<compile_context>
chip_gen: v5e
topology: v5e:2x2
jax: 0.10.0
libtpu: 0.0.40
codegen_flags: <defaults>
</compile_context>

<pallas_src>
import jax
import jax.numpy as jnp
import numpy as np
from jax.experimental import pallas as pl
from jax.experimental.pallas import tpu as pltpu

_LANE = 128


def _round_up(n, m):
    return -(-n // m) * m


# ----------------------------------------------------------------------------
# VariancePredictor body on a lane-padded (C, L) slab:
#   n_layers x [Conv1d(C,C,K,pad=K//2) -> ReLU -> LayerNorm(channels)] then
#   Conv1d(C,1,1) and mask multiply.
# ----------------------------------------------------------------------------
def _vp_body(x, mask, tapm_ref, w_ref, b_ref, g_ref, beta_ref, ow_ref, ob_ref,
             eps=1e-5):
    f32 = jnp.float32
    bf16 = jnp.bfloat16
    C, L = x.shape
    n_layers, K = w_ref.shape[0], w_ref.shape[1]
    pad = K // 2

    for l in range(n_layers):
        # Conv layer = K accumulated (C,C)@(C,L) MXU matmuls over shifted taps.
        # Shifts are XLU rolls; static boundary masks reproduce zero padding.
        acc = None
        for j in range(K):
            off = j - pad
            if off == 0:
                tap = x.astype(bf16)
            else:
                tap = (pltpu.roll(x, shift=(-off) % L, axis=1)
                       * tapm_ref[j]).astype(bf16)
            contrib = jnp.dot(w_ref[l, j], tap, preferred_element_type=f32)
            acc = contrib if acc is None else acc + contrib
        y = jnp.maximum(acc + b_ref[l], 0.0)                       # bias + ReLU

        # Single-pass LayerNorm stats over the channel (sublane) axis.
        mean = jnp.mean(y, axis=0, keepdims=True)
        meansq = jnp.mean(y * y, axis=0, keepdims=True)
        var = meansq - mean * mean
        x = g_ref[l] * ((y - mean) * jax.lax.rsqrt(var + eps)) + beta_ref[l]
        # TODO(synk): Dropout -> identity (deterministic / eval mode).

    # Conv1d(C,1,1): broadcast multiply + sublane reduce.
    out = jnp.sum(ow_ref[...] * x, axis=0, keepdims=True) + ob_ref[...]
    return out * mask


# ----------------------------------------------------------------------------
# Fused VarianceAdopter kernel — one grid step per batch element.
# ----------------------------------------------------------------------------
def _variance_adopter_kernel(
        x_ref, xmask_ref, ymask_ref, pitch_ref, energy_ref, tgt_ref, path_ref,
        dtap_ref, ptap_ref, etap_ref,
        pcw_ref, pcb_ref, ecw_ref, ecb_ref,
        dw_ref, db_ref, dg_ref, dbe_ref, dow_ref, dob_ref,
        pw_ref, pb_ref, pg_ref, pbe_ref, pow_ref, pob_ref,
        ew_ref, eb_ref, eg_ref, ebe_ref, eow_ref, eob_ref,
        xout_ref, dur_ref, pe_ref):
    f32 = jnp.float32
    x = x_ref[...]                                      # (C, Tp) f32
    path = path_ref[...]                                # (Tp, Dp) f32 (0/1)

    # --- duration predictor on the encoder features ---------------------------
    dur_ref[...] = _vp_body(x, xmask_ref[...], dtap_ref,
                            dw_ref, db_ref, dg_ref, dbe_ref, dow_ref, dob_ref)

    # --- Conv1d(1,C,1) expand convs: VPU broadcast-FMA on the (1,Tp) rows ------
    p_pre = pcw_ref[...] * pitch_ref[...] + pcb_ref[...]     # (C, Tp)
    e_pre = ecw_ref[...] * energy_ref[...] + ecb_ref[...]    # (C, Tp)

    # --- length regulation: f32 MXU matmuls against the 0/1 path (near-exact) --
    x_reg = jnp.dot(x, path, preferred_element_type=f32)     # (C, Dp)
    p_reg = jnp.dot(p_pre, path, preferred_element_type=f32)
    e_reg = jnp.dot(e_pre, path, preferred_element_type=f32)

    xout_ref[...] = x_reg + tgt_ref[...]                     # + tgt_pitch+tgt_energy

    # --- pitch / energy predictors; pack both 1-row outputs into one slab -----
    ymask = ymask_ref[...]
    p_out = _vp_body(p_reg, ymask, ptap_ref, pw_ref, pb_ref, pg_ref, pbe_ref,
                     pow_ref, pob_ref)
    e_out = _vp_body(e_reg, ymask, etap_ref, ew_ref, eb_ref, eg_ref, ebe_ref,
                     eow_ref, eob_ref)
    pe_ref[...] = jnp.concatenate([p_out, e_out], axis=0)    # (2, Dp)


# ----------------------------------------------------------------------------
# Wrapper: trace-time layout plumbing (lane padding, bf16 weight casts),
# one pallas_call gridded over the batch, unpad / split outputs.
# ----------------------------------------------------------------------------
def _prep_predictor_params(p):
    convw, convb, gamma, beta, outw, outb = p
    f32 = jnp.float32
    return (convw.astype(jnp.bfloat16),          # (n_layers, K, C, C)  MXU weights
            convb.astype(f32),                   # (n_layers, C, 1)
            gamma.astype(f32),                   # (n_layers, C, 1)
            beta.astype(f32),                    # (n_layers, C, 1)
            outw.reshape(-1, 1).astype(f32),     # (C, 1)
            outb.astype(f32))                    # (1, 1)


def _tap_masks(kernel_size, valid_len, padded_len):
    """(K,1,padded_len) masks: tap j is valid at position t iff t+j-pad lies in
    [0, valid_len) — reproduces Conv1d zero padding under a circular roll."""
    pad = kernel_size // 2
    pos = np.arange(padded_len)
    m = np.stack([((pos + (j - pad) >= 0) & (pos + (j - pad) < valid_len))
                  .astype(np.float32) for j in range(kernel_size)])
    return jnp.asarray(m[:, None, :])


def variance_adopter_forward(params, x, x_mask, y_mask, pitch, tgt_pitch,
                             energy, tgt_energy, path):
    f32 = jnp.float32
    B, C, T = x.shape
    D = path.shape[2]
    Tp = _round_up(T, _LANE)
    Dp = _round_up(D, _LANE)

    def _pad_last(a, L):
        a = a.astype(f32)
        return jnp.pad(a, [(0, 0)] * (a.ndim - 1) + [(0, L - a.shape[-1])])

    x_p = _pad_last(x, Tp)                                   # (B, C, Tp)
    xm_p = _pad_last(x_mask, Tp)                             # (B, 1, Tp)
    ym_p = _pad_last(y_mask, Dp)                             # (B, 1, Dp)
    pit_p = _pad_last(pitch, Tp)                             # (B, 1, Tp)
    ene_p = _pad_last(energy, Tp)                            # (B, 1, Tp)
    tgt_p = _pad_last(tgt_pitch + tgt_energy, Dp)            # (B, 1, Dp)
    path_p = jnp.pad(path.astype(f32), ((0, 0), (0, Tp - T), (0, Dp - D)))

    dur_prm = _prep_predictor_params(params["duration"])
    pit_prm = _prep_predictor_params(params["pitch"])
    ene_prm = _prep_predictor_params(params["energy"])
    dur_k = params["duration"][0].shape[1]
    pit_k = params["pitch"][0].shape[1]
    ene_k = params["energy"][0].shape[1]

    inputs = (
        x_p, xm_p, ym_p, pit_p, ene_p, tgt_p, path_p,
        _tap_masks(dur_k, T, Tp), _tap_masks(pit_k, D, Dp),
        _tap_masks(ene_k, D, Dp),
        params["pitch_conv_w"].astype(f32), params["pitch_conv_b"].astype(f32),
        params["energy_conv_w"].astype(f32), params["energy_conv_b"].astype(f32),
        *dur_prm, *pit_prm, *ene_prm,
    )

    def _batch_spec(a):                 # per-batch block, leading dim squeezed
        nd = a.ndim
        return pl.BlockSpec((None,) + a.shape[1:],
                            lambda b, _nd=nd: (b,) + (0,) * (_nd - 1))

    def _const_spec(a):                 # weights/masks: same block every step
        nd = a.ndim
        return pl.BlockSpec(a.shape, lambda b, _nd=nd: (0,) * _nd)

    in_specs = ([_batch_spec(a) for a in inputs[:7]]
                + [_const_spec(a) for a in inputs[7:]])

    out_shape = (jax.ShapeDtypeStruct((B, C, Dp), f32),      # regulated x
                 jax.ShapeDtypeStruct((B, 1, Tp), f32),      # duration
                 jax.ShapeDtypeStruct((B, 2, Dp), f32))      # pitch|energy packed
    out_specs = (pl.BlockSpec((None, C, Dp), lambda b: (b, 0, 0)),
                 pl.BlockSpec((None, 1, Tp), lambda b: (b, 0, 0)),
                 pl.BlockSpec((None, 2, Dp), lambda b: (b, 0, 0)))

    x_slab, dur_slab, pe_slab = pl.pallas_call(
        _variance_adopter_kernel,
        out_shape=out_shape,
        grid=(B,),
        in_specs=in_specs,
        out_specs=out_specs,
        compiler_params=pltpu.CompilerParams(
            dimension_semantics=("parallel",)),
    )(*inputs)

    x_out = x_slab[:, :, :D]                                 # (B, C, D)
    dur_pred = dur_slab[:, :, :T]                            # (B, 1, T)
    p_out = pe_slab[:, 0:1, :D]                              # (B, 1, D)
    e_out = pe_slab[:, 1:2, :D]                              # (B, 1, D)
    return x_out, (dur_pred, p_out, e_out)


# ----------------------------------------------------------------------------
# Pure-JAX reference (for verification)
# ----------------------------------------------------------------------------
def _vp_ref(x, mask, params, kernel_size, eps=1e-5):
    convw, convb, gamma, beta, outw, outb = params
    n_layers = convw.shape[0]
    pad = kernel_size // 2
    for l in range(n_layers):
        w = jnp.transpose(convw[l], (1, 2, 0))               # (O, I, K)
        y = jax.lax.conv_general_dilated(
            x, w, (1,), [(pad, pad)],
            dimension_numbers=("NCH", "OIH", "NCH"))
        y = y + convb[l][None]
        y = jnp.maximum(y, 0.0)
        mean = y.mean(axis=1, keepdims=True)
        var = ((y - mean) ** 2).mean(axis=1, keepdims=True)
        yhat = (y - mean) / jnp.sqrt(var + eps)
        x = gamma[l][None] * yhat + beta[l][None]
    out = jnp.einsum("oc,bct->bot", outw, x) + outb[0, 0]
    return out * mask


def variance_adopter_ref(params, x, x_mask, y_mask, pitch, tgt_pitch,
                         energy, tgt_energy, path):
    dur_pred = _vp_ref(x, x_mask, params["duration"], 3)
    x_out = jnp.einsum("bct,btd->bcd", x, path) + tgt_pitch + tgt_energy
    p = pitch * params["pitch_conv_w"][None] + params["pitch_conv_b"][None]
    p = jnp.einsum("bct,btd->bcd", p, path)
    p = _vp_ref(p, y_mask, params["pitch"], 5)
    e = energy * params["energy_conv_w"][None] + params["energy_conv_b"][None]
    e = jnp.einsum("bct,btd->bcd", e, path)
    e = _vp_ref(e, y_mask, params["energy"], 3)
    return x_out, (dur_pred, p, e)


# ----------------------------------------------------------------------------
# Deterministic parameter initialization
# ----------------------------------------------------------------------------
def init_variance_predictor(key, channels, n_layers, kernel_size):
    k = jax.random.split(key, 6)
    convw = 0.1 * jax.random.normal(k[0], (n_layers, kernel_size, channels, channels), jnp.float32)
    convb = 0.1 * jax.random.normal(k[1], (n_layers, channels, 1), jnp.float32)
    gamma = 1.0 + 0.1 * jax.random.normal(k[2], (n_layers, channels, 1), jnp.float32)
    beta = 0.1 * jax.random.normal(k[3], (n_layers, channels, 1), jnp.float32)
    outw = 0.1 * jax.random.normal(k[4], (1, channels), jnp.float32)
    outb = 0.1 * jax.random.normal(k[5], (1, 1), jnp.float32)
    return (convw, convb, gamma, beta, outw, outb)


def init_params(key, channels):
    k = jax.random.split(key, 7)
    return {
        "duration": init_variance_predictor(k[0], channels, 2, 3),
        "pitch_conv_w": 0.1 * jax.random.normal(k[1], (channels, 1), jnp.float32),
        "pitch_conv_b": 0.1 * jax.random.normal(k[2], (channels, 1), jnp.float32),
        "pitch": init_variance_predictor(k[3], channels, 5, 5),
        "energy_conv_w": 0.1 * jax.random.normal(k[4], (channels, 1), jnp.float32),
        "energy_conv_b": 0.1 * jax.random.normal(k[5], (channels, 1), jnp.float32),
        "energy": init_variance_predictor(k[6], channels, 2, 3),
    }


if __name__ == "__main__":
    B, C, T, D = 2, 16, 16, 32   # batch, channels, src len, tgt len

    root = jax.random.PRNGKey(0)
    kp, kx, kpi, ke, ktp, kte = jax.random.split(root, 6)
    params = init_params(kp, C)

    x = jax.random.normal(kx, (B, C, T), jnp.float32)
    pitch = jax.random.normal(kpi, (B, 1, T), jnp.float32)
    energy = jax.random.normal(ke, (B, 1, T), jnp.float32)
    tgt_pitch = jax.random.normal(ktp, (B, 1, D), jnp.float32)
    tgt_energy = jax.random.normal(kte, (B, 1, D), jnp.float32)

    # masks: batch 0 fully valid, batch 1 partially valid
    x_lens = jnp.array([T, 12], jnp.int32)
    y_lens = jnp.array([D, 24], jnp.int32)
    x_mask = (jnp.arange(T)[None, :] < x_lens[:, None]).astype(jnp.float32)[:, None, :]
    y_mask = (jnp.arange(D)[None, :] < y_lens[:, None]).astype(jnp.float32)[:, None, :]

    # simple monotonic expansion path: each source frame -> 2 target frames
    path = (jnp.arange(D)[None, :] // (D // T) == jnp.arange(T)[:, None]).astype(jnp.float32)
    path = jnp.broadcast_to(path[None], (B, T, D))

    fwd = jax.jit(variance_adopter_forward)
    x_out, (dur_pred, p_out, e_out) = fwd(params, x, x_mask, y_mask, pitch,
                                          tgt_pitch, energy, tgt_energy, path)
    jax.block_until_ready((x_out, dur_pred, p_out, e_out))

    # verify against the pure-JAX f32 reference (predictor matmuls run bf16 on
    # the MXU with f32 accumulation, hence the loose tolerances; x regulation
    # itself stays f32).
    rx, (rdur, rp, re) = variance_adopter_ref(params, x, x_mask, y_mask, pitch,
                                              tgt_pitch, energy, tgt_energy, path)
    np.testing.assert_allclose(np.asarray(x_out), np.asarray(rx), rtol=5e-2, atol=5e-2)
    np.testing.assert_allclose(np.asarray(dur_pred), np.asarray(rdur), rtol=5e-2, atol=5e-2)
    np.testing.assert_allclose(np.asarray(p_out), np.asarray(rp), rtol=5e-2, atol=5e-2)
    np.testing.assert_allclose(np.asarray(e_out), np.asarray(re), rtol=5e-2, atol=5e-2)

    print("KERNEL_OK")
</pallas_src>

<mosaic_0001>
module attributes {stable_mosaic.version = 11 : i64} {
  func.func @_variance_adopter_kernel(%arg0: i32, %arg1: memref<1x16x128xf32, #tpu.memory_space<vmem>>, %arg2: memref<1x1x128xf32, #tpu.memory_space<vmem>>, %arg3: memref<1x1x128xf32, #tpu.memory_space<vmem>>, %arg4: memref<1x1x128xf32, #tpu.memory_space<vmem>>, %arg5: memref<1x1x128xf32, #tpu.memory_space<vmem>>, %arg6: memref<1x1x128xf32, #tpu.memory_space<vmem>>, %arg7: memref<1x128x128xf32, #tpu.memory_space<vmem>>, %arg8: memref<3x1x128xf32, #tpu.memory_space<vmem>>, %arg9: memref<5x1x128xf32, #tpu.memory_space<vmem>>, %arg10: memref<3x1x128xf32, #tpu.memory_space<vmem>>, %arg11: memref<16x1xf32, #tpu.memory_space<vmem>>, %arg12: memref<16x1xf32, #tpu.memory_space<vmem>>, %arg13: memref<16x1xf32, #tpu.memory_space<vmem>>, %arg14: memref<16x1xf32, #tpu.memory_space<vmem>>, %arg15: memref<2x3x16x16xbf16, #tpu.memory_space<vmem>>, %arg16: memref<2x16x1xf32, #tpu.memory_space<vmem>>, %arg17: memref<2x16x1xf32, #tpu.memory_space<vmem>>, %arg18: memref<2x16x1xf32, #tpu.memory_space<vmem>>, %arg19: memref<16x1xf32, #tpu.memory_space<vmem>>, %arg20: memref<1x1xf32, #tpu.memory_space<vmem>>, %arg21: memref<5x5x16x16xbf16, #tpu.memory_space<vmem>>, %arg22: memref<5x16x1xf32, #tpu.memory_space<vmem>>, %arg23: memref<5x16x1xf32, #tpu.memory_space<vmem>>, %arg24: memref<5x16x1xf32, #tpu.memory_space<vmem>>, %arg25: memref<16x1xf32, #tpu.memory_space<vmem>>, %arg26: memref<1x1xf32, #tpu.memory_space<vmem>>, %arg27: memref<2x3x16x16xbf16, #tpu.memory_space<vmem>>, %arg28: memref<2x16x1xf32, #tpu.memory_space<vmem>>, %arg29: memref<2x16x1xf32, #tpu.memory_space<vmem>>, %arg30: memref<2x16x1xf32, #tpu.memory_space<vmem>>, %arg31: memref<16x1xf32, #tpu.memory_space<vmem>>, %arg32: memref<1x1xf32, #tpu.memory_space<vmem>>, %arg33: memref<1x16x128xf32, #tpu.memory_space<vmem>>, %arg34: memref<1x1x128xf32, #tpu.memory_space<vmem>>, %arg35: memref<1x2x128xf32, #tpu.memory_space<vmem>>) attributes {dimension_semantics = [#tpu.dimension_semantics<parallel>], iteration_bounds = array<i64: 2>, scalar_prefetch = 0 : i64, scratch_operands = 0 : i64, tpu.core_type = #tpu.core_type<tc>, window_params = [{transform_indices = @transform_0, window_bounds = array<i64: 1, 16, 128>}, {transform_indices = @transform_1, window_bounds = array<i64: 1, 1, 128>}, {transform_indices = @transform_2, window_bounds = array<i64: 1, 1, 128>}, {transform_indices = @transform_3, window_bounds = array<i64: 1, 1, 128>}, {transform_indices = @transform_4, window_bounds = array<i64: 1, 1, 128>}, {transform_indices = @transform_5, window_bounds = array<i64: 1, 1, 128>}, {transform_indices = @transform_6, window_bounds = array<i64: 1, 128, 128>}, {pipeline_mode = #tpu.pipeline_mode<synchronous>, transform_indices = @transform_7, window_bounds = array<i64: 3, 1, 128>}, {pipeline_mode = #tpu.pipeline_mode<synchronous>, transform_indices = @transform_8, window_bounds = array<i64: 5, 1, 128>}, {pipeline_mode = #tpu.pipeline_mode<synchronous>, transform_indices = @transform_9, window_bounds = array<i64: 3, 1, 128>}, {pipeline_mode = #tpu.pipeline_mode<synchronous>, transform_indices = @transform_10, window_bounds = array<i64: 16, 1>}, {pipeline_mode = #tpu.pipeline_mode<synchronous>, transform_indices = @transform_11, window_bounds = array<i64: 16, 1>}, {pipeline_mode = #tpu.pipeline_mode<synchronous>, transform_indices = @transform_12, window_bounds = array<i64: 16, 1>}, {pipeline_mode = #tpu.pipeline_mode<synchronous>, transform_indices = @transform_13, window_bounds = array<i64: 16, 1>}, {pipeline_mode = #tpu.pipeline_mode<synchronous>, transform_indices = @transform_14, window_bounds = array<i64: 2, 3, 16, 16>}, {pipeline_mode = #tpu.pipeline_mode<synchronous>, transform_indices = @transform_15, window_bounds = array<i64: 2, 16, 1>}, {pipeline_mode = #tpu.pipeline_mode<synchronous>, transform_indices = @transform_16, window_bounds = array<i64: 2, 16, 1>}, {pipeline_mode = #tpu.pipeline_mode<synchronous>, transform_indices = @transform_17, window_bounds = array<i64: 2, 16, 1>}, {pipeline_mode = #tpu.pipeline_mode<synchronous>, transform_indices = @transform_18, window_bounds = array<i64: 16, 1>}, {pipeline_mode = #tpu.pipeline_mode<synchronous>, transform_indices = @transform_19, window_bounds = array<i64: 1, 1>}, {pipeline_mode = #tpu.pipeline_mode<synchronous>, transform_indices = @transform_20, window_bounds = array<i64: 5, 5, 16, 16>}, {pipeline_mode = #tpu.pipeline_mode<synchronous>, transform_indices = @transform_21, window_bounds = array<i64: 5, 16, 1>}, {pipeline_mode = #tpu.pipeline_mode<synchronous>, transform_indices = @transform_22, window_bounds = array<i64: 5, 16, 1>}, {pipeline_mode = #tpu.pipeline_mode<synchronous>, transform_indices = @transform_23, window_bounds = array<i64: 5, 16, 1>}, {pipeline_mode = #tpu.pipeline_mode<synchronous>, transform_indices = @transform_24, window_bounds = array<i64: 16, 1>}, {pipeline_mode = #tpu.pipeline_mode<synchronous>, transform_indices = @transform_25, window_bounds = array<i64: 1, 1>}, {pipeline_mode = #tpu.pipeline_mode<synchronous>, transform_indices = @transform_26, window_bounds = array<i64: 2, 3, 16, 16>}, {pipeline_mode = #tpu.pipeline_mode<synchronous>, transform_indices = @transform_27, window_bounds = array<i64: 2, 16, 1>}, {pipeline_mode = #tpu.pipeline_mode<synchronous>, transform_indices = @transform_28, window_bounds = array<i64: 2, 16, 1>}, {pipeline_mode = #tpu.pipeline_mode<synchronous>, transform_indices = @transform_29, window_bounds = array<i64: 2, 16, 1>}, {pipeline_mode = #tpu.pipeline_mode<synchronous>, transform_indices = @transform_30, window_bounds = array<i64: 16, 1>}, {pipeline_mode = #tpu.pipeline_mode<synchronous>, transform_indices = @transform_31, window_bounds = array<i64: 1, 1>}, {transform_indices = @transform_32, window_bounds = array<i64: 1, 16, 128>}, {transform_indices = @transform_33, window_bounds = array<i64: 1, 1, 128>}, {transform_indices = @transform_34, window_bounds = array<i64: 1, 2, 128>}]} {
    %c0 = arith.constant 0 : index
    %c0_0 = arith.constant 0 : index
    %c0_1 = arith.constant 0 : index
    %0 = vector.load %arg1[%c0, %c0_0, %c0_1] : memref<1x16x128xf32, #tpu.memory_space<vmem>>, vector<1x16x128xf32>
    %1 = vector.shape_cast %0 : vector<1x16x128xf32> to vector<16x128xf32>
    %c0_2 = arith.constant 0 : index
    %c0_3 = arith.constant 0 : index
    %c0_4 = arith.constant 0 : index
    %2 = vector.load %arg7[%c0_2, %c0_3, %c0_4] : memref<1x128x128xf32, #tpu.memory_space<vmem>>, vector<1x128x128xf32>
    %3 = vector.shape_cast %2 : vector<1x128x128xf32> to vector<128x128xf32>
    %c0_5 = arith.constant 0 : index
    %c0_6 = arith.constant 0 : index
    %c0_7 = arith.constant 0 : index
    %4 = vector.load %arg2[%c0_5, %c0_6, %c0_7] : memref<1x1x128xf32, #tpu.memory_space<vmem>>, vector<1x1x128xf32>
    %5 = vector.shape_cast %4 : vector<1x1x128xf32> to vector<1x128xf32>
    %c1_i32 = arith.constant 1 : i32
    %6 = tpu.dynamic_rotate %1 by %c1_i32 dim 1 : vector<16x128xf32>, i32 -> vector<16x128xf32>
    %c0_8 = arith.constant 0 : index
    %c0_9 = arith.constant 0 : index
    %c0_10 = arith.constant 0 : index
    %7 = vector.load %arg8[%c0_8, %c0_9, %c0_10] : memref<3x1x128xf32, #tpu.memory_space<vmem>>, vector<1x1x128xf32>
    %8 = vector.shape_cast %7 : vector<1x1x128xf32> to vector<1x128xf32>
    %9 = vector.broadcast %8 : vector<1x128xf32> to vector<16x128xf32>
    %10 = arith.mulf %6, %9 : vector<16x128xf32>
    %11 = arith.truncf %10 : vector<16x128xf32> to vector<16x128xbf16>
    %c0_11 = arith.constant 0 : index
    %c0_12 = arith.constant 0 : index
    %c0_13 = arith.constant 0 : index
    %c0_14 = arith.constant 0 : index
    %12 = vector.load %arg15[%c0_11, %c0_12, %c0_13, %c0_14] : memref<2x3x16x16xbf16, #tpu.memory_space<vmem>>, vector<1x1x16x16xbf16>
    %13 = vector.shape_cast %12 : vector<1x1x16x16xbf16> to vector<16x16xbf16>
    %cst = arith.constant dense<0.000000e+00> : vector<16x128xf32>
    %14 = tpu.matmul %13, %11, %cst {dimension_numbers = #tpu.dot_dimension_numbers<[1], [0], [0], [1], [0, 0, 1, 1], [], []>} : vector<16x16xbf16>, vector<16x128xbf16>, vector<16x128xf32> -> vector<16x128xf32>
    %15 = arith.truncf %1 : vector<16x128xf32> to vector<16x128xbf16>
    %c0_15 = arith.constant 0 : index
    %c1 = arith.constant 1 : index
    %c0_16 = arith.constant 0 : index
    %c0_17 = arith.constant 0 : index
    %16 = vector.load %arg15[%c0_15, %c1, %c0_16, %c0_17] : memref<2x3x16x16xbf16, #tpu.memory_space<vmem>>, vector<1x1x16x16xbf16>
    %17 = vector.shape_cast %16 : vector<1x1x16x16xbf16> to vector<16x16xbf16>
    %cst_18 = arith.constant dense<0.000000e+00> : vector<16x128xf32>
    %18 = tpu.matmul %17, %15, %cst_18 {dimension_numbers = #tpu.dot_dimension_numbers<[1], [0], [0], [1], [0, 0, 1, 1], [], []>} : vector<16x16xbf16>, vector<16x128xbf16>, vector<16x128xf32> -> vector<16x128xf32>
    %19 = arith.addf %14, %18 : vector<16x128xf32>
    %c127_i32 = arith.constant 127 : i32
    %20 = tpu.dynamic_rotate %1 by %c127_i32 dim 1 : vector<16x128xf32>, i32 -> vector<16x128xf32>
    %c2 = arith.constant 2 : index
    %c0_19 = arith.constant 0 : index
    %c0_20 = arith.constant 0 : index
    %21 = vector.load %arg8[%c2, %c0_19, %c0_20] : memref<3x1x128xf32, #tpu.memory_space<vmem>>, vector<1x1x128xf32>
    %22 = vector.shape_cast %21 : vector<1x1x128xf32> to vector<1x128xf32>
    %23 = vector.broadcast %22 : vector<1x128xf32> to vector<16x128xf32>
    %24 = arith.mulf %20, %23 : vector<16x128xf32>
    %25 = arith.truncf %24 : vector<16x128xf32> to vector<16x128xbf16>
    %c0_21 = arith.constant 0 : index
    %c2_22 = arith.constant 2 : index
    %c0_23 = arith.constant 0 : index
    %c0_24 = arith.constant 0 : index
    %26 = vector.load %arg15[%c0_21, %c2_22, %c0_23, %c0_24] : memref<2x3x16x16xbf16, #tpu.memory_space<vmem>>, vector<1x1x16x16xbf16>
    %27 = vector.shape_cast %26 : vector<1x1x16x16xbf16> to vector<16x16xbf16>
    %cst_25 = arith.constant dense<0.000000e+00> : vector<16x128xf32>
    %28 = tpu.matmul %27, %25, %cst_25 {dimension_numbers = #tpu.dot_dimension_numbers<[1], [0], [0], [1], [0, 0, 1, 1], [], []>} : vector<16x16xbf16>, vector<16x128xbf16>, vector<16x128xf32> -> vector<16x128xf32>
    %29 = arith.addf %19, %28 : vector<16x128xf32>
    %c0_26 = arith.constant 0 : index
    %c0_27 = arith.constant 0 : index
    %c0_28 = arith.constant 0 : index
    %30 = vector.load %arg16[%c0_26, %c0_27, %c0_28] : memref<2x16x1xf32, #tpu.memory_space<vmem>>, vector<1x16x1xf32>
    %31 = vector.shape_cast %30 : vector<1x16x1xf32> to vector<16x1xf32>
    %32 = vector.broadcast %31 : vector<16x1xf32> to vector<16x128xf32>
    %33 = arith.addf %29, %32 : vector<16x128xf32>
    %cst_29 = arith.constant 0.000000e+00 : f32
    %34 = vector.broadcast %cst_29 : f32 to vector<16x128xf32>
    %35 = arith.maximumf %33, %34 : vector<16x128xf32>
    %cst_30 = arith.constant dense<0.000000e+00> : vector<128xf32>
    %36 = vector.multi_reduction <add>, %35, %cst_30 [0] : vector<16x128xf32> to vector<128xf32>
    %37 = vector.shape_cast %36 : vector<128xf32> to vector<1x128xf32>
    %cst_31 = arith.constant 1.600000e+01 : f32
    %38 = vector.broadcast %cst_31 : f32 to vector<1x128xf32>
    %39 = arith.divf %37, %38 : vector<1x128xf32>
    %40 = arith.mulf %35, %35 : vector<16x128xf32>
    %cst_32 = arith.constant dense<0.000000e+00> : vector<128xf32>
    %41 = vector.multi_reduction <add>, %40, %cst_32 [0] : vector<16x128xf32> to vector<128xf32>
    %42 = vector.shape_cast %41 : vector<128xf32> to vector<1x128xf32>
    %cst_33 = arith.constant 1.600000e+01 : f32
    %43 = vector.broadcast %cst_33 : f32 to vector<1x128xf32>
    %44 = arith.divf %42, %43 : vector<1x128xf32>
    %45 = arith.mulf %39, %39 : vector<1x128xf32>
    %46 = arith.subf %44, %45 : vector<1x128xf32>
    %c0_34 = arith.constant 0 : index
    %c0_35 = arith.constant 0 : index
    %c0_36 = arith.constant 0 : index
    %47 = vector.load %arg17[%c0_34, %c0_35, %c0_36] : memref<2x16x1xf32, #tpu.memory_space<vmem>>, vector<1x16x1xf32>
    %48 = vector.shape_cast %47 : vector<1x16x1xf32> to vector<16x1xf32>
    %49 = vector.broadcast %39 : vector<1x128xf32> to vector<16x128xf32>
    %50 = arith.subf %35, %49 : vector<16x128xf32>
    %cst_37 = arith.constant 9.99999974E-6 : f32
    %51 = vector.broadcast %cst_37 : f32 to vector<1x128xf32>
    %52 = arith.addf %46, %51 : vector<1x128xf32>
    %53 = math.rsqrt %52 : vector<1x128xf32>
    %54 = vector.broadcast %53 : vector<1x128xf32> to vector<16x128xf32>
    %55 = arith.mulf %50, %54 : vector<16x128xf32>
    %56 = vector.broadcast %48 : vector<16x1xf32> to vector<16x128xf32>
    %57 = arith.mulf %56, %55 : vector<16x128xf32>
    %c0_38 = arith.constant 0 : index
    %c0_39 = arith.constant 0 : index
    %c0_40 = arith.constant 0 : index
    %58 = vector.load %arg18[%c0_38, %c0_39, %c0_40] : memref<2x16x1xf32, #tpu.memory_space<vmem>>, vector<1x16x1xf32>
    %59 = vector.shape_cast %58 : vector<1x16x1xf32> to vector<16x1xf32>
    %60 = vector.broadcast %59 : vector<16x1xf32> to vector<16x128xf32>
    %61 = arith.addf %57, %60 : vector<16x128xf32>
    %c1_i32_41 = arith.constant 1 : i32
    %62 = tpu.dynamic_rotate %61 by %c1_i32_41 dim 1 : vector<16x128xf32>, i32 -> vector<16x128xf32>
    %c0_42 = arith.constant 0 : index
    %c0_43 = arith.constant 0 : index
    %c0_44 = arith.constant 0 : index
    %63 = vector.load %arg8[%c0_42, %c0_43, %c0_44] : memref<3x1x128xf32, #tpu.memory_space<vmem>>, vector<1x1x128xf32>
    %64 = vector.shape_cast %63 : vector<1x1x128xf32> to vector<1x128xf32>
    %65 = vector.broadcast %64 : vector<1x128xf32> to vector<16x128xf32>
    %66 = arith.mulf %62, %65 : vector<16x128xf32>
    %67 = arith.truncf %66 : vector<16x128xf32> to vector<16x128xbf16>
    %c1_45 = arith.constant 1 : index
    %c0_46 = arith.constant 0 : index
    %c0_47 = arith.constant 0 : index
    %c0_48 = arith.constant 0 : index
    %68 = vector.load %arg15[%c1_45, %c0_46, %c0_47, %c0_48] : memref<2x3x16x16xbf16, #tpu.memory_space<vmem>>, vector<1x1x16x16xbf16>
    %69 = vector.shape_cast %68 : vector<1x1x16x16xbf16> to vector<16x16xbf16>
    %cst_49 = arith.constant dense<0.000000e+00> : vector<16x128xf32>
    %70 = tpu.matmul %69, %67, %cst_49 {dimension_numbers = #tpu.dot_dimension_numbers<[1], [0], [0], [1], [0, 0, 1, 1], [], []>} : vector<16x16xbf16>, vector<16x128xbf16>, vector<16x128xf32> -> vector<16x128xf32>
    %71 = arith.truncf %61 : vector<16x128xf32> to vector<16x128xbf16>
    %c1_50 = arith.constant 1 : index
    %c1_51 = arith.constant 1 : index
    %c0_52 = arith.constant 0 : index
    %c0_53 = arith.constant 0 : index
    %72 = vector.load %arg15[%c1_50, %c1_51, %c0_52, %c0_53] : memref<2x3x16x16xbf16, #tpu.memory_space<vmem>>, vector<1x1x16x16xbf16>
    %73 = vector.shape_cast %72 : vector<1x1x16x16xbf16> to vector<16x16xbf16>
    %cst_54 = arith.constant dense<0.000000e+00> : vector<16x128xf32>
    %74 = tpu.matmul %73, %71, %cst_54 {dimension_numbers = #tpu.dot_dimension_numbers<[1], [0], [0], [1], [0, 0, 1, 1], [], []>} : vector<16x16xbf16>, vector<16x128xbf16>, vector<16x128xf32> -> vector<16x128xf32>
    %75 = arith.addf %70, %74 : vector<16x128xf32>
    %c127_i32_55 = arith.constant 127 : i32
    %76 = tpu.dynamic_rotate %61 by %c127_i32_55 dim 1 : vector<16x128xf32>, i32 -> vector<16x128xf32>
    %c2_56 = arith.constant 2 : index
    %c0_57 = arith.constant 0 : index
    %c0_58 = arith.constant 0 : index
    %77 = vector.load %arg8[%c2_56, %c0_57, %c0_58] : memref<3x1x128xf32, #tpu.memory_space<vmem>>, vector<1x1x128xf32>
    %78 = vector.shape_cast %77 : vector<1x1x128xf32> to vector<1x128xf32>
    %79 = vector.broadcast %78 : vector<1x128xf32> to vector<16x128xf32>
    %80 = arith.mulf %76, %79 : vector<16x128xf32>
    %81 = arith.truncf %80 : vector<16x128xf32> to vector<16x128xbf16>
    %c1_59 = arith.constant 1 : index
    %c2_60 = arith.constant 2 : index
    %c0_61 = arith.constant 0 : index
    %c0_62 = arith.constant 0 : index
    %82 = vector.load %arg15[%c1_59, %c2_60, %c0_61, %c0_62] : memref<2x3x16x16xbf16, #tpu.memory_space<vmem>>, vector<1x1x16x16xbf16>
    %83 = vector.shape_cast %82 : vector<1x1x16x16xbf16> to vector<16x16xbf16>
    %cst_63 = arith.constant dense<0.000000e+00> : vector<16x128xf32>
    %84 = tpu.matmul %83, %81, %cst_63 {dimension_numbers = #tpu.dot_dimension_numbers<[1], [0], [0], [1], [0, 0, 1, 1], [], []>} : vector<16x16xbf16>, vector<16x128xbf16>, vector<16x128xf32> -> vector<16x128xf32>
    %85 = arith.addf %75, %84 : vector<16x128xf32>
    %c1_64 = arith.constant 1 : index
    %c0_65 = arith.constant 0 : index
    %c0_66 = arith.constant 0 : index
    %86 = vector.load %arg16[%c1_64, %c0_65, %c0_66] : memref<2x16x1xf32, #tpu.memory_space<vmem>>, vector<1x16x1xf32>
    %87 = vector.shape_cast %86 : vector<1x16x1xf32> to vector<16x1xf32>
    %88 = vector.broadcast %87 : vector<16x1xf32> to vector<16x128xf32>
    %89 = arith.addf %85, %88 : vector<16x128xf32>
    %cst_67 = arith.constant 0.000000e+00 : f32
    %90 = vector.broadcast %cst_67 : f32 to vector<16x128xf32>
    %91 = arith.maximumf %89, %90 : vector<16x128xf32>
    %cst_68 = arith.constant dense<0.000000e+00> : vector<128xf32>
    %92 = vector.multi_reduction <add>, %91, %cst_68 [0] : vector<16x128xf32> to vector<128xf32>
    %93 = vector.shape_cast %92 : vector<128xf32> to vector<1x128xf32>
    %cst_69 = arith.constant 1.600000e+01 : f32
    %94 = vector.broadcast %cst_69 : f32 to vector<1x128xf32>
    %95 = arith.divf %93, %94 : vector<1x128xf32>
    %96 = arith.mulf %91, %91 : vector<16x128xf32>
    %cst_70 = arith.constant dense<0.000000e+00> : vector<128xf32>
    %97 = vector.multi_reduction <add>, %96, %cst_70 [0] : vector<16x128xf32> to vector<128xf32>
    %98 = vector.shape_cast %97 : vector<128xf32> to vector<1x128xf32>
    %cst_71 = arith.constant 1.600000e+01 : f32
    %99 = vector.broadcast %cst_71 : f32 to vector<1x128xf32>
    %100 = arith.divf %98, %99 : vector<1x128xf32>
    %101 = arith.mulf %95, %95 : vector<1x128xf32>
    %102 = arith.subf %100, %101 : vector<1x128xf32>
    %c1_72 = arith.constant 1 : index
    %c0_73 = arith.constant 0 : index
    %c0_74 = arith.constant 0 : index
    %103 = vector.load %arg17[%c1_72, %c0_73, %c0_74] : memref<2x16x1xf32, #tpu.memory_space<vmem>>, vector<1x16x1xf32>
    %104 = vector.shape_cast %103 : vector<1x16x1xf32> to vector<16x1xf32>
    %105 = vector.broadcast %95 : vector<1x128xf32> to vector<16x128xf32>
    %106 = arith.subf %91, %105 : vector<16x128xf32>
    %cst_75 = arith.constant 9.99999974E-6 : f32
    %107 = vector.broadcast %cst_75 : f32 to vector<1x128xf32>
    %108 = arith.addf %102, %107 : vector<1x128xf32>
    %109 = math.rsqrt %108 : vector<1x128xf32>
    %110 = vector.broadcast %109 : vector<1x128xf32> to vector<16x128xf32>
    %111 = arith.mulf %106, %110 : vector<16x128xf32>
    %112 = vector.broadcast %104 : vector<16x1xf32> to vector<16x128xf32>
    %113 = arith.mulf %112, %111 : vector<16x128xf32>
    %c1_76 = arith.constant 1 : index
    %c0_77 = arith.constant 0 : index
    %c0_78 = arith.constant 0 : index
    %114 = vector.load %arg18[%c1_76, %c0_77, %c0_78] : memref<2x16x1xf32, #tpu.memory_space<vmem>>, vector<1x16x1xf32>
    %115 = vector.shape_cast %114 : vector<1x16x1xf32> to vector<16x1xf32>
    %116 = vector.broadcast %115 : vector<16x1xf32> to vector<16x128xf32>
    %117 = arith.addf %113, %116 : vector<16x128xf32>
    %c0_79 = arith.constant 0 : index
    %c0_80 = arith.constant 0 : index
    %118 = vector.load %arg19[%c0_79, %c0_80] : memref<16x1xf32, #tpu.memory_space<vmem>>, vector<16x1xf32>
    %119 = vector.broadcast %118 : vector<16x1xf32> to vector<16x128xf32>
    %120 = arith.mulf %119, %117 : vector<16x128xf32>
    %cst_81 = arith.constant dense<0.000000e+00> : vector<128xf32>
    %121 = vector.multi_reduction <add>, %120, %cst_81 [0] : vector<16x128xf32> to vector<128xf32>
    %122 = vector.shape_cast %121 : vector<128xf32> to vector<1x128xf32>
    %c0_82 = arith.constant 0 : index
    %c0_83 = arith.constant 0 : index
    %123 = vector.load %arg20[%c0_82, %c0_83] : memref<1x1xf32, #tpu.memory_space<vmem>>, vector<1x1xf32>
    %124 = vector.broadcast %123 : vector<1x1xf32> to vector<1x128xf32>
    %125 = arith.addf %122, %124 : vector<1x128xf32>
    %126 = arith.mulf %125, %5 : vector<1x128xf32>
    %c0_84 = arith.constant 0 : index
    %c0_85 = arith.constant 0 : index
    %c0_86 = arith.constant 0 : index
    %127 = vector.load %arg34[%c0_84, %c0_85, %c0_86] : memref<1x1x128xf32, #tpu.memory_space<vmem>>, vector<1x1x128xf32>
    %128 = vector.shape_cast %127 : vector<1x1x128xf32> to vector<1x128xf32>
    %129 = vector.shape_cast %126 : vector<1x128xf32> to vector<1x1x128xf32>
    tpu.vector_store %arg34[%c0_84, %c0_85, %c0_86], %129 {strides = array<i32>} : memref<1x1x128xf32, #tpu.memory_space<vmem>>, vector<1x1x128xf32>,
    %c0_87 = arith.constant 0 : index
    %c0_88 = arith.constant 0 : index
    %130 = vector.load %arg11[%c0_87, %c0_88] : memref<16x1xf32, #tpu.memory_space<vmem>>, vector<16x1xf32>
    %c0_89 = arith.constant 0 : index
    %c0_90 = arith.constant 0 : index
    %c0_91 = arith.constant 0 : index
    %131 = vector.load %arg4[%c0_89, %c0_90, %c0_91] : memref<1x1x128xf32, #tpu.memory_space<vmem>>, vector<1x1x128xf32>
    %132 = vector.shape_cast %131 : vector<1x1x128xf32> to vector<1x128xf32>
    %133 = vector.broadcast %130 : vector<16x1xf32> to vector<16x128xf32>
    %134 = vector.broadcast %132 : vector<1x128xf32> to vector<16x128xf32>
    %135 = arith.mulf %133, %134 : vector<16x128xf32>
    %c0_92 = arith.constant 0 : index
    %c0_93 = arith.constant 0 : index
    %136 = vector.load %arg12[%c0_92, %c0_93] : memref<16x1xf32, #tpu.memory_space<vmem>>, vector<16x1xf32>
    %137 = vector.broadcast %136 : vector<16x1xf32> to vector<16x128xf32>
    %138 = arith.addf %135, %137 : vector<16x128xf32>
    %c0_94 = arith.constant 0 : index
    %c0_95 = arith.constant 0 : index
    %139 = vector.load %arg13[%c0_94, %c0_95] : memref<16x1xf32, #tpu.memory_space<vmem>>, vector<16x1xf32>
    %c0_96 = arith.constant 0 : index
    %c0_97 = arith.constant 0 : index
    %c0_98 = arith.constant 0 : index
    %140 = vector.load %arg5[%c0_96, %c0_97, %c0_98] : memref<1x1x128xf32, #tpu.memory_space<vmem>>, vector<1x1x128xf32>
    %141 = vector.shape_cast %140 : vector<1x1x128xf32> to vector<1x128xf32>
    %142 = vector.broadcast %139 : vector<16x1xf32> to vector<16x128xf32>
    %143 = vector.broadcast %141 : vector<1x128xf32> to vector<16x128xf32>
    %144 = arith.mulf %142, %143 : vector<16x128xf32>
    %c0_99 = arith.constant 0 : index
    %c0_100 = arith.constant 0 : index
    %145 = vector.load %arg14[%c0_99, %c0_100] : memref<16x1xf32, #tpu.memory_space<vmem>>, vector<16x1xf32>
    %146 = vector.broadcast %145 : vector<16x1xf32> to vector<16x128xf32>
    %147 = arith.addf %144, %146 : vector<16x128xf32>
    %cst_101 = arith.constant dense<0.000000e+00> : vector<16x128xf32>
    %148 = tpu.matmul %1, %3, %cst_101 {dimension_numbers = #tpu.dot_dimension_numbers<[1], [0], [0], [1], [0, 0, 1, 1], [], []>} : vector<16x128xf32>, vector<128x128xf32>, vector<16x128xf32> -> vector<16x128xf32>
    %cst_102 = arith.constant dense<0.000000e+00> : vector<16x128xf32>
    %149 = tpu.matmul %138, %3, %cst_102 {dimension_numbers = #tpu.dot_dimension_numbers<[1], [0], [0], [1], [0, 0, 1, 1], [], []>} : vector<16x128xf32>, vector<128x128xf32>, vector<16x128xf32> -> vector<16x128xf32>
    %cst_103 = arith.constant dense<0.000000e+00> : vector<16x128xf32>
    %150 = tpu.matmul %147, %3, %cst_103 {dimension_numbers = #tpu.dot_dimension_numbers<[1], [0], [0], [1], [0, 0, 1, 1], [], []>} : vector<16x128xf32>, vector<128x128xf32>, vector<16x128xf32> -> vector<16x128xf32>
    %c0_104 = arith.constant 0 : index
    %c0_105 = arith.constant 0 : index
    %c0_106 = arith.constant 0 : index
    %151 = vector.load %arg6[%c0_104, %c0_105, %c0_106] : memref<1x1x128xf32, #tpu.memory_space<vmem>>, vector<1x1x128xf32>
    %152 = vector.shape_cast %151 : vector<1x1x128xf32> to vector<1x128xf32>
    %153 = vector.broadcast %152 : vector<1x128xf32> to vector<16x128xf32>
    %154 = arith.addf %148, %153 : vector<16x128xf32>
    %c0_107 = arith.constant 0 : index
    %c0_108 = arith.constant 0 : index
    %c0_109 = arith.constant 0 : index
    %155 = vector.load %arg33[%c0_107, %c0_108, %c0_109] : memref<1x16x128xf32, #tpu.memory_space<vmem>>, vector<1x16x128xf32>
    %156 = vector.shape_cast %155 : vector<1x16x128xf32> to vector<16x128xf32>
    %157 = vector.shape_cast %154 : vector<16x128xf32> to vector<1x16x128xf32>
    tpu.vector_store %arg33[%c0_107, %c0_108, %c0_109], %157 {strides = array<i32>} : memref<1x16x128xf32, #tpu.memory_space<vmem>>, vector<1x16x128xf32>,
    %c0_110 = arith.constant 0 : index
    %c0_111 = arith.constant 0 : index
    %c0_112 = arith.constant 0 : index
    %158 = vector.load %arg3[%c0_110, %c0_111, %c0_112] : memref<1x1x128xf32, #tpu.memory_space<vmem>>, vector<1x1x128xf32>
    %159 = vector.shape_cast %158 : vector<1x1x128xf32> to vector<1x128xf32>
    %c2_i32 = arith.constant 2 : i32
    %160 = tpu.dynamic_rotate %149 by %c2_i32 dim 1 : vector<16x128xf32>, i32 -> vector<16x128xf32>
    %c0_113 = arith.constant 0 : index
    %c0_114 = arith.constant 0 : index
    %c0_115 = arith.constant 0 : index
    %161 = vector.load %arg9[%c0_113, %c0_114, %c0_115] : memref<5x1x128xf32, #tpu.memory_space<vmem>>, vector<1x1x128xf32>
    %162 = vector.shape_cast %161 : vector<1x1x128xf32> to vector<1x128xf32>
    %163 = vector.broadcast %162 : vector<1x128xf32> to vector<16x128xf32>
    %164 = arith.mulf %160, %163 : vector<16x128xf32>
    %165 = arith.truncf %164 : vector<16x128xf32> to vector<16x128xbf16>
    %c0_116 = arith.constant 0 : index
    %c0_117 = arith.constant 0 : index
    %c0_118 = arith.constant 0 : index
    %c0_119 = arith.constant 0 : index
    %166 = vector.load %arg21[%c0_116, %c0_117, %c0_118, %c0_119] : memref<5x5x16x16xbf16, #tpu.memory_space<vmem>>, vector<1x1x16x16xbf16>
    %167 = vector.shape_cast %166 : vector<1x1x16x16xbf16> to vector<16x16xbf16>
    %cst_120 = arith.constant dense<0.000000e+00> : vector<16x128xf32>
    %168 = tpu.matmul %167, %165, %cst_120 {dimension_numbers = #tpu.dot_dimension_numbers<[1], [0], [0], [1], [0, 0, 1, 1], [], []>} : vector<16x16xbf16>, vector<16x128xbf16>, vector<16x128xf32> -> vector<16x128xf32>
    %c1_i32_121 = arith.constant 1 : i32
    %169 = tpu.dynamic_rotate %149 by %c1_i32_121 dim 1 : vector<16x128xf32>, i32 -> vector<16x128xf32>
    %c1_122 = arith.constant 1 : index
    %c0_123 = arith.constant 0 : index
    %c0_124 = arith.constant 0 : index
    %170 = vector.load %arg9[%c1_122, %c0_123, %c0_124] : memref<5x1x128xf32, #tpu.memory_space<vmem>>, vector<1x1x128xf32>
    %171 = vector.shape_cast %170 : vector<1x1x128xf32> to vector<1x128xf32>
    %172 = vector.broadcast %171 : vector<1x128xf32> to vector<16x128xf32>
    %173 = arith.mulf %169, %172 : vector<16x128xf32>
    %174 = arith.truncf %173 : vector<16x128xf32> to vector<16x128xbf16>
    %c0_125 = arith.constant 0 : index
    %c1_126 = arith.constant 1 : index
    %c0_127 = arith.constant 0 : index
    %c0_128 = arith.constant 0 : index
    %175 = vector.load %arg21[%c0_125, %c1_126, %c0_127, %c0_128] : memref<5x5x16x16xbf16, #tpu.memory_space<vmem>>, vector<1x1x16x16xbf16>
    %176 = vector.shape_cast %175 : vector<1x1x16x16xbf16> to vector<16x16xbf16>
    %cst_129 = arith.constant dense<0.000000e+00> : vector<16x128xf32>
    %177 = tpu.matmul %176, %174, %cst_129 {dimension_numbers = #tpu.dot_dimension_numbers<[1], [0], [0], [1], [0, 0, 1, 1], [], []>} : vector<16x16xbf16>, vector<16x128xbf16>, vector<16x128xf32> -> vector<16x128xf32>
    %178 = arith.addf %168, %177 : vector<16x128xf32>
    %179 = arith.truncf %149 : vector<16x128xf32> to vector<16x128xbf16>
    %c0_130 = arith.constant 0 : index
    %c2_131 = arith.constant 2 : index
    %c0_132 = arith.constant 0 : index
    %c0_133 = arith.constant 0 : index
    %180 = vector.load %arg21[%c0_130, %c2_131, %c0_132, %c0_133] : memref<5x5x16x16xbf16, #tpu.memory_space<vmem>>, vector<1x1x16x16xbf16>
    %181 = vector.shape_cast %180 : vector<1x1x16x16xbf16> to vector<16x16xbf16>
    %cst_134 = arith.constant dense<0.000000e+00> : vector<16x128xf32>
    %182 = tpu.matmul %181, %179, %cst_134 {dimension_numbers = #tpu.dot_dimension_numbers<[1], [0], [0], [1], [0, 0, 1, 1], [], []>} : vector<16x16xbf16>, vector<16x128xbf16>, vector<16x128xf32> -> vector<16x128xf32>
    %183 = arith.addf %178, %182 : vector<16x128xf32>
    %c127_i32_135 = arith.constant 127 : i32
    %184 = tpu.dynamic_rotate %149 by %c127_i32_135 dim 1 : vector<16x128xf32>, i32 -> vector<16x128xf32>
    %c3 = arith.constant 3 : index
    %c0_136 = arith.constant 0 : index
    %c0_137 = arith.constant 0 : index
    %185 = vector.load %arg9[%c3, %c0_136, %c0_137] : memref<5x1x128xf32, #tpu.memory_space<vmem>>, vector<1x1x128xf32>
    %186 = vector.shape_cast %185 : vector<1x1x128xf32> to vector<1x128xf32>
    %187 = vector.broadcast %186 : vector<1x128xf32> to vector<16x128xf32>
    %188 = arith.mulf %184, %187 : vector<16x128xf32>
    %189 = arith.truncf %188 : vector<16x128xf32> to vector<16x128xbf16>
    %c0_138 = arith.constant 0 : index
    %c3_139 = arith.constant 3 : index
    %c0_140 = arith.constant 0 : index
    %c0_141 = arith.constant 0 : index
    %190 = vector.load %arg21[%c0_138, %c3_139, %c0_140, %c0_141] : memref<5x5x16x16xbf16, #tpu.memory_space<vmem>>, vector<1x1x16x16xbf16>
    %191 = vector.shape_cast %190 : vector<1x1x16x16xbf16> to vector<16x16xbf16>
    %cst_142 = arith.constant dense<0.000000e+00> : vector<16x128xf32>
    %192 = tpu.matmul %191, %189, %cst_142 {dimension_numbers = #tpu.dot_dimension_numbers<[1], [0], [0], [1], [0, 0, 1, 1], [], []>} : vector<16x16xbf16>, vector<16x128xbf16>, vector<16x128xf32> -> vector<16x128xf32>
    %193 = arith.addf %183, %192 : vector<16x128xf32>
    %c126_i32 = arith.constant 126 : i32
    %194 = tpu.dynamic_rotate %149 by %c126_i32 dim 1 : vector<16x128xf32>, i32 -> vector<16x128xf32>
    %c4 = arith.constant 4 : index
    %c0_143 = arith.constant 0 : index
    %c0_144 = arith.constant 0 : index
    %195 = vector.load %arg9[%c4, %c0_143, %c0_144] : memref<5x1x128xf32, #tpu.memory_space<vmem>>, vector<1x1x128xf32>
    %196 = vector.shape_cast %195 : vector<1x1x128xf32> to vector<1x128xf32>
    %197 = vector.broadcast %196 : vector<1x128xf32> to vector<16x128xf32>
    %198 = arith.mulf %194, %197 : vector<16x128xf32>
    %199 = arith.truncf %198 : vector<16x128xf32> to vector<16x128xbf16>
    %c0_145 = arith.constant 0 : index
    %c4_146 = arith.constant 4 : index
    %c0_147 = arith.constant 0 : index
    %c0_148 = arith.constant 0 : index
    %200 = vector.load %arg21[%c0_145, %c4_146, %c0_147, %c0_148] : memref<5x5x16x16xbf16, #tpu.memory_space<vmem>>, vector<1x1x16x16xbf16>
    %201 = vector.shape_cast %200 : vector<1x1x16x16xbf16> to vector<16x16xbf16>
    %cst_149 = arith.constant dense<0.000000e+00> : vector<16x128xf32>
    %202 = tpu.matmul %201, %199, %cst_149 {dimension_numbers = #tpu.dot_dimension_numbers<[1], [0], [0], [1], [0, 0, 1, 1], [], []>} : vector<16x16xbf16>, vector<16x128xbf16>, vector<16x128xf32> -> vector<16x128xf32>
    %203 = arith.addf %193, %202 : vector<16x128xf32>
    %c0_150 = arith.constant 0 : index
    %c0_151 = arith.constant 0 : index
    %c0_152 = arith.constant 0 : index
    %204 = vector.load %arg22[%c0_150, %c0_151, %c0_152] : memref<5x16x1xf32, #tpu.memory_space<vmem>>, vector<1x16x1xf32>
    %205 = vector.shape_cast %204 : vector<1x16x1xf32> to vector<16x1xf32>
    %206 = vector.broadcast %205 : vector<16x1xf32> to vector<16x128xf32>
    %207 = arith.addf %203, %206 : vector<16x128xf32>
    %cst_153 = arith.constant 0.000000e+00 : f32
    %208 = vector.broadcast %cst_153 : f32 to vector<16x128xf32>
    %209 = arith.maximumf %207, %208 : vector<16x128xf32>
    %cst_154 = arith.constant dense<0.000000e+00> : vector<128xf32>
    %210 = vector.multi_reduction <add>, %209, %cst_154 [0] : vector<16x128xf32> to vector<128xf32>
    %211 = vector.shape_cast %210 : vector<128xf32> to vector<1x128xf32>
    %cst_155 = arith.constant 1.600000e+01 : f32
    %212 = vector.broadcast %cst_155 : f32 to vector<1x128xf32>
    %213 = arith.divf %211, %212 : vector<1x128xf32>
    %214 = arith.mulf %209, %209 : vector<16x128xf32>
    %cst_156 = arith.constant dense<0.000000e+00> : vector<128xf32>
    %215 = vector.multi_reduction <add>, %214, %cst_156 [0] : vector<16x128xf32> to vector<128xf32>
    %216 = vector.shape_cast %215 : vector<128xf32> to vector<1x128xf32>
    %cst_157 = arith.constant 1.600000e+01 : f32
    %217 = vector.broadcast %cst_157 : f32 to vector<1x128xf32>
    %218 = arith.divf %216, %217 : vector<1x128xf32>
    %219 = arith.mulf %213, %213 : vector<1x128xf32>
    %220 = arith.subf %218, %219 : vector<1x128xf32>
    %c0_158 = arith.constant 0 : index
    %c0_159 = arith.constant 0 : index
    %c0_160 = arith.constant 0 : index
    %221 = vector.load %arg23[%c0_158, %c0_159, %c0_160] : memref<5x16x1xf32, #tpu.memory_space<vmem>>, vector<1x16x1xf32>
    %222 = vector.shape_cast %221 : vector<1x16x1xf32> to vector<16x1xf32>
    %223 = vector.broadcast %213 : vector<1x128xf32> to vector<16x128xf32>
    %224 = arith.subf %209, %223 : vector<16x128xf32>
    %cst_161 = arith.constant 9.99999974E-6 : f32
    %225 = vector.broadcast %cst_161 : f32 to vector<1x128xf32>
    %226 = arith.addf %220, %225 : vector<1x128xf32>
    %227 = math.rsqrt %226 : vector<1x128xf32>
    %228 = vector.broadcast %227 : vector<1x128xf32> to vector<16x128xf32>
    %229 = arith.mulf %224, %228 : vector<16x128xf32>
    %230 = vector.broadcast %222 : vector<16x1xf32> to vector<16x128xf32>
    %231 = arith.mulf %230, %229 : vector<16x128xf32>
    %c0_162 = arith.constant 0 : index
    %c0_163 = arith.constant 0 : index
    %c0_164 = arith.constant 0 : index
    %232 = vector.load %arg24[%c0_162, %c0_163, %c0_164] : memref<5x16x1xf32, #tpu.memory_space<vmem>>, vector<1x16x1xf32>
    %233 = vector.shape_cast %232 : vector<1x16x1xf32> to vector<16x1xf32>
    %234 = vector.broadcast %233 : vector<16x1xf32> to vector<16x128xf32>
    %235 = arith.addf %231, %234 : vector<16x128xf32>
    %c2_i32_165 = arith.constant 2 : i32
    %236 = tpu.dynamic_rotate %235 by %c2_i32_165 dim 1 : vector<16x128xf32>, i32 -> vector<16x128xf32>
    %c0_166 = arith.constant 0 : index
    %c0_167 = arith.constant 0 : index
    %c0_168 = arith.constant 0 : index
    %237 = vector.load %arg9[%c0_166, %c0_167, %c0_168] : memref<5x1x128xf32, #tpu.memory_space<vmem>>, vector<1x1x128xf32>
    %238 = vector.shape_cast %237 : vector<1x1x128xf32> to vector<1x128xf32>
    %239 = vector.broadcast %238 : vector<1x128xf32> to vector<16x128xf32>
    %240 = arith.mulf %236, %239 : vector<16x128xf32>
    %241 = arith.truncf %240 : vector<16x128xf32> to vector<16x128xbf16>
    %c1_169 = arith.constant 1 : index
    %c0_170 = arith.constant 0 : index
    %c0_171 = arith.constant 0 : index
    %c0_172 = arith.constant 0 : index
    %242 = vector.load %arg21[%c1_169, %c0_170, %c0_171, %c0_172] : memref<5x5x16x16xbf16, #tpu.memory_space<vmem>>, vector<1x1x16x16xbf16>
    %243 = vector.shape_cast %242 : vector<1x1x16x16xbf16> to vector<16x16xbf16>
    %cst_173 = arith.constant dense<0.000000e+00> : vector<16x128xf32>
    %244 = tpu.matmul %243, %241, %cst_173 {dimension_numbers = #tpu.dot_dimension_numbers<[1], [0], [0], [1], [0, 0, 1, 1], [], []>} : vector<16x16xbf16>, vector<16x128xbf16>, vector<16x128xf32> -> vector<16x128xf32>
    %c1_i32_174 = arith.constant 1 : i32
    %245 = tpu.dynamic_rotate %235 by %c1_i32_174 dim 1 : vector<16x128xf32>, i32 -> vector<16x128xf32>
    %c1_175 = arith.constant 1 : index
    %c0_176 = arith.constant 0 : index
    %c0_177 = arith.constant 0 : index
    %246 = vector.load %arg9[%c1_175, %c0_176, %c0_177] : memref<5x1x128xf32, #tpu.memory_space<vmem>>, vector<1x1x128xf32>
    %247 = vector.shape_cast %246 : vector<1x1x128xf32> to vector<1x128xf32>
    %248 = vector.broadcast %247 : vector<1x128xf32> to vector<16x128xf32>
    %249 = arith.mulf %245, %248 : vector<16x128xf32>
    %250 = arith.truncf %249 : vector<16x128xf32> to vector<16x128xbf16>
    %c1_178 = arith.constant 1 : index
    %c1_179 = arith.constant 1 : index
    %c0_180 = arith.constant 0 : index
    %c0_181 = arith.constant 0 : index
    %251 = vector.load %arg21[%c1_178, %c1_179, %c0_180, %c0_181] : memref<5x5x16x16xbf16, #tpu.memory_space<vmem>>, vector<1x1x16x16xbf16>
    %252 = vector.shape_cast %251 : vector<1x1x16x16xbf16> to vector<16x16xbf16>
    %cst_182 = arith.constant dense<0.000000e+00> : vector<16x128xf32>
    %253 = tpu.matmul %252, %250, %cst_182 {dimension_numbers = #tpu.dot_dimension_numbers<[1], [0], [0], [1], [0, 0, 1, 1], [], []>} : vector<16x16xbf16>, vector<16x128xbf16>, vector<16x128xf32> -> vector<16x128xf32>
    %254 = arith.addf %244, %253 : vector<16x128xf32>
    %255 = arith.truncf %235 : vector<16x128xf32> to vector<16x128xbf16>
    %c1_183 = arith.constant 1 : index
    %c2_184 = arith.constant 2 : index
    %c0_185 = arith.constant 0 : index
    %c0_186 = arith.constant 0 : index
    %256 = vector.load %arg21[%c1_183, %c2_184, %c0_185, %c0_186] : memref<5x5x16x16xbf16, #tpu.memory_space<vmem>>, vector<1x1x16x16xbf16>
    %257 = vector.shape_cast %256 : vector<1x1x16x16xbf16> to vector<16x16xbf16>
    %cst_187 = arith.constant dense<0.000000e+00> : vector<16x128xf32>
    %258 = tpu.matmul %257, %255, %cst_187 {dimension_numbers = #tpu.dot_dimension_numbers<[1], [0], [0], [1], [0, 0, 1, 1], [], []>} : vector<16x16xbf16>, vector<16x128xbf16>, vector<16x128xf32> -> vector<16x128xf32>
    %259 = arith.addf %254, %258 : vector<16x128xf32>
    %c127_i32_188 = arith.constant 127 : i32
    %260 = tpu.dynamic_rotate %235 by %c127_i32_188 dim 1 : vector<16x128xf32>, i32 -> vector<16x128xf32>
    %c3_189 = arith.constant 3 : index
    %c0_190 = arith.constant 0 : index
    %c0_191 = arith.constant 0 : index
    %261 = vector.load %arg9[%c3_189, %c0_190, %c0_191] : memref<5x1x128xf32, #tpu.memory_space<vmem>>, vector<1x1x128xf32>
    %262 = vector.shape_cast %261 : vector<1x1x128xf32> to vector<1x128xf32>
    %263 = vector.broadcast %262 : vector<1x128xf32> to vector<16x128xf32>
    %264 = arith.mulf %260, %263 : vector<16x128xf32>
    %265 = arith.truncf %264 : vector<16x128xf32> to vector<16x128xbf16>
    %c1_192 = arith.constant 1 : index
    %c3_193 = arith.constant 3 : index
    %c0_194 = arith.constant 0 : index
    %c0_195 = arith.constant 0 : index
    %266 = vector.load %arg21[%c1_192, %c3_193, %c0_194, %c0_195] : memref<5x5x16x16xbf16, #tpu.memory_space<vmem>>, vector<1x1x16x16xbf16>
    %267 = vector.shape_cast %266 : vector<1x1x16x16xbf16> to vector<16x16xbf16>
    %cst_196 = arith.constant dense<0.000000e+00> : vector<16x128xf32>
    %268 = tpu.matmul %267, %265, %cst_196 {dimension_numbers = #tpu.dot_dimension_numbers<[1], [0], [0], [1], [0, 0, 1, 1], [], []>} : vector<16x16xbf16>, vector<16x128xbf16>, vector<16x128xf32> -> vector<16x128xf32>
    %269 = arith.addf %259, %268 : vector<16x128xf32>
    %c126_i32_197 = arith.constant 126 : i32
    %270 = tpu.dynamic_rotate %235 by %c126_i32_197 dim 1 : vector<16x128xf32>, i32 -> vector<16x128xf32>
    %c4_198 = arith.constant 4 : index
    %c0_199 = arith.constant 0 : index
    %c0_200 = arith.constant 0 : index
    %271 = vector.load %arg9[%c4_198, %c0_199, %c0_200] : memref<5x1x128xf32, #tpu.memory_space<vmem>>, vector<1x1x128xf32>
    %272 = vector.shape_cast %271 : vector<1x1x128xf32> to vector<1x128xf32>
    %273 = vector.broadcast %272 : vector<1x128xf32> to vector<16x128xf32>
    %274 = arith.mulf %270, %273 : vector<16x128xf32>
    %275 = arith.truncf %274 : vector<16x128xf32> to vector<16x128xbf16>
    %c1_201 = arith.constant 1 : index
    %c4_202 = arith.constant 4 : index
    %c0_203 = arith.constant 0 : index
    %c0_204 = arith.constant 0 : index
    %276 = vector.load %arg21[%c1_201, %c4_202, %c0_203, %c0_204] : memref<5x5x16x16xbf16, #tpu.memory_space<vmem>>, vector<1x1x16x16xbf16>
    %277 = vector.shape_cast %276 : vector<1x1x16x16xbf16> to vector<16x16xbf16>
    %cst_205 = arith.constant dense<0.000000e+00> : vector<16x128xf32>
    %278 = tpu.matmul %277, %275, %cst_205 {dimension_numbers = #tpu.dot_dimension_numbers<[1], [0], [0], [1], [0, 0, 1, 1], [], []>} : vector<16x16xbf16>, vector<16x128xbf16>, vector<16x128xf32> -> vector<16x128xf32>
    %279 = arith.addf %269, %278 : vector<16x128xf32>
    %c1_206 = arith.constant 1 : index
    %c0_207 = arith.constant 0 : index
    %c0_208 = arith.constant 0 : index
    %280 = vector.load %arg22[%c1_206, %c0_207, %c0_208] : memref<5x16x1xf32, #tpu.memory_space<vmem>>, vector<1x16x1xf32>
    %281 = vector.shape_cast %280 : vector<1x16x1xf32> to vector<16x1xf32>
    %282 = vector.broadcast %281 : vector<16x1xf32> to vector<16x128xf32>
    %283 = arith.addf %279, %282 : vector<16x128xf32>
    %cst_209 = arith.constant 0.000000e+00 : f32
    %284 = vector.broadcast %cst_209 : f32 to vector<16x128xf32>
    %285 = arith.maximumf %283, %284 : vector<16x128xf32>
    %cst_210 = arith.constant dense<0.000000e+00> : vector<128xf32>
    %286 = vector.multi_reduction <add>, %285, %cst_210 [0] : vector<16x128xf32> to vector<128xf32>
    %287 = vector.shape_cast %286 : vector<128xf32> to vector<1x128xf32>
    %cst_211 = arith.constant 1.600000e+01 : f32
    %288 = vector.broadcast %cst_211 : f32 to vector<1x128xf32>
    %289 = arith.divf %287, %288 : vector<1x128xf32>
    %290 = arith.mulf %285, %285 : vector<16x128xf32>
    %cst_212 = arith.constant dense<0.000000e+00> : vector<128xf32>
    %291 = vector.multi_reduction <add>, %290, %cst_212 [0] : vector<16x128xf32> to vector<128xf32>
    %292 = vector.shape_cast %291 : vector<128xf32> to vector<1x128xf32>
    %cst_213 = arith.constant 1.600000e+01 : f32
    %293 = vector.broadcast %cst_213 : f32 to vector<1x128xf32>
    %294 = arith.divf %292, %293 : vector<1x128xf32>
    %295 = arith.mulf %289, %289 : vector<1x128xf32>
    %296 = arith.subf %294, %295 : vector<1x128xf32>
    %c1_214 = arith.constant 1 : index
    %c0_215 = arith.constant 0 : index
    %c0_216 = arith.constant 0 : index
    %297 = vector.load %arg23[%c1_214, %c0_215, %c0_216] : memref<5x16x1xf32, #tpu.memory_space<vmem>>, vector<1x16x1xf32>
    %298 = vector.shape_cast %297 : vector<1x16x1xf32> to vector<16x1xf32>
    %299 = vector.broadcast %289 : vector<1x128xf32> to vector<16x128xf32>
    %300 = arith.subf %285, %299 : vector<16x128xf32>
    %cst_217 = arith.constant 9.99999974E-6 : f32
    %301 = vector.broadcast %cst_217 : f32 to vector<1x128xf32>
    %302 = arith.addf %296, %301 : vector<1x128xf32>
    %303 = math.rsqrt %302 : vector<1x128xf32>
    %304 = vector.broadcast %303 : vector<1x128xf32> to vector<16x128xf32>
    %305 = arith.mulf %300, %304 : vector<16x128xf32>
    %306 = vector.broadcast %298 : vector<16x1xf32> to vector<16x128xf32>
    %307 = arith.mulf %306, %305 : vector<16x128xf32>
    %c1_218 = arith.constant 1 : index
    %c0_219 = arith.constant 0 : index
    %c0_220 = arith.constant 0 : index
    %308 = vector.load %arg24[%c1_218, %c0_219, %c0_220] : memref<5x16x1xf32, #tpu.memory_space<vmem>>, vector<1x16x1xf32>
    %309 = vector.shape_cast %308 : vector<1x16x1xf32> to vector<16x1xf32>
    %310 = vector.broadcast %309 : vector<16x1xf32> to vector<16x128xf32>
    %311 = arith.addf %307, %310 : vector<16x128xf32>
    %c2_i32_221 = arith.constant 2 : i32
    %312 = tpu.dynamic_rotate %311 by %c2_i32_221 dim 1 : vector<16x128xf32>, i32 -> vector<16x128xf32>
    %c0_222 = arith.constant 0 : index
    %c0_223 = arith.constant 0 : index
    %c0_224 = arith.constant 0 : index
    %313 = vector.load %arg9[%c0_222, %c0_223, %c0_224] : memref<5x1x128xf32, #tpu.memory_space<vmem>>, vector<1x1x128xf32>
    %314 = vector.shape_cast %313 : vector<1x1x128xf32> to vector<1x128xf32>
    %315 = vector.broadcast %314 : vector<1x128xf32> to vector<16x128xf32>
    %316 = arith.mulf %312, %315 : vector<16x128xf32>
    %317 = arith.truncf %316 : vector<16x128xf32> to vector<16x128xbf16>
    %c2_225 = arith.constant 2 : index
    %c0_226 = arith.constant 0 : index
    %c0_227 = arith.constant 0 : index
    %c0_228 = arith.constant 0 : index
    %318 = vector.load %arg21[%c2_225, %c0_226, %c0_227, %c0_228] : memref<5x5x16x16xbf16, #tpu.memory_space<vmem>>, vector<1x1x16x16xbf16>
    %319 = vector.shape_cast %318 : vector<1x1x16x16xbf16> to vector<16x16xbf16>
    %cst_229 = arith.constant dense<0.000000e+00> : vector<16x128xf32>
    %320 = tpu.matmul %319, %317, %cst_229 {dimension_numbers = #tpu.dot_dimension_numbers<[1], [0], [0], [1], [0, 0, 1, 1], [], []>} : vector<16x16xbf16>, vector<16x128xbf16>, vector<16x128xf32> -> vector<16x128xf32>
    %c1_i32_230 = arith.constant 1 : i32
    %321 = tpu.dynamic_rotate %311 by %c1_i32_230 dim 1 : vector<16x128xf32>, i32 -> vector<16x128xf32>
    %c1_231 = arith.constant 1 : index
    %c0_232 = arith.constant 0 : index
    %c0_233 = arith.constant 0 : index
    %322 = vector.load %arg9[%c1_231, %c0_232, %c0_233] : memref<5x1x128xf32, #tpu.memory_space<vmem>>, vector<1x1x128xf32>
    %323 = vector.shape_cast %322 : vector<1x1x128xf32> to vector<1x128xf32>
    %324 = vector.broadcast %323 : vector<1x128xf32> to vector<16x128xf32>
    %325 = arith.mulf %321, %324 : vector<16x128xf32>
    %326 = arith.truncf %325 : vector<16x128xf32> to vector<16x128xbf16>
    %c2_234 = arith.constant 2 : index
    %c1_235 = arith.constant 1 : index
    %c0_236 = arith.constant 0 : index
    %c0_237 = arith.constant 0 : index
    %327 = vector.load %arg21[%c2_234, %c1_235, %c0_236, %c0_237] : memref<5x5x16x16xbf16, #tpu.memory_space<vmem>>, vector<1x1x16x16xbf16>
    %328 = vector.shape_cast %327 : vector<1x1x16x16xbf16> to vector<16x16xbf16>
    %cst_238 = arith.constant dense<0.000000e+00> : vector<16x128xf32>
    %329 = tpu.matmul %328, %326, %cst_238 {dimension_numbers = #tpu.dot_dimension_numbers<[1], [0], [0], [1], [0, 0, 1, 1], [], []>} : vector<16x16xbf16>, vector<16x128xbf16>, vector<16x128xf32> -> vector<16x128xf32>
    %330 = arith.addf %320, %329 : vector<16x128xf32>
    %331 = arith.truncf %311 : vector<16x128xf32> to vector<16x128xbf16>
    %c2_239 = arith.constant 2 : index
    %c2_240 = arith.constant 2 : index
    %c0_241 = arith.constant 0 : index
    %c0_242 = arith.constant 0 : index
    %332 = vector.load %arg21[%c2_239, %c2_240, %c0_241, %c0_242] : memref<5x5x16x16xbf16, #tpu.memory_space<vmem>>, vector<1x1x16x16xbf16>
    %333 = vector.shape_cast %332 : vector<1x1x16x16xbf16> to vector<16x16xbf16>
    %cst_243 = arith.constant dense<0.000000e+00> : vector<16x128xf32>
    %334 = tpu.matmul %333, %331, %cst_243 {dimension_numbers = #tpu.dot_dimension_numbers<[1], [0], [0], [1], [0, 0, 1, 1], [], []>} : vector<16x16xbf16>, vector<16x128xbf16>, vector<16x128xf32> -> vector<16x128xf32>
    %335 = arith.addf %330, %334 : vector<16x128xf32>
    %c127_i32_244 = arith.constant 127 : i32
    %336 = tpu.dynamic_rotate %311 by %c127_i32_244 dim 1 : vector<16x128xf32>, i32 -> vector<16x128xf32>
    %c3_245 = arith.constant 3 : index
    %c0_246 = arith.constant 0 : index
    %c0_247 = arith.constant 0 : index
    %337 = vector.load %arg9[%c3_245, %c0_246, %c0_247] : memref<5x1x128xf32, #tpu.memory_space<vmem>>, vector<1x1x128xf32>
    %338 = vector.shape_cast %337 : vector<1x1x128xf32> to vector<1x128xf32>
    %339 = vector.broadcast %338 : vector<1x128xf32> to vector<16x128xf32>
    %340 = arith.mulf %336, %339 : vector<16x128xf32>
    %341 = arith.truncf %340 : vector<16x128xf32> to vector<16x128xbf16>
    %c2_248 = arith.constant 2 : index
    %c3_249 = arith.constant 3 : index
    %c0_250 = arith.constant 0 : index
    %c0_251 = arith.constant 0 : index
    %342 = vector.load %arg21[%c2_248, %c3_249, %c0_250, %c0_251] : memref<5x5x16x16xbf16, #tpu.memory_space<vmem>>, vector<1x1x16x16xbf16>
    %343 = vector.shape_cast %342 : vector<1x1x16x16xbf16> to vector<16x16xbf16>
    %cst_252 = arith.constant dense<0.000000e+00> : vector<16x128xf32>
    %344 = tpu.matmul %343, %341, %cst_252 {dimension_numbers = #tpu.dot_dimension_numbers<[1], [0], [0], [1], [0, 0, 1, 1], [], []>} : vector<16x16xbf16>, vector<16x128xbf16>, vector<16x128xf32> -> vector<16x128xf32>
    %345 = arith.addf %335, %344 : vector<16x128xf32>
    %c126_i32_253 = arith.constant 126 : i32
    %346 = tpu.dynamic_rotate %311 by %c126_i32_253 dim 1 : vector<16x128xf32>, i32 -> vector<16x128xf32>
    %c4_254 = arith.constant 4 : index
    %c0_255 = arith.constant 0 : index
    %c0_256 = arith.constant 0 : index
    %347 = vector.load %arg9[%c4_254, %c0_255, %c0_256] : memref<5x1x128xf32, #tpu.memory_space<vmem>>, vector<1x1x128xf32>
    %348 = vector.shape_cast %347 : vector<1x1x128xf32> to vector<1x128xf32>
    %349 = vector.broadcast %348 : vector<1x128xf32> to vector<16x128xf32>
    %350 = arith.mulf %346, %349 : vector<16x128xf32>
    %351 = arith.truncf %350 : vector<16x128xf32> to vector<16x128xbf16>
    %c2_257 = arith.constant 2 : index
    %c4_258 = arith.constant 4 : index
    %c0_259 = arith.constant 0 : index
    %c0_260 = arith.constant 0 : index
    %352 = vector.load %arg21[%c2_257, %c4_258, %c0_259, %c0_260] : memref<5x5x16x16xbf16, #tpu.memory_space<vmem>>, vector<1x1x16x16xbf16>
    %353 = vector.shape_cast %352 : vector<1x1x16x16xbf16> to vector<16x16xbf16>
    %cst_261 = arith.constant dense<0.000000e+00> : vector<16x128xf32>
    %354 = tpu.matmul %353, %351, %cst_261 {dimension_numbers = #tpu.dot_dimension_numbers<[1], [0], [0], [1], [0, 0, 1, 1], [], []>} : vector<16x16xbf16>, vector<16x128xbf16>, vector<16x128xf32> -> vector<16x128xf32>
    %355 = arith.addf %345, %354 : vector<16x128xf32>
    %c2_262 = arith.constant 2 : index
    %c0_263 = arith.constant 0 : index
    %c0_264 = arith.constant 0 : index
    %356 = vector.load %arg22[%c2_262, %c0_263, %c0_264] : memref<5x16x1xf32, #tpu.memory_space<vmem>>, vector<1x16x1xf32>
    %357 = vector.shape_cast %356 : vector<1x16x1xf32> to vector<16x1xf32>
    %358 = vector.broadcast %357 : vector<16x1xf32> to vector<16x128xf32>
    %359 = arith.addf %355, %358 : vector<16x128xf32>
    %cst_265 = arith.constant 0.000000e+00 : f32
    %360 = vector.broadcast %cst_265 : f32 to vector<16x128xf32>
    %361 = arith.maximumf %359, %360 : vector<16x128xf32>
    %cst_266 = arith.constant dense<0.000000e+00> : vector<128xf32>
    %362 = vector.multi_reduction <add>, %361, %cst_266 [0] : vector<16x128xf32> to vector<128xf32>
    %363 = vector.shape_cast %362 : vector<128xf32> to vector<1x128xf32>
    %cst_267 = arith.constant 1.600000e+01 : f32
    %364 = vector.broadcast %cst_267 : f32 to vector<1x128xf32>
    %365 = arith.divf %363, %364 : vector<1x128xf32>
    %366 = arith.mulf %361, %361 : vector<16x128xf32>
    %cst_268 = arith.constant dense<0.000000e+00> : vector<128xf32>
    %367 = vector.multi_reduction <add>, %366, %cst_268 [0] : vector<16x128xf32> to vector<128xf32>
    %368 = vector.shape_cast %367 : vector<128xf32> to vector<1x128xf32>
    %cst_269 = arith.constant 1.600000e+01 : f32
    %369 = vector.broadcast %cst_269 : f32 to vector<1x128xf32>
    %370 = arith.divf %368, %369 : vector<1x128xf32>
    %371 = arith.mulf %365, %365 : vector<1x128xf32>
    %372 = arith.subf %370, %371 : vector<1x128xf32>
    %c2_270 = arith.constant 2 : index
    %c0_271 = arith.constant 0 : index
    %c0_272 = arith.constant 0 : index
    %373 = vector.load %arg23[%c2_270, %c0_271, %c0_272] : memref<5x16x1xf32, #tpu.memory_space<vmem>>, vector<1x16x1xf32>
    %374 = vector.shape_cast %373 : vector<1x16x1xf32> to vector<16x1xf32>
    %375 = vector.broadcast %365 : vector<1x128xf32> to vector<16x128xf32>
    %376 = arith.subf %361, %375 : vector<16x128xf32>
    %cst_273 = arith.constant 9.99999974E-6 : f32
    %377 = vector.broadcast %cst_273 : f32 to vector<1x128xf32>
    %378 = arith.addf %372, %377 : vector<1x128xf32>
    %379 = math.rsqrt %378 : vector<1x128xf32>
    %380 = vector.broadcast %379 : vector<1x128xf32> to vector<16x128xf32>
    %381 = arith.mulf %376, %380 : vector<16x128xf32>
    %382 = vector.broadcast %374 : vector<16x1xf32> to vector<16x128xf32>
    %383 = arith.mulf %382, %381 : vector<16x128xf32>
    %c2_274 = arith.constant 2 : index
    %c0_275 = arith.constant 0 : index
    %c0_276 = arith.constant 0 : index
    %384 = vector.load %arg24[%c2_274, %c0_275, %c0_276] : memref<5x16x1xf32, #tpu.memory_space<vmem>>, vector<1x16x1xf32>
    %385 = vector.shape_cast %384 : vector<1x16x1xf32> to vector<16x1xf32>
    %386 = vector.broadcast %385 : vector<16x1xf32> to vector<16x128xf32>
    %387 = arith.addf %383, %386 : vector<16x128xf32>
    %c2_i32_277 = arith.constant 2 : i32
    %388 = tpu.dynamic_rotate %387 by %c2_i32_277 dim 1 : vector<16x128xf32>, i32 -> vector<16x128xf32>
    %c0_278 = arith.constant 0 : index
    %c0_279 = arith.constant 0 : index
    %c0_280 = arith.constant 0 : index
    %389 = vector.load %arg9[%c0_278, %c0_279, %c0_280] : memref<5x1x128xf32, #tpu.memory_space<vmem>>, vector<1x1x128xf32>
    %390 = vector.shape_cast %389 : vector<1x1x128xf32> to vector<1x128xf32>
    %391 = vector.broadcast %390 : vector<1x128xf32> to vector<16x128xf32>
    %392 = arith.mulf %388, %391 : vector<16x128xf32>
    %393 = arith.truncf %392 : vector<16x128xf32> to vector<16x128xbf16>
    %c3_281 = arith.constant 3 : index
    %c0_282 = arith.constant 0 : index
    %c0_283 = arith.constant 0 : index
    %c0_284 = arith.constant 0 : index
    %394 = vector.load %arg21[%c3_281, %c0_282, %c0_283, %c0_284] : memref<5x5x16x16xbf16, #tpu.memory_space<vmem>>, vector<1x1x16x16xbf16>
    %395 = vector.shape_cast %394 : vector<1x1x16x16xbf16> to vector<16x16xbf16>
    %cst_285 = arith.constant dense<0.000000e+00> : vector<16x128xf32>
    %396 = tpu.matmul %395, %393, %cst_285 {dimension_numbers = #tpu.dot_dimension_numbers<[1], [0], [0], [1], [0, 0, 1, 1], [], []>} : vector<16x16xbf16>, vector<16x128xbf16>, vector<16x128xf32> -> vector<16x128xf32>
    %c1_i32_286 = arith.constant 1 : i32
    %397 = tpu.dynamic_rotate %387 by %c1_i32_286 dim 1 : vector<16x128xf32>, i32 -> vector<16x128xf32>
    %c1_287 = arith.constant 1 : index
    %c0_288 = arith.constant 0 : index
    %c0_289 = arith.constant 0 : index
    %398 = vector.load %arg9[%c1_287, %c0_288, %c0_289] : memref<5x1x128xf32, #tpu.memory_space<vmem>>, vector<1x1x128xf32>
    %399 = vector.shape_cast %398 : vector<1x1x128xf32> to vector<1x128xf32>
    %400 = vector.broadcast %399 : vector<1x128xf32> to vector<16x128xf32>
    %401 = arith.mulf %397, %400 : vector<16x128xf32>
    %402 = arith.truncf %401 : vector<16x128xf32> to vector<16x128xbf16>
    %c3_290 = arith.constant 3 : index
    %c1_291 = arith.constant 1 : index
    %c0_292 = arith.constant 0 : index
    %c0_293 = arith.constant 0 : index
    %403 = vector.load %arg21[%c3_290, %c1_291, %c0_292, %c0_293] : memref<5x5x16x16xbf16, #tpu.memory_space<vmem>>, vector<1x1x16x16xbf16>
    %404 = vector.shape_cast %403 : vector<1x1x16x16xbf16> to vector<16x16xbf16>
    %cst_294 = arith.constant dense<0.000000e+00> : vector<16x128xf32>
    %405 = tpu.matmul %404, %402, %cst_294 {dimension_numbers = #tpu.dot_dimension_numbers<[1], [0], [0], [1], [0, 0, 1, 1], [], []>} : vector<16x16xbf16>, vector<16x128xbf16>, vector<16x128xf32> -> vector<16x128xf32>
    %406 = arith.addf %396, %405 : vector<16x128xf32>
    %407 = arith.truncf %387 : vector<16x128xf32> to vector<16x128xbf16>
    %c3_295 = arith.constant 3 : index
    %c2_296 = arith.constant 2 : index
    %c0_297 = arith.constant 0 : index
    %c0_298 = arith.constant 0 : index
    %408 = vector.load %arg21[%c3_295, %c2_296, %c0_297, %c0_298] : memref<5x5x16x16xbf16, #tpu.memory_space<vmem>>, vector<1x1x16x16xbf16>
    %409 = vector.shape_cast %408 : vector<1x1x16x16xbf16> to vector<16x16xbf16>
    %cst_299 = arith.constant dense<0.000000e+00> : vector<16x128xf32>
    %410 = tpu.matmul %409, %407, %cst_299 {dimension_numbers = #tpu.dot_dimension_numbers<[1], [0], [0], [1], [0, 0, 1, 1], [], []>} : vector<16x16xbf16>, vector<16x128xbf16>, vector<16x128xf32> -> vector<16x128xf32>
    %411 = arith.addf %406, %410 : vector<16x128xf32>
    %c127_i32_300 = arith.constant 127 : i32
    %412 = tpu.dynamic_rotate %387 by %c127_i32_300 dim 1 : vector<16x128xf32>, i32 -> vector<16x128xf32>
    %c3_301 = arith.constant 3 : index
    %c0_302 = arith.constant 0 : index
    %c0_303 = arith.constant 0 : index
    %413 = vector.load %arg9[%c3_301, %c0_302, %c0_303] : memref<5x1x128xf32, #tpu.memory_space<vmem>>, vector<1x1x128xf32>
    %414 = vector.shape_cast %413 : vector<1x1x128xf32> to vector<1x128xf32>
    %415 = vector.broadcast %414 : vector<1x128xf32> to vector<16x128xf32>
    %416 = arith.mulf %412, %415 : vector<16x128xf32>
    %417 = arith.truncf %416 : vector<16x128xf32> to vector<16x128xbf16>
    %c3_304 = arith.constant 3 : index
    %c3_305 = arith.constant 3 : index
    %c0_306 = arith.constant 0 : index
    %c0_307 = arith.constant 0 : index
    %418 = vector.load %arg21[%c3_304, %c3_305, %c0_306, %c0_307] : memref<5x5x16x16xbf16, #tpu.memory_space<vmem>>, vector<1x1x16x16xbf16>
    %419 = vector.shape_cast %418 : vector<1x1x16x16xbf16> to vector<16x16xbf16>
    %cst_308 = arith.constant dense<0.000000e+00> : vector<16x128xf32>
    %420 = tpu.matmul %419, %417, %cst_308 {dimension_numbers = #tpu.dot_dimension_numbers<[1], [0], [0], [1], [0, 0, 1, 1], [], []>} : vector<16x16xbf16>, vector<16x128xbf16>, vector<16x128xf32> -> vector<16x128xf32>
    %421 = arith.addf %411, %420 : vector<16x128xf32>
    %c126_i32_309 = arith.constant 126 : i32
    %422 = tpu.dynamic_rotate %387 by %c126_i32_309 dim 1 : vector<16x128xf32>, i32 -> vector<16x128xf32>
    %c4_310 = arith.constant 4 : index
    %c0_311 = arith.constant 0 : index
    %c0_312 = arith.constant 0 : index
    %423 = vector.load %arg9[%c4_310, %c0_311, %c0_312] : memref<5x1x128xf32, #tpu.memory_space<vmem>>, vector<1x1x128xf32>
    %424 = vector.shape_cast %423 : vector<1x1x128xf32> to vector<1x128xf32>
    %425 = vector.broadcast %424 : vector<1x128xf32> to vector<16x128xf32>
    %426 = arith.mulf %422, %425 : vector<16x128xf32>
    %427 = arith.truncf %426 : vector<16x128xf32> to vector<16x128xbf16>
    %c3_313 = arith.constant 3 : index
    %c4_314 = arith.constant 4 : index
    %c0_315 = arith.constant 0 : index
    %c0_316 = arith.constant 0 : index
    %428 = vector.load %arg21[%c3_313, %c4_314, %c0_315, %c0_316] : memref<5x5x16x16xbf16, #tpu.memory_space<vmem>>, vector<1x1x16x16xbf16>
    %429 = vector.shape_cast %428 : vector<1x1x16x16xbf16> to vector<16x16xbf16>
    %cst_317 = arith.constant dense<0.000000e+00> : vector<16x128xf32>
    %430 = tpu.matmul %429, %427, %cst_317 {dimension_numbers = #tpu.dot_dimension_numbers<[1], [0], [0], [1], [0, 0, 1, 1], [], []>} : vector<16x16xbf16>, vector<16x128xbf16>, vector<16x128xf32> -> vector<16x128xf32>
    %431 = arith.addf %421, %430 : vector<16x128xf32>
    %c3_318 = arith.constant 3 : index
    %c0_319 = arith.constant 0 : index
    %c0_320 = arith.constant 0 : index
    %432 = vector.load %arg22[%c3_318, %c0_319, %c0_320] : memref<5x16x1xf32, #tpu.memory_space<vmem>>, vector<1x16x1xf32>
    %433 = vector.shape_cast %432 : vector<1x16x1xf32> to vector<16x1xf32>
    %434 = vector.broadcast %433 : vector<16x1xf32> to vector<16x128xf32>
    %435 = arith.addf %431, %434 : vector<16x128xf32>
    %cst_321 = arith.constant 0.000000e+00 : f32
    %436 = vector.broadcast %cst_321 : f32 to vector<16x128xf32>
    %437 = arith.maximumf %435, %436 : vector<16x128xf32>
    %cst_322 = arith.constant dense<0.000000e+00> : vector<128xf32>
    %438 = vector.multi_reduction <add>, %437, %cst_322 [0] : vector<16x128xf32> to vector<128xf32>
    %439 = vector.shape_cast %438 : vector<128xf32> to vector<1x128xf32>
    %cst_323 = arith.constant 1.600000e+01 : f32
    %440 = vector.broadcast %cst_323 : f32 to vector<1x128xf32>
    %441 = arith.divf %439, %440 : vector<1x128xf32>
    %442 = arith.mulf %437, %437 : vector<16x128xf32>
    %cst_324 = arith.constant dense<0.000000e+00> : vector<128xf32>
    %443 = vector.multi_reduction <add>, %442, %cst_324 [0] : vector<16x128xf32> to vector<128xf32>
    %444 = vector.shape_cast %443 : vector<128xf32> to vector<1x128xf32>
    %cst_325 = arith.constant 1.600000e+01 : f32
    %445 = vector.broadcast %cst_325 : f32 to vector<1x128xf32>
    %446 = arith.divf %444, %445 : vector<1x128xf32>
    %447 = arith.mulf %441, %441 : vector<1x128xf32>
    %448 = arith.subf %446, %447 : vector<1x128xf32>
    %c3_326 = arith.constant 3 : index
    %c0_327 = arith.constant 0 : index
    %c0_328 = arith.constant 0 : index
    %449 = vector.load %arg23[%c3_326, %c0_327, %c0_328] : memref<5x16x1xf32, #tpu.memory_space<vmem>>, vector<1x16x1xf32>
    %450 = vector.shape_cast %449 : vector<1x16x1xf32> to vector<16x1xf32>
    %451 = vector.broadcast %441 : vector<1x128xf32> to vector<16x128xf32>
    %452 = arith.subf %437, %451 : vector<16x128xf32>
    %cst_329 = arith.constant 9.99999974E-6 : f32
    %453 = vector.broadcast %cst_329 : f32 to vector<1x128xf32>
    %454 = arith.addf %448, %453 : vector<1x128xf32>
    %455 = math.rsqrt %454 : vector<1x128xf32>
    %456 = vector.broadcast %455 : vector<1x128xf32> to vector<16x128xf32>
    %457 = arith.mulf %452, %456 : vector<16x128xf32>
    %458 = vector.broadcast %450 : vector<16x1xf32> to vector<16x128xf32>
    %459 = arith.mulf %458, %457 : vector<16x128xf32>
    %c3_330 = arith.constant 3 : index
    %c0_331 = arith.constant 0 : index
    %c0_332 = arith.constant 0 : index
    %460 = vector.load %arg24[%c3_330, %c0_331, %c0_332] : memref<5x16x1xf32, #tpu.memory_space<vmem>>, vector<1x16x1xf32>
    %461 = vector.shape_cast %460 : vector<1x16x1xf32> to vector<16x1xf32>
    %462 = vector.broadcast %461 : vector<16x1xf32> to vector<16x128xf32>
    %463 = arith.addf %459, %462 : vector<16x128xf32>
    %c2_i32_333 = arith.constant 2 : i32
    %464 = tpu.dynamic_rotate %463 by %c2_i32_333 dim 1 : vector<16x128xf32>, i32 -> vector<16x128xf32>
    %c0_334 = arith.constant 0 : index
    %c0_335 = arith.constant 0 : index
    %c0_336 = arith.constant 0 : index
    %465 = vector.load %arg9[%c0_334, %c0_335, %c0_336] : memref<5x1x128xf32, #tpu.memory_space<vmem>>, vector<1x1x128xf32>
    %466 = vector.shape_cast %465 : vector<1x1x128xf32> to vector<1x128xf32>
    %467 = vector.broadcast %466 : vector<1x128xf32> to vector<16x128xf32>
    %468 = arith.mulf %464, %467 : vector<16x128xf32>
    %469 = arith.truncf %468 : vector<16x128xf32> to vector<16x128xbf16>
    %c4_337 = arith.constant 4 : index
    %c0_338 = arith.constant 0 : index
    %c0_339 = arith.constant 0 : index
    %c0_340 = arith.constant 0 : index
    %470 = vector.load %arg21[%c4_337, %c0_338, %c0_339, %c0_340] : memref<5x5x16x16xbf16, #tpu.memory_space<vmem>>, vector<1x1x16x16xbf16>
    %471 = vector.shape_cast %470 : vector<1x1x16x16xbf16> to vector<16x16xbf16>
    %cst_341 = arith.constant dense<0.000000e+00> : vector<16x128xf32>
    %472 = tpu.matmul %471, %469, %cst_341 {dimension_numbers = #tpu.dot_dimension_numbers<[1], [0], [0], [1], [0, 0, 1, 1], [], []>} : vector<16x16xbf16>, vector<16x128xbf16>, vector<16x128xf32> -> vector<16x128xf32>
    %c1_i32_342 = arith.constant 1 : i32
    %473 = tpu.dynamic_rotate %463 by %c1_i32_342 dim 1 : vector<16x128xf32>, i32 -> vector<16x128xf32>
    %c1_343 = arith.constant 1 : index
    %c0_344 = arith.constant 0 : index
    %c0_345 = arith.constant 0 : index
    %474 = vector.load %arg9[%c1_343, %c0_344, %c0_345] : memref<5x1x128xf32, #tpu.memory_space<vmem>>, vector<1x1x128xf32>
    %475 = vector.shape_cast %474 : vector<1x1x128xf32> to vector<1x128xf32>
    %476 = vector.broadcast %475 : vector<1x128xf32> to vector<16x128xf32>
    %477 = arith.mulf %473, %476 : vector<16x128xf32>
    %478 = arith.truncf %477 : vector<16x128xf32> to vector<16x128xbf16>
    %c4_346 = arith.constant 4 : index
    %c1_347 = arith.constant 1 : index
    %c0_348 = arith.constant 0 : index
    %c0_349 = arith.constant 0 : index
    %479 = vector.load %arg21[%c4_346, %c1_347, %c0_348, %c0_349] : memref<5x5x16x16xbf16, #tpu.memory_space<vmem>>, vector<1x1x16x16xbf16>
    %480 = vector.shape_cast %479 : vector<1x1x16x16xbf16> to vector<16x16xbf16>
    %cst_350 = arith.constant dense<0.000000e+00> : vector<16x128xf32>
    %481 = tpu.matmul %480, %478, %cst_350 {dimension_numbers = #tpu.dot_dimension_numbers<[1], [0], [0], [1], [0, 0, 1, 1], [], []>} : vector<16x16xbf16>, vector<16x128xbf16>, vector<16x128xf32> -> vector<16x128xf32>
    %482 = arith.addf %472, %481 : vector<16x128xf32>
    %483 = arith.truncf %463 : vector<16x128xf32> to vector<16x128xbf16>
    %c4_351 = arith.constant 4 : index
    %c2_352 = arith.constant 2 : index
    %c0_353 = arith.constant 0 : index
    %c0_354 = arith.constant 0 : index
    %484 = vector.load %arg21[%c4_351, %c2_352, %c0_353, %c0_354] : memref<5x5x16x16xbf16, #tpu.memory_space<vmem>>, vector<1x1x16x16xbf16>
    %485 = vector.shape_cast %484 : vector<1x1x16x16xbf16> to vector<16x16xbf16>
    %cst_355 = arith.constant dense<0.000000e+00> : vector<16x128xf32>
    %486 = tpu.matmul %485, %483, %cst_355 {dimension_numbers = #tpu.dot_dimension_numbers<[1], [0], [0], [1], [0, 0, 1, 1], [], []>} : vector<16x16xbf16>, vector<16x128xbf16>, vector<16x128xf32> -> vector<16x128xf32>
    %487 = arith.addf %482, %486 : vector<16x128xf32>
    %c127_i32_356 = arith.constant 127 : i32
    %488 = tpu.dynamic_rotate %463 by %c127_i32_356 dim 1 : vector<16x128xf32>, i32 -> vector<16x128xf32>
    %c3_357 = arith.constant 3 : index
    %c0_358 = arith.constant 0 : index
    %c0_359 = arith.constant 0 : index
    %489 = vector.load %arg9[%c3_357, %c0_358, %c0_359] : memref<5x1x128xf32, #tpu.memory_space<vmem>>, vector<1x1x128xf32>
    %490 = vector.shape_cast %489 : vector<1x1x128xf32> to vector<1x128xf32>
    %491 = vector.broadcast %490 : vector<1x128xf32> to vector<16x128xf32>
    %492 = arith.mulf %488, %491 : vector<16x128xf32>
    %493 = arith.truncf %492 : vector<16x128xf32> to vector<16x128xbf16>
    %c4_360 = arith.constant 4 : index
    %c3_361 = arith.constant 3 : index
    %c0_362 = arith.constant 0 : index
    %c0_363 = arith.constant 0 : index
    %494 = vector.load %arg21[%c4_360, %c3_361, %c0_362, %c0_363] : memref<5x5x16x16xbf16, #tpu.memory_space<vmem>>, vector<1x1x16x16xbf16>
    %495 = vector.shape_cast %494 : vector<1x1x16x16xbf16> to vector<16x16xbf16>
    %cst_364 = arith.constant dense<0.000000e+00> : vector<16x128xf32>
    %496 = tpu.matmul %495, %493, %cst_364 {dimension_numbers = #tpu.dot_dimension_numbers<[1], [0], [0], [1], [0, 0, 1, 1], [], []>} : vector<16x16xbf16>, vector<16x128xbf16>, vector<16x128xf32> -> vector<16x128xf32>
    %497 = arith.addf %487, %496 : vector<16x128xf32>
    %c126_i32_365 = arith.constant 126 : i32
    %498 = tpu.dynamic_rotate %463 by %c126_i32_365 dim 1 : vector<16x128xf32>, i32 -> vector<16x128xf32>
    %c4_366 = arith.constant 4 : index
    %c0_367 = arith.constant 0 : index
    %c0_368 = arith.constant 0 : index
    %499 = vector.load %arg9[%c4_366, %c0_367, %c0_368] : memref<5x1x128xf32, #tpu.memory_space<vmem>>, vector<1x1x128xf32>
    %500 = vector.shape_cast %499 : vector<1x1x128xf32> to vector<1x128xf32>
    %501 = vector.broadcast %500 : vector<1x128xf32> to vector<16x128xf32>
    %502 = arith.mulf %498, %501 : vector<16x128xf32>
    %503 = arith.truncf %502 : vector<16x128xf32> to vector<16x128xbf16>
    %c4_369 = arith.constant 4 : index
    %c4_370 = arith.constant 4 : index
    %c0_371 = arith.constant 0 : index
    %c0_372 = arith.constant 0 : index
    %504 = vector.load %arg21[%c4_369, %c4_370, %c0_371, %c0_372] : memref<5x5x16x16xbf16, #tpu.memory_space<vmem>>, vector<1x1x16x16xbf16>
    %505 = vector.shape_cast %504 : vector<1x1x16x16xbf16> to vector<16x16xbf16>
    %cst_373 = arith.constant dense<0.000000e+00> : vector<16x128xf32>
    %506 = tpu.matmul %505, %503, %cst_373 {dimension_numbers = #tpu.dot_dimension_numbers<[1], [0], [0], [1], [0, 0, 1, 1], [], []>} : vector<16x16xbf16>, vector<16x128xbf16>, vector<16x128xf32> -> vector<16x128xf32>
    %507 = arith.addf %497, %506 : vector<16x128xf32>
    %c4_374 = arith.constant 4 : index
    %c0_375 = arith.constant 0 : index
    %c0_376 = arith.constant 0 : index
    %508 = vector.load %arg22[%c4_374, %c0_375, %c0_376] : memref<5x16x1xf32, #tpu.memory_space<vmem>>, vector<1x16x1xf32>
    %509 = vector.shape_cast %508 : vector<1x16x1xf32> to vector<16x1xf32>
    %510 = vector.broadcast %509 : vector<16x1xf32> to vector<16x128xf32>
    %511 = arith.addf %507, %510 : vector<16x128xf32>
    %cst_377 = arith.constant 0.000000e+00 : f32
    %512 = vector.broadcast %cst_377 : f32 to vector<16x128xf32>
    %513 = arith.maximumf %511, %512 : vector<16x128xf32>
    %cst_378 = arith.constant dense<0.000000e+00> : vector<128xf32>
    %514 = vector.multi_reduction <add>, %513, %cst_378 [0] : vector<16x128xf32> to vector<128xf32>
    %515 = vector.shape_cast %514 : vector<128xf32> to vector<1x128xf32>
    %cst_379 = arith.constant 1.600000e+01 : f32
    %516 = vector.broadcast %cst_379 : f32 to vector<1x128xf32>
    %517 = arith.divf %515, %516 : vector<1x128xf32>
    %518 = arith.mulf %513, %513 : vector<16x128xf32>
    %cst_380 = arith.constant dense<0.000000e+00> : vector<128xf32>
    %519 = vector.multi_reduction <add>, %518, %cst_380 [0] : vector<16x128xf32> to vector<128xf32>
    %520 = vector.shape_cast %519 : vector<128xf32> to vector<1x128xf32>
    %cst_381 = arith.constant 1.600000e+01 : f32
    %521 = vector.broadcast %cst_381 : f32 to vector<1x128xf32>
    %522 = arith.divf %520, %521 : vector<1x128xf32>
    %523 = arith.mulf %517, %517 : vector<1x128xf32>
    %524 = arith.subf %522, %523 : vector<1x128xf32>
    %c4_382 = arith.constant 4 : index
    %c0_383 = arith.constant 0 : index
    %c0_384 = arith.constant 0 : index
    %525 = vector.load %arg23[%c4_382, %c0_383, %c0_384] : memref<5x16x1xf32, #tpu.memory_space<vmem>>, vector<1x16x1xf32>
    %526 = vector.shape_cast %525 : vector<1x16x1xf32> to vector<16x1xf32>
    %527 = vector.broadcast %517 : vector<1x128xf32> to vector<16x128xf32>
    %528 = arith.subf %513, %527 : vector<16x128xf32>
    %cst_385 = arith.constant 9.99999974E-6 : f32
    %529 = vector.broadcast %cst_385 : f32 to vector<1x128xf32>
    %530 = arith.addf %524, %529 : vector<1x128xf32>
    %531 = math.rsqrt %530 : vector<1x128xf32>
    %532 = vector.broadcast %531 : vector<1x128xf32> to vector<16x128xf32>
    %533 = arith.mulf %528, %532 : vector<16x128xf32>
    %534 = vector.broadcast %526 : vector<16x1xf32> to vector<16x128xf32>
    %535 = arith.mulf %534, %533 : vector<16x128xf32>
    %c4_386 = arith.constant 4 : index
    %c0_387 = arith.constant 0 : index
    %c0_388 = arith.constant 0 : index
    %536 = vector.load %arg24[%c4_386, %c0_387, %c0_388] : memref<5x16x1xf32, #tpu.memory_space<vmem>>, vector<1x16x1xf32>
    %537 = vector.shape_cast %536 : vector<1x16x1xf32> to vector<16x1xf32>
    %538 = vector.broadcast %537 : vector<16x1xf32> to vector<16x128xf32>
    %539 = arith.addf %535, %538 : vector<16x128xf32>
    %c0_389 = arith.constant 0 : index
    %c0_390 = arith.constant 0 : index
    %540 = vector.load %arg25[%c0_389, %c0_390] : memref<16x1xf32, #tpu.memory_space<vmem>>, vector<16x1xf32>
    %541 = vector.broadcast %540 : vector<16x1xf32> to vector<16x128xf32>
    %542 = arith.mulf %541, %539 : vector<16x128xf32>
    %cst_391 = arith.constant dense<0.000000e+00> : vector<128xf32>
    %543 = vector.multi_reduction <add>, %542, %cst_391 [0] : vector<16x128xf32> to vector<128xf32>
    %544 = vector.shape_cast %543 : vector<128xf32> to vector<1x128xf32>
    %c0_392 = arith.constant 0 : index
    %c0_393 = arith.constant 0 : index
    %545 = vector.load %arg26[%c0_392, %c0_393] : memref<1x1xf32, #tpu.memory_space<vmem>>, vector<1x1xf32>
    %546 = vector.broadcast %545 : vector<1x1xf32> to vector<1x128xf32>
    %547 = arith.addf %544, %546 : vector<1x128xf32>
    %548 = arith.mulf %547, %159 : vector<1x128xf32>
    %c1_i32_394 = arith.constant 1 : i32
    %549 = tpu.dynamic_rotate %150 by %c1_i32_394 dim 1 : vector<16x128xf32>, i32 -> vector<16x128xf32>
    %c0_395 = arith.constant 0 : index
    %c0_396 = arith.constant 0 : index
    %c0_397 = arith.constant 0 : index
    %550 = vector.load %arg10[%c0_395, %c0_396, %c0_397] : memref<3x1x128xf32, #tpu.memory_space<vmem>>, vector<1x1x128xf32>
    %551 = vector.shape_cast %550 : vector<1x1x128xf32> to vector<1x128xf32>
    %552 = vector.broadcast %551 : vector<1x128xf32> to vector<16x128xf32>
    %553 = arith.mulf %549, %552 : vector<16x128xf32>
    %554 = arith.truncf %553 : vector<16x128xf32> to vector<16x128xbf16>
    %c0_398 = arith.constant 0 : index
    %c0_399 = arith.constant 0 : index
    %c0_400 = arith.constant 0 : index
    %c0_401 = arith.constant 0 : index
    %555 = vector.load %arg27[%c0_398, %c0_399, %c0_400, %c0_401] : memref<2x3x16x16xbf16, #tpu.memory_space<vmem>>, vector<1x1x16x16xbf16>
    %556 = vector.shape_cast %555 : vector<1x1x16x16xbf16> to vector<16x16xbf16>
    %cst_402 = arith.constant dense<0.000000e+00> : vector<16x128xf32>
    %557 = tpu.matmul %556, %554, %cst_402 {dimension_numbers = #tpu.dot_dimension_numbers<[1], [0], [0], [1], [0, 0, 1, 1], [], []>} : vector<16x16xbf16>, vector<16x128xbf16>, vector<16x128xf32> -> vector<16x128xf32>
    %558 = arith.truncf %150 : vector<16x128xf32> to vector<16x128xbf16>
    %c0_403 = arith.constant 0 : index
    %c1_404 = arith.constant 1 : index
    %c0_405 = arith.constant 0 : index
    %c0_406 = arith.constant 0 : index
    %559 = vector.load %arg27[%c0_403, %c1_404, %c0_405, %c0_406] : memref<2x3x16x16xbf16, #tpu.memory_space<vmem>>, vector<1x1x16x16xbf16>
    %560 = vector.shape_cast %559 : vector<1x1x16x16xbf16> to vector<16x16xbf16>
    %cst_407 = arith.constant dense<0.000000e+00> : vector<16x128xf32>
    %561 = tpu.matmul %560, %558, %cst_407 {dimension_numbers = #tpu.dot_dimension_numbers<[1], [0], [0], [1], [0, 0, 1, 1], [], []>} : vector<16x16xbf16>, vector<16x128xbf16>, vector<16x128xf32> -> vector<16x128xf32>
    %562 = arith.addf %557, %561 : vector<16x128xf32>
    %c127_i32_408 = arith.constant 127 : i32
    %563 = tpu.dynamic_rotate %150 by %c127_i32_408 dim 1 : vector<16x128xf32>, i32 -> vector<16x128xf32>
    %c2_409 = arith.constant 2 : index
    %c0_410 = arith.constant 0 : index
    %c0_411 = arith.constant 0 : index
    %564 = vector.load %arg10[%c2_409, %c0_410, %c0_411] : memref<3x1x128xf32, #tpu.memory_space<vmem>>, vector<1x1x128xf32>
    %565 = vector.shape_cast %564 : vector<1x1x128xf32> to vector<1x128xf32>
    %566 = vector.broadcast %565 : vector<1x128xf32> to vector<16x128xf32>
    %567 = arith.mulf %563, %566 : vector<16x128xf32>
    %568 = arith.truncf %567 : vector<16x128xf32> to vector<16x128xbf16>
    %c0_412 = arith.constant 0 : index
    %c2_413 = arith.constant 2 : index
    %c0_414 = arith.constant 0 : index
    %c0_415 = arith.constant 0 : index
    %569 = vector.load %arg27[%c0_412, %c2_413, %c0_414, %c0_415] : memref<2x3x16x16xbf16, #tpu.memory_space<vmem>>, vector<1x1x16x16xbf16>
    %570 = vector.shape_cast %569 : vector<1x1x16x16xbf16> to vector<16x16xbf16>
    %cst_416 = arith.constant dense<0.000000e+00> : vector<16x128xf32>
    %571 = tpu.matmul %570, %568, %cst_416 {dimension_numbers = #tpu.dot_dimension_numbers<[1], [0], [0], [1], [0, 0, 1, 1], [], []>} : vector<16x16xbf16>, vector<16x128xbf16>, vector<16x128xf32> -> vector<16x128xf32>
    %572 = arith.addf %562, %571 : vector<16x128xf32>
    %c0_417 = arith.constant 0 : index
    %c0_418 = arith.constant 0 : index
    %c0_419 = arith.constant 0 : index
    %573 = vector.load %arg28[%c0_417, %c0_418, %c0_419] : memref<2x16x1xf32, #tpu.memory_space<vmem>>, vector<1x16x1xf32>
    %574 = vector.shape_cast %573 : vector<1x16x1xf32> to vector<16x1xf32>
    %575 = vector.broadcast %574 : vector<16x1xf32> to vector<16x128xf32>
    %576 = arith.addf %572, %575 : vector<16x128xf32>
    %cst_420 = arith.constant 0.000000e+00 : f32
    %577 = vector.broadcast %cst_420 : f32 to vector<16x128xf32>
    %578 = arith.maximumf %576, %577 : vector<16x128xf32>
    %cst_421 = arith.constant dense<0.000000e+00> : vector<128xf32>
    %579 = vector.multi_reduction <add>, %578, %cst_421 [0] : vector<16x128xf32> to vector<128xf32>
    %580 = vector.shape_cast %579 : vector<128xf32> to vector<1x128xf32>
    %cst_422 = arith.constant 1.600000e+01 : f32
    %581 = vector.broadcast %cst_422 : f32 to vector<1x128xf32>
    %582 = arith.divf %580, %581 : vector<1x128xf32>
    %583 = arith.mulf %578, %578 : vector<16x128xf32>
    %cst_423 = arith.constant dense<0.000000e+00> : vector<128xf32>
    %584 = vector.multi_reduction <add>, %583, %cst_423 [0] : vector<16x128xf32> to vector<128xf32>
    %585 = vector.shape_cast %584 : vector<128xf32> to vector<1x128xf32>
    %cst_424 = arith.constant 1.600000e+01 : f32
    %586 = vector.broadcast %cst_424 : f32 to vector<1x128xf32>
    %587 = arith.divf %585, %586 : vector<1x128xf32>
    %588 = arith.mulf %582, %582 : vector<1x128xf32>
    %589 = arith.subf %587, %588 : vector<1x128xf32>
    %c0_425 = arith.constant 0 : index
    %c0_426 = arith.constant 0 : index
    %c0_427 = arith.constant 0 : index
    %590 = vector.load %arg29[%c0_425, %c0_426, %c0_427] : memref<2x16x1xf32, #tpu.memory_space<vmem>>, vector<1x16x1xf32>
    %591 = vector.shape_cast %590 : vector<1x16x1xf32> to vector<16x1xf32>
    %592 = vector.broadcast %582 : vector<1x128xf32> to vector<16x128xf32>
    %593 = arith.subf %578, %592 : vector<16x128xf32>
    %cst_428 = arith.constant 9.99999974E-6 : f32
    %594 = vector.broadcast %cst_428 : f32 to vector<1x128xf32>
    %595 = arith.addf %589, %594 : vector<1x128xf32>
    %596 = math.rsqrt %595 : vector<1x128xf32>
    %597 = vector.broadcast %596 : vector<1x128xf32> to vector<16x128xf32>
    %598 = arith.mulf %593, %597 : vector<16x128xf32>
    %599 = vector.broadcast %591 : vector<16x1xf32> to vector<16x128xf32>
    %600 = arith.mulf %599, %598 : vector<16x128xf32>
    %c0_429 = arith.constant 0 : index
    %c0_430 = arith.constant 0 : index
    %c0_431 = arith.constant 0 : index
    %601 = vector.load %arg30[%c0_429, %c0_430, %c0_431] : memref<2x16x1xf32, #tpu.memory_space<vmem>>, vector<1x16x1xf32>
    %602 = vector.shape_cast %601 : vector<1x16x1xf32> to vector<16x1xf32>
    %603 = vector.broadcast %602 : vector<16x1xf32> to vector<16x128xf32>
    %604 = arith.addf %600, %603 : vector<16x128xf32>
    %c1_i32_432 = arith.constant 1 : i32
    %605 = tpu.dynamic_rotate %604 by %c1_i32_432 dim 1 : vector<16x128xf32>, i32 -> vector<16x128xf32>
    %c0_433 = arith.constant 0 : index
    %c0_434 = arith.constant 0 : index
    %c0_435 = arith.constant 0 : index
    %606 = vector.load %arg10[%c0_433, %c0_434, %c0_435] : memref<3x1x128xf32, #tpu.memory_space<vmem>>, vector<1x1x128xf32>
    %607 = vector.shape_cast %606 : vector<1x1x128xf32> to vector<1x128xf32>
    %608 = vector.broadcast %607 : vector<1x128xf32> to vector<16x128xf32>
    %609 = arith.mulf %605, %608 : vector<16x128xf32>
    %610 = arith.truncf %609 : vector<16x128xf32> to vector<16x128xbf16>
    %c1_436 = arith.constant 1 : index
    %c0_437 = arith.constant 0 : index
    %c0_438 = arith.constant 0 : index
    %c0_439 = arith.constant 0 : index
    %611 = vector.load %arg27[%c1_436, %c0_437, %c0_438, %c0_439] : memref<2x3x16x16xbf16, #tpu.memory_space<vmem>>, vector<1x1x16x16xbf16>
    %612 = vector.shape_cast %611 : vector<1x1x16x16xbf16> to vector<16x16xbf16>
    %cst_440 = arith.constant dense<0.000000e+00> : vector<16x128xf32>
    %613 = tpu.matmul %612, %610, %cst_440 {dimension_numbers = #tpu.dot_dimension_numbers<[1], [0], [0], [1], [0, 0, 1, 1], [], []>} : vector<16x16xbf16>, vector<16x128xbf16>, vector<16x128xf32> -> vector<16x128xf32>
    %614 = arith.truncf %604 : vector<16x128xf32> to vector<16x128xbf16>
    %c1_441 = arith.constant 1 : index
    %c1_442 = arith.constant 1 : index
    %c0_443 = arith.constant 0 : index
    %c0_444 = arith.constant 0 : index
    %615 = vector.load %arg27[%c1_441, %c1_442, %c0_443, %c0_444] : memref<2x3x16x16xbf16, #tpu.memory_space<vmem>>, vector<1x1x16x16xbf16>
    %616 = vector.shape_cast %615 : vector<1x1x16x16xbf16> to vector<16x16xbf16>
    %cst_445 = arith.constant dense<0.000000e+00> : vector<16x128xf32>
    %617 = tpu.matmul %616, %614, %cst_445 {dimension_numbers = #tpu.dot_dimension_numbers<[1], [0], [0], [1], [0, 0, 1, 1], [], []>} : vector<16x16xbf16>, vector<16x128xbf16>, vector<16x128xf32> -> vector<16x128xf32>
    %618 = arith.addf %613, %617 : vector<16x128xf32>
    %c127_i32_446 = arith.constant 127 : i32
    %619 = tpu.dynamic_rotate %604 by %c127_i32_446 dim 1 : vector<16x128xf32>, i32 -> vector<16x128xf32>
    %c2_447 = arith.constant 2 : index
    %c0_448 = arith.constant 0 : index
    %c0_449 = arith.constant 0 : index
    %620 = vector.load %arg10[%c2_447, %c0_448, %c0_449] : memref<3x1x128xf32, #tpu.memory_space<vmem>>, vector<1x1x128xf32>
    %621 = vector.shape_cast %620 : vector<1x1x128xf32> to vector<1x128xf32>
    %622 = vector.broadcast %621 : vector<1x128xf32> to vector<16x128xf32>
    %623 = arith.mulf %619, %622 : vector<16x128xf32>
    %624 = arith.truncf %623 : vector<16x128xf32> to vector<16x128xbf16>
    %c1_450 = arith.constant 1 : index
    %c2_451 = arith.constant 2 : index
    %c0_452 = arith.constant 0 : index
    %c0_453 = arith.constant 0 : index
    %625 = vector.load %arg27[%c1_450, %c2_451, %c0_452, %c0_453] : memref<2x3x16x16xbf16, #tpu.memory_space<vmem>>, vector<1x1x16x16xbf16>
    %626 = vector.shape_cast %625 : vector<1x1x16x16xbf16> to vector<16x16xbf16>
    %cst_454 = arith.constant dense<0.000000e+00> : vector<16x128xf32>
    %627 = tpu.matmul %626, %624, %cst_454 {dimension_numbers = #tpu.dot_dimension_numbers<[1], [0], [0], [1], [0, 0, 1, 1], [], []>} : vector<16x16xbf16>, vector<16x128xbf16>, vector<16x128xf32> -> vector<16x128xf32>
    %628 = arith.addf %618, %627 : vector<16x128xf32>
    %c1_455 = arith.constant 1 : index
    %c0_456 = arith.constant 0 : index
    %c0_457 = arith.constant 0 : index
    %629 = vector.load %arg28[%c1_455, %c0_456, %c0_457] : memref<2x16x1xf32, #tpu.memory_space<vmem>>, vector<1x16x1xf32>
    %630 = vector.shape_cast %629 : vector<1x16x1xf32> to vector<16x1xf32>
    %631 = vector.broadcast %630 : vector<16x1xf32> to vector<16x128xf32>
    %632 = arith.addf %628, %631 : vector<16x128xf32>
    %cst_458 = arith.constant 0.000000e+00 : f32
    %633 = vector.broadcast %cst_458 : f32 to vector<16x128xf32>
    %634 = arith.maximumf %632, %633 : vector<16x128xf32>
    %cst_459 = arith.constant dense<0.000000e+00> : vector<128xf32>
    %635 = vector.multi_reduction <add>, %634, %cst_459 [0] : vector<16x128xf32> to vector<128xf32>
    %636 = vector.shape_cast %635 : vector<128xf32> to vector<1x128xf32>
    %cst_460 = arith.constant 1.600000e+01 : f32
    %637 = vector.broadcast %cst_460 : f32 to vector<1x128xf32>
    %638 = arith.divf %636, %637 : vector<1x128xf32>
    %639 = arith.mulf %634, %634 : vector<16x128xf32>
    %cst_461 = arith.constant dense<0.000000e+00> : vector<128xf32>
    %640 = vector.multi_reduction <add>, %639, %cst_461 [0] : vector<16x128xf32> to vector<128xf32>
    %641 = vector.shape_cast %640 : vector<128xf32> to vector<1x128xf32>
    %cst_462 = arith.constant 1.600000e+01 : f32
    %642 = vector.broadcast %cst_462 : f32 to vector<1x128xf32>
    %643 = arith.divf %641, %642 : vector<1x128xf32>
    %644 = arith.mulf %638, %638 : vector<1x128xf32>
    %645 = arith.subf %643, %644 : vector<1x128xf32>
    %c1_463 = arith.constant 1 : index
    %c0_464 = arith.constant 0 : index
    %c0_465 = arith.constant 0 : index
    %646 = vector.load %arg29[%c1_463, %c0_464, %c0_465] : memref<2x16x1xf32, #tpu.memory_space<vmem>>, vector<1x16x1xf32>
    %647 = vector.shape_cast %646 : vector<1x16x1xf32> to vector<16x1xf32>
    %648 = vector.broadcast %638 : vector<1x128xf32> to vector<16x128xf32>
    %649 = arith.subf %634, %648 : vector<16x128xf32>
    %cst_466 = arith.constant 9.99999974E-6 : f32
    %650 = vector.broadcast %cst_466 : f32 to vector<1x128xf32>
    %651 = arith.addf %645, %650 : vector<1x128xf32>
    %652 = math.rsqrt %651 : vector<1x128xf32>
    %653 = vector.broadcast %652 : vector<1x128xf32> to vector<16x128xf32>
    %654 = arith.mulf %649, %653 : vector<16x128xf32>
    %655 = vector.broadcast %647 : vector<16x1xf32> to vector<16x128xf32>
    %656 = arith.mulf %655, %654 : vector<16x128xf32>
    %c1_467 = arith.constant 1 : index
    %c0_468 = arith.constant 0 : index
    %c0_469 = arith.constant 0 : index
    %657 = vector.load %arg30[%c1_467, %c0_468, %c0_469] : memref<2x16x1xf32, #tpu.memory_space<vmem>>, vector<1x16x1xf32>
    %658 = vector.shape_cast %657 : vector<1x16x1xf32> to vector<16x1xf32>
    %659 = vector.broadcast %658 : vector<16x1xf32> to vector<16x128xf32>
    %660 = arith.addf %656, %659 : vector<16x128xf32>
    %c0_470 = arith.constant 0 : index
    %c0_471 = arith.constant 0 : index
    %661 = vector.load %arg31[%c0_470, %c0_471] : memref<16x1xf32, #tpu.memory_space<vmem>>, vector<16x1xf32>
    %662 = vector.broadcast %661 : vector<16x1xf32> to vector<16x128xf32>
    %663 = arith.mulf %662, %660 : vector<16x128xf32>
    %cst_472 = arith.constant dense<0.000000e+00> : vector<128xf32>
    %664 = vector.multi_reduction <add>, %663, %cst_472 [0] : vector<16x128xf32> to vector<128xf32>
    %665 = vector.shape_cast %664 : vector<128xf32> to vector<1x128xf32>
    %c0_473 = arith.constant 0 : index
    %c0_474 = arith.constant 0 : index
    %666 = vector.load %arg32[%c0_473, %c0_474] : memref<1x1xf32, #tpu.memory_space<vmem>>, vector<1x1xf32>
    %667 = vector.broadcast %666 : vector<1x1xf32> to vector<1x128xf32>
    %668 = arith.addf %665, %667 : vector<1x128xf32>
    %669 = arith.mulf %668, %159 : vector<1x128xf32>
    %670 = tpu.concatenate %548, %669 in 0 : vector<1x128xf32>, vector<1x128xf32> -> vector<2x128xf32>
    %c0_475 = arith.constant 0 : index
    %c0_476 = arith.constant 0 : index
    %c0_477 = arith.constant 0 : index
    %671 = vector.load %arg35[%c0_475, %c0_476, %c0_477] : memref<1x2x128xf32, #tpu.memory_space<vmem>>, vector<1x2x128xf32>
    %672 = vector.shape_cast %671 : vector<1x2x128xf32> to vector<2x128xf32>
    %673 = vector.shape_cast %670 : vector<2x128xf32> to vector<1x2x128xf32>
    tpu.vector_store %arg35[%c0_475, %c0_476, %c0_477], %673 {strides = array<i32>} : memref<1x2x128xf32, #tpu.memory_space<vmem>>, vector<1x2x128xf32>,
    return
  }
  func.func @transform_0(%arg0: i32) -> (i32, i32, i32) {
    %c0_i32 = arith.constant 0 : i32
    %c0_i32_0 = arith.constant 0 : i32
    %c0_i32_1 = arith.constant 0 : i32
    return %arg0, %c0_i32, %c0_i32_0 : i32, i32, i32
  }
  func.func @transform_1(%arg0: i32) -> (i32, i32, i32) {
    %c0_i32 = arith.constant 0 : i32
    %c0_i32_0 = arith.constant 0 : i32
    %c0_i32_1 = arith.constant 0 : i32
    return %arg0, %c0_i32, %c0_i32_0 : i32, i32, i32
  }
  func.func @transform_2(%arg0: i32) -> (i32, i32, i32) {
    %c0_i32 = arith.constant 0 : i32
    %c0_i32_0 = arith.constant 0 : i32
    %c0_i32_1 = arith.constant 0 : i32
    return %arg0, %c0_i32, %c0_i32_0 : i32, i32, i32
  }
  func.func @transform_3(%arg0: i32) -> (i32, i32, i32) {
    %c0_i32 = arith.constant 0 : i32
    %c0_i32_0 = arith.constant 0 : i32
    %c0_i32_1 = arith.constant 0 : i32
    return %arg0, %c0_i32, %c0_i32_0 : i32, i32, i32
  }
  func.func @transform_4(%arg0: i32) -> (i32, i32, i32) {
    %c0_i32 = arith.constant 0 : i32
    %c0_i32_0 = arith.constant 0 : i32
    %c0_i32_1 = arith.constant 0 : i32
    return %arg0, %c0_i32, %c0_i32_0 : i32, i32, i32
  }
  func.func @transform_5(%arg0: i32) -> (i32, i32, i32) {
    %c0_i32 = arith.constant 0 : i32
    %c0_i32_0 = arith.constant 0 : i32
    %c0_i32_1 = arith.constant 0 : i32
    return %arg0, %c0_i32, %c0_i32_0 : i32, i32, i32
  }
  func.func @transform_6(%arg0: i32) -> (i32, i32, i32) {
    %c0_i32 = arith.constant 0 : i32
    %c0_i32_0 = arith.constant 0 : i32
    %c0_i32_1 = arith.constant 0 : i32
    return %arg0, %c0_i32, %c0_i32_0 : i32, i32, i32
  }
  func.func @transform_7(%arg0: i32) -> (i32, i32, i32) {
    %c0_i32 = arith.constant 0 : i32
    %c0_i32_0 = arith.constant 0 : i32
    %c0_i32_1 = arith.constant 0 : i32
    %c0_i32_2 = arith.constant 0 : i32
    return %c0_i32, %c0_i32_0, %c0_i32_1 : i32, i32, i32
  }
  func.func @transform_8(%arg0: i32) -> (i32, i32, i32) {
    %c0_i32 = arith.constant 0 : i32
    %c0_i32_0 = arith.constant 0 : i32
    %c0_i32_1 = arith.constant 0 : i32
    %c0_i32_2 = arith.constant 0 : i32
    return %c0_i32, %c0_i32_0, %c0_i32_1 : i32, i32, i32
  }
  func.func @transform_9(%arg0: i32) -> (i32, i32, i32) {
    %c0_i32 = arith.constant 0 : i32
    %c0_i32_0 = arith.constant 0 : i32
    %c0_i32_1 = arith.constant 0 : i32
    %c0_i32_2 = arith.constant 0 : i32
    return %c0_i32, %c0_i32_0, %c0_i32_1 : i32, i32, i32
  }
  func.func @transform_10(%arg0: i32) -> (i32, i32) {
    %c0_i32 = arith.constant 0 : i32
    %c0_i32_0 = arith.constant 0 : i32
    %c0_i32_1 = arith.constant 0 : i32
    return %c0_i32, %c0_i32_0 : i32, i32
  }
  func.func @transform_11(%arg0: i32) -> (i32, i32) {
    %c0_i32 = arith.constant 0 : i32
    %c0_i32_0 = arith.constant 0 : i32
    %c0_i32_1 = arith.constant 0 : i32
    return %c0_i32, %c0_i32_0 : i32, i32
  }
  func.func @transform_12(%arg0: i32) -> (i32, i32) {
    %c0_i32 = arith.constant 0 : i32
    %c0_i32_0 = arith.constant 0 : i32
    %c0_i32_1 = arith.constant 0 : i32
    return %c0_i32, %c0_i32_0 : i32, i32
  }
  func.func @transform_13(%arg0: i32) -> (i32, i32) {
    %c0_i32 = arith.constant 0 : i32
    %c0_i32_0 = arith.constant 0 : i32
    %c0_i32_1 = arith.constant 0 : i32
    return %c0_i32, %c0_i32_0 : i32, i32
  }
  func.func @transform_14(%arg0: i32) -> (i32, i32, i32, i32) {
    %c0_i32 = arith.constant 0 : i32
    %c0_i32_0 = arith.constant 0 : i32
    %c0_i32_1 = arith.constant 0 : i32
    %c0_i32_2 = arith.constant 0 : i32
    %c0_i32_3 = arith.constant 0 : i32
    return %c0_i32, %c0_i32_0, %c0_i32_1, %c0_i32_2 : i32, i32, i32, i32
  }
  func.func @transform_15(%arg0: i32) -> (i32, i32, i32) {
    %c0_i32 = arith.constant 0 : i32
    %c0_i32_0 = arith.constant 0 : i32
    %c0_i32_1 = arith.constant 0 : i32
    %c0_i32_2 = arith.constant 0 : i32
    return %c0_i32, %c0_i32_0, %c0_i32_1 : i32, i32, i32
  }
  func.func @transform_16(%arg0: i32) -> (i32, i32, i32) {
    %c0_i32 = arith.constant 0 : i32
    %c0_i32_0 = arith.constant 0 : i32
    %c0_i32_1 = arith.constant 0 : i32
    %c0_i32_2 = arith.constant 0 : i32
    return %c0_i32, %c0_i32_0, %c0_i32_1 : i32, i32, i32
  }
  func.func @transform_17(%arg0: i32) -> (i32, i32, i32) {
    %c0_i32 = arith.constant 0 : i32
    %c0_i32_0 = arith.constant 0 : i32
    %c0_i32_1 = arith.constant 0 : i32
    %c0_i32_2 = arith.constant 0 : i32
    return %c0_i32, %c0_i32_0, %c0_i32_1 : i32, i32, i32
  }
  func.func @transform_18(%arg0: i32) -> (i32, i32) {
    %c0_i32 = arith.constant 0 : i32
    %c0_i32_0 = arith.constant 0 : i32
    %c0_i32_1 = arith.constant 0 : i32
    return %c0_i32, %c0_i32_0 : i32, i32
  }
  func.func @transform_19(%arg0: i32) -> (i32, i32) {
    %c0_i32 = arith.constant 0 : i32
    %c0_i32_0 = arith.constant 0 : i32
    %c0_i32_1 = arith.constant 0 : i32
    return %c0_i32, %c0_i32_0 : i32, i32
  }
  func.func @transform_20(%arg0: i32) -> (i32, i32, i32, i32) {
    %c0_i32 = arith.constant 0 : i32
    %c0_i32_0 = arith.constant 0 : i32
    %c0_i32_1 = arith.constant 0 : i32
    %c0_i32_2 = arith.constant 0 : i32
    %c0_i32_3 = arith.constant 0 : i32
    return %c0_i32, %c0_i32_0, %c0_i32_1, %c0_i32_2 : i32, i32, i32, i32
  }
  func.func @transform_21(%arg0: i32) -> (i32, i32, i32) {
    %c0_i32 = arith.constant 0 : i32
    %c0_i32_0 = arith.constant 0 : i32
    %c0_i32_1 = arith.constant 0 : i32
    %c0_i32_2 = arith.constant 0 : i32
    return %c0_i32, %c0_i32_0, %c0_i32_1 : i32, i32, i32
  }
  func.func @transform_22(%arg0: i32) -> (i32, i32, i32) {
    %c0_i32 = arith.constant 0 : i32
    %c0_i32_0 = arith.constant 0 : i32
    %c0_i32_1 = arith.constant 0 : i32
    %c0_i32_2 = arith.constant 0 : i32
    return %c0_i32, %c0_i32_0, %c0_i32_1 : i32, i32, i32
  }
  func.func @transform_23(%arg0: i32) -> (i32, i32, i32) {
    %c0_i32 = arith.constant 0 : i32
    %c0_i32_0 = arith.constant 0 : i32
    %c0_i32_1 = arith.constant 0 : i32
    %c0_i32_2 = arith.constant 0 : i32
    return %c0_i32, %c0_i32_0, %c0_i32_1 : i32, i32, i32
  }
  func.func @transform_24(%arg0: i32) -> (i32, i32) {
    %c0_i32 = arith.constant 0 : i32
    %c0_i32_0 = arith.constant 0 : i32
    %c0_i32_1 = arith.constant 0 : i32
    return %c0_i32, %c0_i32_0 : i32, i32
  }
  func.func @transform_25(%arg0: i32) -> (i32, i32) {
    %c0_i32 = arith.constant 0 : i32
    %c0_i32_0 = arith.constant 0 : i32
    %c0_i32_1 = arith.constant 0 : i32
    return %c0_i32, %c0_i32_0 : i32, i32
  }
  func.func @transform_26(%arg0: i32) -> (i32, i32, i32, i32) {
    %c0_i32 = arith.constant 0 : i32
    %c0_i32_0 = arith.constant 0 : i32
    %c0_i32_1 = arith.constant 0 : i32
    %c0_i32_2 = arith.constant 0 : i32
    %c0_i32_3 = arith.constant 0 : i32
    return %c0_i32, %c0_i32_0, %c0_i32_1, %c0_i32_2 : i32, i32, i32, i32
  }
  func.func @transform_27(%arg0: i32) -> (i32, i32, i32) {
    %c0_i32 = arith.constant 0 : i32
    %c0_i32_0 = arith.constant 0 : i32
    %c0_i32_1 = arith.constant 0 : i32
    %c0_i32_2 = arith.constant 0 : i32
    return %c0_i32, %c0_i32_0, %c0_i32_1 : i32, i32, i32
  }
  func.func @transform_28(%arg0: i32) -> (i32, i32, i32) {
    %c0_i32 = arith.constant 0 : i32
    %c0_i32_0 = arith.constant 0 : i32
    %c0_i32_1 = arith.constant 0 : i32
    %c0_i32_2 = arith.constant 0 : i32
    return %c0_i32, %c0_i32_0, %c0_i32_1 : i32, i32, i32
  }
  func.func @transform_29(%arg0: i32) -> (i32, i32, i32) {
    %c0_i32 = arith.constant 0 : i32
    %c0_i32_0 = arith.constant 0 : i32
    %c0_i32_1 = arith.constant 0 : i32
    %c0_i32_2 = arith.constant 0 : i32
    return %c0_i32, %c0_i32_0, %c0_i32_1 : i32, i32, i32
  }
  func.func @transform_30(%arg0: i32) -> (i32, i32) {
    %c0_i32 = arith.constant 0 : i32
    %c0_i32_0 = arith.constant 0 : i32
    %c0_i32_1 = arith.constant 0 : i32
    return %c0_i32, %c0_i32_0 : i32, i32
  }
  func.func @transform_31(%arg0: i32) -> (i32, i32) {
    %c0_i32 = arith.constant 0 : i32
    %c0_i32_0 = arith.constant 0 : i32
    %c0_i32_1 = arith.constant 0 : i32
    return %c0_i32, %c0_i32_0 : i32, i32
  }
  func.func @transform_32(%arg0: i32) -> (i32, i32, i32) {
    %c0_i32 = arith.constant 0 : i32
    %c0_i32_0 = arith.constant 0 : i32
    %c0_i32_1 = arith.constant 0 : i32
    return %arg0, %c0_i32, %c0_i32_0 : i32, i32, i32
  }
  func.func @transform_33(%arg0: i32) -> (i32, i32, i32) {
    %c0_i32 = arith.constant 0 : i32
    %c0_i32_0 = arith.constant 0 : i32
    %c0_i32_1 = arith.constant 0 : i32
    return %arg0, %c0_i32, %c0_i32_0 : i32, i32, i32
  }
  func.func @transform_34(%arg0: i32) -> (i32, i32, i32) {
    %c0_i32 = arith.constant 0 : i32
    %c0_i32_0 = arith.constant 0 : i32
    %c0_i32_1 = arith.constant 0 : i32
    return %arg0, %c0_i32, %c0_i32_0 : i32, i32, i32
  }
}

</mosaic_0001>

<bundles_post_ra>
// kernel: variance_adopter_forward.1
= control target key start
LH: loop header
LB: loop body
LE: loop exit
PB: predicated region body
PF: predicated region fallthrough
CT: control target
= control target key end

     0   :  { %s4167_s6 = smov 1   ;;  %s4168_s10 = smov 2   ;;  %s5009_s0 = inlined_call_operand.smem [shape: u32[35], index: -1, kind: input, shape index: {}] }
   0x1   :  { %s4217_s5 = sld [smem:[%s5009_s0]]   ;;  %s4169_s14 = smov 3  }
   0x2   :  { %s4222_s9 = sld [smem:[%s5009_s0 + %s4167_s6]]   ;;  %s4170_s18 = smov 4  }
   0x3   :  { %s4227_s13 = sld [smem:[%s5009_s0 + %s4168_s10]]   ;;  %s4171_s22 = smov 5  }
   0x4   :  { %s4232_s17 = sld [smem:[%s5009_s0 + %s4169_s14]]   ;;  %s4172_s26 = smov 6  }
   0x5   :  { %s4237_s21 = sld [smem:[%s5009_s0 + %s4170_s18]]   ;;  %s4173_s30 = smov 7  }
   0x6   :  { %s4242_s25 = sld [smem:[%s5009_s0 + %s4171_s22]]   ;;  %s4174_s4 = smov 8  }
   0x7   :  { %5050 = sst [smem:[#allocation11_spill]] %s4217_s5  ;;  %s4175_s10 = smov 9  }
   0x8   :  { %5051 = sst [smem:[#allocation12_spill]] %s4222_s9  ;;  %s4176_s15 = smov 10  }
   0x9   :  { %5052 = sst [smem:[#allocation13_spill]] %s4227_s13  ;;  %s4177_s20 = smov 11  }
   0xa   :  { %5053 = sst [smem:[#allocation14_spill]] %s4232_s17  ;;  %s4179_s1 = smov 13  }
   0xb   :  { %5054 = sst [smem:[#allocation15_spill]] %s4237_s21  ;;  %s4180_s7 = smov 14  }
   0xc   :  { %5055 = sst [smem:[#allocation16_spill]] %s4242_s25  ;;  %s4182_s22 = smov 16  }
   0xd   :  { %s4247_s29 = sld [smem:[%s5009_s0 + %s4172_s26]]   ;;  %s4178_s26 = smov 12  }
   0xe   :  { %s4252_s3 = sld [smem:[%s5009_s0 + %s4173_s30]]   ;;  %s4183_s28 = smov 17  }
   0xf   :  { %s4257_s8 = sld [smem:[%s5009_s0 + %s4174_s4]]   ;;  %s4186_s23 = smov 20  }
  0x10   :  { %s4262_s14 = sld [smem:[%s5009_s0 + %s4175_s10]]   ;;  %s4188_s10 = smov 22  }
  0x11   :  { %s4267_s19 = sld [smem:[%s5009_s0 + %s4176_s15]]   ;;  %s4181_s15 = smov 15  }
  0x12   :  { %s4272_s24 = sld [smem:[%s5009_s0 + %s4177_s20]]   ;;  %s4189_s16 = smov 23  }
  0x13   :  { %5056 = sst [smem:[#allocation17_spill]] %s4247_s29 }
  0x14   :  { %5057 = sst [smem:[#allocation18_spill]] %s4252_s3 }
  0x15   :  { %5058 = sst [smem:[#allocation19_spill]] %s4257_s8 }
  0x16   :  { %5059 = sst [smem:[#allocation20_spill]] %s4262_s14 }
  0x17   :  { %5060 = sst [smem:[#allocation21_spill]] %s4267_s19 }
  0x18   :  { %5061 = sst [smem:[#allocation22_spill]] %s4272_s24 }
  0x19   :  { %s4277_s30 = sld [smem:[%s5009_s0 + %s4178_s26]]  }
  0x1a   :  { %s4282_s6 = sld [smem:[%s5009_s0 + %s4179_s1]]   ;;  %s4187_s1 = smov 21  }
  0x1b   :  { %s4287_s12 = sld [smem:[%s5009_s0 + %s4180_s7]]   ;;  %s4184_s7 = smov 18  }
  0x1c   :  { %s4292_s20 = sld [smem:[%s5009_s0 + %s4181_s15]]   ;;  %s4185_s15 = smov 19  }
  0x1d   :  { %s4297_s27 = sld [smem:[%s5009_s0 + %s4182_s22]]   ;;  %s4194_s22 = smov 29  }
  0x1e   :  { %s4302_s4 = sld [smem:[%s5009_s0 + %s4183_s28]]  }
  0x1f   :  { %s4307_s13 = sld [smem:[%s5009_s0 + %s4184_s7]]  }
  0x20   :  { %5062 = sst [smem:[#allocation23_spill]] %s4282_s6 }
  0x21   :  { %5063 = sst [smem:[#allocation24_spill]] %s4287_s12 }
  0x22   :  { %5064 = sst [smem:[#allocation25_spill]] %s4292_s20 }
  0x23   :  { %s3581_s9 = sld [smem:[%s5009_s0 + %s4185_s15]]  }
  0x24   :  { %5065 = sst [smem:[#allocation26_spill]] %s4302_s4 }
  0x25   :  { %5066 = sst [smem:[#allocation27_spill]] %s4307_s13 }
  0x26   :  { %s4315_s14 = sld [smem:[%s5009_s0 + %s4186_s23]]   ;;  %s4190_s23 = smov 24  }
  0x27   :  { %s4320_s25 = sld [smem:[%s5009_s0 + %s4187_s1]]   ;;  %s4191_s1 = smov 26  }
  0x28   :  { %s4325_s13 = sld [smem:[%s5009_s0 + %s4188_s10]]   ;;  %s4192_s10 = smov 27  }
  0x29   :  { %s4330_s8 = sld [smem:[%s5009_s0 + %s4189_s16]]   ;;  %v75_v0 = vstv %s3581_s9  ;;  %s4193_s16 = smov 28  }
  0x2a   :  { %s4345_s15 = sld [smem:[%s5009_s0 + %s4192_s10]]   ;;  %76 = vst [vmem:[#allocation2] sm:$0x1] %v75_v0  ;;  %s4195_s9 = smov 30  }
  0x2b   :  { %s4360_s7 = sld [smem:[%s5009_s0 + %s4195_s9]]   ;;  %s4196_s10 = smov 32  }
  0x2c   :  { %5067 = sst [smem:[#allocation28_spill]] %s4315_s14  ;;  %s4199_s9 = smov 25  }
  0x2d   :  { %5068 = sst [smem:[#allocation29_spill]] %s4320_s25 }
  0x2e   :  { %5069 = sst [smem:[#allocation30_spill]] %s4325_s13 }
  0x2f   :  { %5070 = sst [smem:[#allocation31_spill]] %s4330_s8  ;;  %s4197_s8 = smov 33  }
  0x30   :  { %s4335_s14 = sld [smem:[%s5009_s0 + %s4190_s23]]  }
  0x31   :  { %s4340_s25 = sld [smem:[%s5009_s0 + %s4191_s1]]  }
  0x32   :  { %5073 = sst [smem:[#allocation34_spill]] %s4345_s15 }
  0x33   :  { %s4350_s23 = sld [smem:[%s5009_s0 + %s4193_s16]]  }
  0x34   :  { %s4355_s1 = sld [smem:[%s5009_s0 + %s4194_s22]]  }
  0x35   :  { %5076 = sst [smem:[#allocation37_spill]] %s4360_s7 }
  0x36   :  { %5071 = sst [smem:[#allocation32_spill]] %s4335_s14  ;;  %s4198_s14 = smov 34  }
  0x37   :  { %5072 = sst [smem:[#allocation33_spill]] %s4340_s25  ;;  %s4200_s25 = smov 31  }
  0x38   :  { %s4365_s15 = sld [smem:[%s5009_s0 + %s4196_s10]]  }
  0x39   :  { %5074 = sst [smem:[#allocation35_spill]] %s4350_s23 }
  0x3a   :  { %5075 = sst [smem:[#allocation36_spill]] %s4355_s1 }
  0x3b   :  { %s4370_s23 = sld [smem:[%s5009_s0 + %s4197_s8]]  }
  0x3c   :  { %s4375_s1 = sld [smem:[%s5009_s0 + %s4198_s14]]  }
  0x3d   :  { %s3587_s7 = sld [smem:[%s5009_s0 + %s4199_s9]]  }
  0x3e   :  { %5077 = sst [smem:[#allocation38_spill]] %s4365_s15 }
  0x3f   :  { %s3593_s15 = sld [smem:[%s5009_s0 + %s4200_s25]]  }
  0x43   :  { %v77_v1 = vstv %s3587_s7 }
  0x44   :  { %78 = vst [vmem:[#allocation3] sm:$0x1] %v77_v1 }
  0x45   :  { %v79_v2 = vstv %s3593_s15 }
  0x46   :  { %80 = vst [vmem:[#allocation4] sm:$0x1] %v79_v2 }
  0x47   :  { %81 = vsyncpa [#allocation6], 0 }
  0x48   :  { %83 = vsyncpa [#allocation6 + $0x1], 0 }
  0x49   :  { %84 = vsyncpa [#allocation8], 0 }
  0x4a   :  { %86 = vsyncpa [#allocation8 + $0x1], 0  ;;  %s4383_s8 = smov 0   ;;  %s4385_s16 = smov 0  }
  0x4b   :  { %s4387_s18 = smov 0   ;;  %s4389_s14 = smov 0  }
  0x4c LB: > { %s5078_s20 = sld [smem:[#allocation25_spill]]  ;;  %s4404_s0 = sadd.s32 4294967295, %s4165_s14   ;;  %s4157_s16 = sphi %s4385_s16, %s5114_s16   ;;  %s4153_s8 = sphi %s4383_s8, %s5113_s8   ;;  %s4165_s14 = sphi %s4389_s14, %s5116_s14   ;;  %s4161_s18 = sphi %s4387_s18, %s5115_s18  }
  0x4d   : > { %s5079_s13 = sld [smem:[#allocation30_spill]]  ;;  %s3598_s15 = sadd.s32 4294967294, %s4165_s14  }
  0x4e   : > { %s5080_s4 = sld [smem:[#allocation26_spill]]  ;;  %s4408_s7 = sadd.s32 1, %s4165_s14  }
  0x4f   : > { %s5081_s24 = sld [smem:[#allocation22_spill]]  ;;  %s806_s22 = sadd.s32 1, %s4161_s18 }
  0x50   : > { %s5082_s21 = sld [smem:[#allocation15_spill]]  ;;  %s803_s26 = ssub.s32 %s4165_s14, %s4408_s7 }
  0x51   : > { %s5083_s19 = sld [smem:[#allocation21_spill]]  ;;  %p816_p0 = scmp.ne.s32.totalorder %s4161_s18, %s4157_s16 }
  0x52   : > { %s5084_s17 = sld [smem:[#allocation14_spill]]  ;;  %p804_p1 = scmp.eq.s32.totalorder %s803_s26, 0 }
  0x53   : > { %s5085_s12 = sld [smem:[#allocation24_spill]]  ;;  %p817_p2 = scmp.eq.s32.totalorder %s4404_s0, 1 }
  0x54   : > { %s5086_s6 = sld [smem:[#allocation23_spill]]  ;;  %p822_p3 = scmp.ne.s32.totalorder %s4157_s16, %s4153_s8 }
  0x55   : > { %s5087_s3 = sld [smem:[#allocation18_spill]]  ;;  %p823_p4 = scmp.eq.s32.totalorder %s3598_s15, 1 }
  0x56   : > { %s4419_s9 = scalar_select %p804_p1, %s4161_s18, %s806_s22  }
  0x57   : > { %p4421_p5 = por %p817_p2, %p816_p0  ;;  %p4425_p6 = por %p823_p4, %p822_p3 }
  0x58   : > { %p3601_p7 = scmp.ge.s32.totalorder %s4165_s14, 1  ;;  %p1014_p8 = scmp.lt.s32.totalorder %s4165_s14, 3 }
  0x5a   : > { %p1015_p9 = pnand %p3601_p7, %p1014_p8 }
  0x5b   : > { %s5090_s5 = sld [smem:[#allocation11_spill]] (!%p1015_p9)  ;;  %p1128_p10 = scmp.lt.s32.totalorder (!%p1015_p9), %s4404_s0, 1 }
  0x5c   : > { %1018 = sbr.rel (%p1015_p9) target bundleno = 2457 (0x999), region = 148  ;;  %s5023_s15 = smov (!%p1015_p9), 1  }
  0x5d   : > { %s5025_s22 = smov (!%p1015_p9), 127   ;;  %s5091_s29 = sld [smem:[#allocation17_spill]] (!%p1015_p9) }
  0x61   : > { %v1569_v3 = vld [vmem:[%s5083_s19] sm:$0xff]  ;;  %v4201_v4 = vmov 0   ;;  %s4434_s25 = scalar_select %p1128_p10, %s4404_s0, 1  ;;  %v1570_v9 = vld [vmem:[%s5083_s19 + $0x8] sm:$0xff]  ;;  %vm1199_vm0 = vcmask 130048   ;;  %v3911_v32 = vld [vmem:[%s5085_s12 + $0x10] sm:$0xff] }
  0x62   : > { %4034 = vset.pattern.permute.xlu0 %v4201_v4  ;;  %4033 = vset.pattern.permute.xlu2 %v4201_v4  ;;  %v1587_v6 = vld [vmem:[%s5081_s24] sm:$0xff]  ;;  %v1588_v10 = vld [vmem:[%s5081_s24 + $0x8] sm:$0xff]  ;;  %v4204_v61 = vmov 16.0   ;;  %s5102_s19 = sld [smem:[#allocation34_spill]] }
  0x63   : > { %4035 = vset.pattern.permute.xlu1 %v4201_v4  ;;  %1574 = vperm.xlu2 %4033, %v1569_v3   ;;  %s3907_s10 = sshll.u32 %s4434_s25, 4  ;;  %v1278_v8 = vld [vmem:[%s5078_s20] sm:$0xff]  ;;  %s1141_s26 = scalar_lea.vmem %s5084_s17, %s4434_s25  ;;  %v1279_v12 = vld [vmem:[%s5078_s20 + $0x8] sm:$0xff]  ;;  %4047 = vrcp.f32 %v4204_v61 }
  0x64   : > { %s1132_s11 = scalar_lea.vmem %s5090_s5, %s3907_s10  ;;  %v1321_v11 = vld [vmem:[%s4297_s27] sm:$0xff]  ;;  %v1351_v13 = vld [vmem:[%s5080_s4 + $0x8] sm:$0xff]  ;;  %s3908_s10 = sshll.u32 %s4434_s25, 7 }
  0x65   : > { %v4438_v5 = vld [vmem:[%s1132_s11] sm:$0xff]  ;;  %v4445_v7 = vld [vmem:[%s1132_s11 + $0x8] sm:$0xff]  ;;  %s4473_s11 = scalar_lea.vmem %s5091_s29, %s3908_s10  ;;  %s5092_s10 = sld [smem:[#allocation29_spill]] }
  0x66   : > { %1177 = vrot.lane.b32.xlu1 %v4438_v5, %s5023_s15  ;;  %1239 = vrot.lane.b32.xlu0 %v4438_v5, %s5025_s22  ;;  %v1322_v14 = vld [vmem:[%s4297_s27 + $0x8] sm:$0xff]  ;;  %v1350_v15 = vld [vmem:[%s5080_s4] sm:$0xff]  ;;  %v1190_v16 = vpack.c.bf16 %v4445_v7, %v4438_v5  ;;  %s5101_s17 = smov 126   ;;  %s5104_s24 = sld [smem:[#allocation36_spill]] }
  0x67   : > { %v3910_v17 = vld [vmem:[%s5085_s12 + $0x8] sm:$0xff]  ;;  %v4466_v20 = vld [vmem:[%s5087_s3] ss:$0 sm:$0xff]  ;;  %v4469_v21 = vld [vmem:[%s5087_s3 + $0x2] ss:$0 sm:$0xff]  ;;  %s5095_s3 = sld [smem:[#allocation28_spill]] }
  0x68   : > { %1210 = vmatpush.bf16.msra.mxu0 %v1190_v16  ;;  %v4480_v30 = vld [vmem:[%s4473_s11 + $0x78] sm:$0xff]  ;;  %v3909_v31 = vld [vmem:[%s5085_s12] sm:$0xff]  ;;  %v4486_v33 = vld [vmem:[%s4473_s11 + $0x70] sm:$0xff]  ;;  %s5106_s29 = sld [smem:[#allocation33_spill]] }
  0x69   : > { %v4491_v34 = vld [vmem:[%s4473_s11 + $0x68] sm:$0xff]  ;;  %v4495_v35 = vld [vmem:[%s4473_s11 + $0x60] sm:$0xff]  ;;  %v4499_v36 = vld [vmem:[%s4473_s11 + $0x58] sm:$0xff]  ;;  %v4048_v2 = vpop.eup %4047 }
  0x6a   : > { %v4503_v37 = vld [vmem:[%s4473_s11 + $0x50] sm:$0xff]  ;;  %v4507_v38 = vld [vmem:[%s4473_s11 + $0x48] sm:$0xff]  ;;  %v4511_v39 = vld [vmem:[%s4473_s11 + $0x40] sm:$0xff]  ;;  %vm1306_vm1 = vweird.f32 %v4048_v2 }
  0x6b   : > { %1591 = vperm.xlu2 %4033, %v1587_v6   ;;  %3614 = vmatmul.msk.bf16.vlgmr.msra.gmra.mxu0 %vm1199_vm0, %v3910_v17  ;;  %v4515_v40 = vld [vmem:[%s4473_s11 + $0x38] sm:$0xff]  ;;  %v4519_v41 = vld [vmem:[%s4473_s11 + $0x30] sm:$0xff]  ;;  %v4523_v43 = vld [vmem:[%s4473_s11 + $0x28] sm:$0xff] }
  0x6c   : > { %v4038_v44 = vld [vmem:[%s1141_s26] ss:$0 sm:$0xff]  ;;  %v4534_v46 = vld [vmem:[%s4473_s11 + $0x18] sm:$0xff]  ;;  %v4538_v48 = vld [vmem:[%s4473_s11 + $0x10] sm:$0xff]  ;;  %s5028_s26 = smov 126  }
  0x6d   : > { %v4530_v45 = vld [vmem:[%s4473_s11 + $0x20] sm:$0xff]  ;;  %v4542_v49 = vld [vmem:[%s4473_s11 + $0x8] sm:$0xff] }
  0x6e   : > { %1179 = vrot.lane.b32.xlu1 %v4445_v7, %s5023_s15  ;;  %1241 = vrot.lane.b32.xlu0 %v4445_v7, %s5025_s22  ;;  %v4546_v52 = vld [vmem:[%s4473_s11] sm:$0xff]  ;;  %s5093_s11 = sld [smem:[#allocation31_spill]] }
  0x73   : > { %1282 = vperm.xlu2 %4033, %v1278_v8  }
  0x76   : > { %1579 = vperm.xlu0 %4034, %v1570_v9   ;;  %1596 = vperm.xlu1 %4035, %v1588_v10   ;;  %v1302_v10 = vmul.f32 16.0, %v4048_v2 }
  0x7b   : > { %1340 = vperm.xlu2 %4033, %v1321_v11  }
  0x7e   : > { %1287 = vperm.xlu1 %4035, %v1279_v12   ;;  %1345 = vperm.xlu0 %4034, %v1322_v14   ;;  %v1303_v14 = vsub.f32 1.0, %v1302_v10 }
  0x83   : > { %1359 = vperm.xlu2 %4033, %v1351_v13  }
  0x86   : > { %1354 = vperm.xlu1 %4035, %v1350_v15  }
  0xbd   : > { %v1575_v42 = vpop.permute.xlu2 %1574 }
  0xbe   : > { %v1585_v47 = vmul.f32 %v4038_v44, %v1575_v42 }
  0xc5   : > { %v1592_v50 = vpop.permute.xlu2 %1591 }
  0xc6   : > { %v1599_v51 = vadd.f32 %v1592_v50, %v1585_v47 }
  0xcd   : > { %v1283_v0 = vpop.permute.xlu2 %1282 }
  0xd8   : > { %v1178_v18 = vpop.permute.xlu1 %1177  ;;  %v1240_v19 = vpop.permute.xlu0 %1239 }
  0xd9   : > { %v1185_v24 = vmul.f32 %v4466_v20, %v1178_v18  ;;  %v1248_v25 = vmul.f32 %v4469_v21, %v1240_v19 }
  0xe0   : > { %v1180_v22 = vpop.permute.xlu1 %1179  ;;  %v1242_v23 = vpop.permute.xlu0 %1241 }
  0xe1   : > { %v1186_v26 = vmul.f32 %v4466_v20, %v1180_v22  ;;  %v1249_v27 = vmul.f32 %v4469_v21, %v1242_v23  ;;  %v1304_v22 = vmul.f32 %v4048_v2, %v1303_v14 }
  0xe3   : > { %v1187_v28 = vpack.c.bf16 %v1186_v26, %v1185_v24  ;;  %v1250_v29 = vpack.c.bf16 %v1249_v27, %v1248_v25  ;;  %v1305_v27 = vadd.f32 %v4048_v2, %v1304_v22  ;;  %v1601_v22 = vld [vmem:[%s4277_s30] sm:$0xff] }
  0xe5   : > { %1232 = vmatpush.bf16.msra.mxu1 %v1187_v28  ;;  %1269 = vmatpush.bf16.msra.mxu2 %v1250_v29  ;;  %v4550_v42 = vsel %vm1306_vm1, %v4048_v2, %v1305_v27  ;;  %v1952_v27 = vld [vmem:[%s5093_s11] sm:$0xff] }
  0xe8   : > { %3619 = vmatmul.msk.bf16.vlgmr.msra.gmra.mxu1 %vm1199_vm0, %v3909_v31  ;;  %3627 = vmatmul.msk.bf16.vlgmr.msra.gmra.mxu2 %vm1199_vm0, %v3911_v32  ;;  %v1580_v53 = vpop.permute.xlu0 %1579  ;;  %v1597_v55 = vpop.permute.xlu1 %1596 }
  0xe9   : > { %1633 = vmatpush.msrb.mxu2 %v4480_v30  ;;  %v1586_v54 = vmul.f32 %v4038_v44, %v1580_v53  ;;  %v1212_v58 = vpop.f32.mrf.mxu0 }
  0xeb   : > { %1634 = vmatpush.msrb.mxu2 %v4486_v33  ;;  %v1600_v56 = vadd.f32 %v1597_v55, %v1586_v54 }
  0xed   : > { %1635 = vmatpush.msrb.mxu2 %v4491_v34 }
  0xef   : > { %1636 = vmatpush.msrb.mxu2 %v4495_v35 }
  0xf0   : > { %v1288_v9 = vpop.permute.xlu1 %1287  ;;  %v1346_v10 = vpop.permute.xlu0 %1345 }
  0xf1   : > { %1637 = vmatpush.msrb.mxu2 %v4499_v36  ;;  %v1214_v1 = vpop.f32.mrf.mxu0 }
  0xf3   : > { %1638 = vmatpush.msrb.mxu2 %v4503_v37 }
  0xf5   : > { %1639 = vmatpush.msrb.mxu2 %v4507_v38 }
  0xf7   : > { %1640 = vmatpush.msrb.mxu2 %v4511_v39 }
  0xf9   : > { %1641 = vmatpush.msrb.mxu2 %v4515_v40 }
  0xfb   : > { %1642 = vmatpush.msrb.mxu2 %v4519_v41 }
  0xfd   : > { %1643 = vmatpush.msrb.mxu2 %v4523_v43 }
  0xff   : > { %1644 = vmatpush.msrb.mxu2 %v4530_v45 }
 0x101   : > { %1645 = vmatpush.msrb.mxu2 %v4534_v46 }
 0x103   : > { %1646 = vmatpush.msrb.mxu2 %v4538_v48 }
 0x105   : > { %1647 = vmatpush.msrb.mxu2 %v4542_v49 }
 0x107   : > { %1648 = vmatpush.msrb.mxu2 %v4546_v52 }
 0x108   : > { %1649 = vmatmul.f32.vlgmr.msrb.gmra.mxu2 %v1599_v51 }
 0x110   : > { %1652 = vmatmul.f32.gmra.mxu2 %v1600_v56 }
 0x165   : > { %v1234_v57 = vpop.f32.mrf.mxu1 }
 0x166   : > { %v1235_v59 = vadd.f32 %v1234_v57, %v1212_v58 }
 0x16b   : > { %v1271_v60 = vpop.f32.mrf.mxu2 }
 0x16c   : > { %v1276_v62 = vadd.f32 %v1271_v60, %v1235_v59 }
 0x16d   : > { %v1236_v63 = vpop.f32.mrf.mxu1 }
 0x16e   : > { %v1290_v3 = vadd.f32 %v1283_v0, %v1276_v62  ;;  %v1237_v4 = vadd.f32 %v1236_v63, %v1214_v1  ;;  %v1341_v63 = vpop.permute.xlu2 %1340 }
 0x170   : > { %v1292_v11 = vmax.f32 %v1290_v3, 0.0 }
 0x172   : > { %v1309_v15 = vmul.f32 %v1292_v11, %v1292_v11 }
 0x173   : > { %v1273_v6 = vpop.f32.mrf.mxu2 }
 0x174   : > { %v1277_v8 = vadd.f32 %v1273_v6, %v1237_v4 }
 0x176   : > { %v1291_v12 = vadd.f32 %v1288_v9, %v1277_v8 }
 0x178   : > { %v1293_v13 = vmax.f32 %v1291_v12, 0.0 }
 0x17a   : > { %v1294_v16 = vadd.f32 %v1293_v13, %v1292_v11  ;;  %v1310_v17 = vmul.f32 %v1293_v13, %v1293_v13 }
 0x17c   : > { %v1295_v18 = vrot.slane %v1294_v16, 4  ;;  %v1311_v19 = vadd.f32 %v1310_v17, %v1309_v15  ;;  %v1360_v15 = vpop.permute.xlu2 %1359 }
 0x17e   : > { %v1296_v23 = vadd.f32 %v1295_v18, %v1294_v16  ;;  %v1312_v24 = vrot.slane %v1311_v19, 4  ;;  %v1355_v16 = vpop.permute.xlu1 %1354 }
 0x180   : > { %v1297_v25 = vrot.slane %v1296_v23, 2  ;;  %v1313_v26 = vadd.f32 %v1312_v24, %v1311_v19  ;;  %v1602_v19 = vld [vmem:[%s4277_s30 + $0x8] sm:$0xff]  ;;  %v1887_v24 = vld [vmem:[%s5092_s10] sm:$0xff] }
 0x182   : > { %v1298_v28 = vadd.f32 %v1297_v25, %v1296_v23  ;;  %v1314_v29 = vrot.slane %v1313_v26, 2  ;;  %v1620_v23 = vld [vmem:[%s5086_s6 + $0x8] sm:$0xff] }
 0x183   : > { %v1888_v25 = vld [vmem:[%s5092_s10 + $0x8] sm:$0xff] }
 0x184   : > { %v1299_v31 = vrot.slane %v1298_v28, 1  ;;  %v1315_v32 = vadd.f32 %v1314_v29, %v1313_v26  ;;  %v1924_v26 = vld [vmem:[%s5079_s13 + $0x8] sm:$0xff] }
 0x185   : > { %v1953_v29 = vld [vmem:[%s5093_s11 + $0x8] sm:$0xff] }
 0x186   : > { %v1300_v44 = vadd.f32 %v1299_v31, %v1298_v28  ;;  %v1316_v47 = vrot.slane %v1315_v32, 1  ;;  %v1923_v28 = vld [vmem:[%s5079_s13] sm:$0xff] }
 0x187   : > { %v3913_v31 = vld [vmem:[%s5085_s12 + $0x20] sm:$0xff] }
 0x188   : > { %v1308_v50 = vmul.f32 %v4550_v42, %v1300_v44  ;;  %v1317_v51 = vadd.f32 %v1316_v47, %v1315_v32 }
 0x18a   : > { %v1318_v53 = vmul.f32 %v1317_v51, %v4550_v42  ;;  %v1319_v54 = vmul.f32 %v1308_v50, %v1308_v50  ;;  %v1324_v3 = vsub.f32 %v1293_v13, %v1308_v50  ;;  %v1323_v4 = vsub.f32 %v1292_v11, %v1308_v50  ;;  %v1619_v11 = vld [vmem:[%s5086_s6] sm:$0xff] }
 0x18b   : > { %v4556_v56 = vpop.f32.mrf.mxu2 }
 0x18c   : > { %v1320_v55 = vsub.f32 %v1318_v53, %v1319_v54 }
 0x18e   : > { %v1325_v57 = vadd.f32 1e-05, %v1320_v55 }
 0x190   : > { %4049 = vrsqrt.f32 %v1325_v57  ;;  %vm1332_vm3 = vweird.f32 %v1325_v57 }
 0x193   : > { %v4558_v60 = vpop.f32.mrf.mxu2 }
 0x194   : > { %v1781_v61 = vpack.c.bf16 %v4558_v60, %v4556_v56 }
 0x196   : > { %v4050_v58 = vpop.eup %4049  ;;  %1800 = vmatpush.bf16.msra.mxu2 %v1781_v61 }
 0x197   : > { %v1327_v59 = vmul.f32 %v4050_v58, %v1325_v57  ;;  %vm1333_vm2 = vweird.f32 %v4050_v58  ;;  %v3914_v57 = vld [vmem:[%s5085_s12 + $0x28] sm:$0xff] }
 0x198   : > { %vm1334_vm4 = vmor %vm1332_vm3, %vm1333_vm2 }
 0x199   : > { %v1328_v62 = vmul.f32 %v4050_v58, %v1327_v59 }
 0x19b   : > { %v1329_v0 = vmul.f32 0.5, %v1328_v62 }
 0x19d   : > { %v1330_v1 = vsub.f32 1.5, %v1329_v0 }
 0x19f   : > { %v1331_v2 = vmul.f32 %v4050_v58, %v1330_v1 }
 0x1a1   : > { %v1335_v6 = vsel %vm1334_vm4, %v4050_v58, %v1331_v2  ;;  %v3912_v2 = vld [vmem:[%s5085_s12 + $0x18] sm:$0xff]  ;;  %s5100_s12 = smov 127  }
 0x1a2   : > { %v1337_v8 = vmul.f32 %v1335_v6, %v1324_v3  ;;  %v1336_v9 = vmul.f32 %v1335_v6, %v1323_v4 }
 0x1a4   : > { %v1349_v12 = vmul.f32 %v1346_v10, %v1337_v8  ;;  %v1348_v14 = vmul.f32 %v1341_v63, %v1336_v9  ;;  %v3916_v10 = vld [vmem:[%s5095_s3 + $0x8] sm:$0xff] }
 0x1a6   : > { %v1363_v17 = vadd.f32 %v1360_v15, %v1349_v12  ;;  %v1362_v18 = vadd.f32 %v1355_v16, %v1348_v14 }
 0x1a8   : > { %1424 = vrot.lane.b32.xlu1 %v1363_v17, %s5025_s22  ;;  %1364 = vrot.lane.b32.xlu2 %v1362_v18, %s5023_s15  ;;  %v1374_v13 = vpack.c.bf16 %v1363_v17, %v1362_v18 }
 0x1a9   : > { %1422 = vrot.lane.b32.xlu0 %v1362_v18, %s5025_s22 }
 0x1aa   : > { %1393 = vmatpush.bf16.msra.mxu3 %v1374_v13 }
 0x1ad   : > { %3636 = vmatmul.msk.bf16.vlgmr.msra.gmra.mxu3 %vm1199_vm0, %v3913_v31 }
 0x1ae   : > { %1656 = vmatpush.msrb.mxu3 %v4480_v30 }
 0x1b0   : > { %1657 = vmatpush.msrb.mxu3 %v4486_v33  ;;  %1722 = vrot.lane.b32.xlu1 %v4556_v56, %s5023_s15 }
 0x1b1   : > { %1724 = vrot.lane.b32.xlu2 %v4558_v60, %s5023_s15  ;;  %1366 = vrot.lane.b32.xlu0 %v1363_v17, %s5023_s15  ;;  %s5030_s15 = smov 2  }
 0x1b2   : > { %1658 = vmatpush.msrb.mxu3 %v4491_v34 }
 0x1b4   : > { %1659 = vmatpush.msrb.mxu3 %v4495_v35 }
 0x1b6   : > { %1660 = vmatpush.msrb.mxu3 %v4499_v36 }
 0x1b8   : > { %1661 = vmatpush.msrb.mxu3 %v4503_v37  ;;  %1623 = vperm.xlu1 %4035, %v1619_v11   ;;  %v3918_v11 = vld [vmem:[%s5095_s3 + $0x18] sm:$0xff] }
 0x1b9   : > { %1611 = vperm.xlu2 %4033, %v1602_v19   ;;  %1606 = vperm.xlu0 %4034, %v1601_v22   ;;  %v3915_v19 = vld [vmem:[%s5095_s3] sm:$0xff] }
 0x1ba   : > { %1662 = vmatpush.msrb.mxu3 %v4507_v38 }
 0x1bc   : > { %1663 = vmatpush.msrb.mxu3 %v4511_v39 }
 0x1be   : > { %1664 = vmatpush.msrb.mxu3 %v4515_v40 }
 0x1c0   : > { %1665 = vmatpush.msrb.mxu3 %v4519_v41  ;;  %1809 = vrot.lane.b32.xlu1 %v4556_v56, %s5025_s22 }
 0x1c1   : > { %1811 = vrot.lane.b32.xlu2 %v4558_v60, %s5025_s22  ;;  %1628 = vperm.xlu0 %4034, %v1620_v23   ;;  %s5094_s22 = sld [smem:[#allocation19_spill]] }
 0x1c2   : > { %1666 = vmatpush.msrb.mxu3 %v4523_v43 }
 0x1c4   : > { %1667 = vmatpush.msrb.mxu3 %v4530_v45 }
 0x1c6   : > { %1668 = vmatpush.msrb.mxu3 %v4534_v46 }
 0x1c7   : > { %v4613_v54 = vld [vmem:[%s5094_s22 + $0x1] ss:$0 sm:$0xff]  ;;  %v4631_v9 = vld [vmem:[%s5094_s22 + $0x3] ss:$0 sm:$0xff]  ;;  %v4654_v22 = vld [vmem:[%s5094_s22 + $0x4] ss:$0 sm:$0xff] }
 0x1c8   : > { %1669 = vmatpush.msrb.mxu3 %v4538_v48  ;;  %1711 = vrot.lane.b32.xlu1 %v4558_v60, %s5030_s15 }
 0x1c9   : > { %1848 = vrot.lane.b32.xlu2 %v4556_v56, %s5028_s26  ;;  %1709 = vrot.lane.b32.xlu0 %v4556_v56, %s5030_s15  ;;  %v3917_v56 = vld [vmem:[%s5095_s3 + $0x10] sm:$0xff] }
 0x1ca   : > { %1670 = vmatpush.msrb.mxu3 %v4542_v49  ;;  %3674 = vmatmul.msk.bf16.vlgmr.msra.gmra.mxu2 %vm1199_vm0, %v3917_v56 }
 0x1cc   : > { %1671 = vmatpush.msrb.mxu3 %v4546_v52 }
 0x1d0   : > { %1891 = vperm.xlu1 %4035, %v1887_v24  }
 0x1d1   : > { %1896 = vperm.xlu2 %4033, %v1888_v25   ;;  %1850 = vrot.lane.b32.xlu0 %v4558_v60, %s5028_s26  ;;  %s5096_s26 = scalar_lea.vmem %s5082_s21, %s4434_s25  ;;  %s5103_s21 = sld [smem:[#allocation35_spill]] }
 0x1d2   : > { %v4040_v3 = vld [vmem:[%s5096_s26] ss:$0 sm:$0xff]  ;;  %s5097_s26 = sld [smem:[#allocation16_spill]] }
 0x1d8   : > { %1947 = vperm.xlu1 %4035, %v1924_v26   ;;  %s1147_s15 = scalar_lea.vmem %s5097_s26, %s4434_s25  ;;  %s4678_s26 = sand.u32 1, %s4157_s16  }
 0x1d9   : > { %1956 = vperm.xlu2 %4033, %v1952_v27   ;;  %1942 = vperm.xlu0 %4034, %v1923_v28   ;;  %s3602_s5 = sshll.u32 %s4678_s26, 4 }
 0x1da   : > { %s4683_s6 = scalar_lea.vmem [#allocation5], %s3602_s5  ;;  %s5098_s5 = smov 1  }
 0x1e1   : > { %1961 = vperm.xlu0 %4034, %v1953_v29  }
 0x202   : > { %v1365_v32 = vpop.permute.xlu2 %1364 }
 0x20b   : > { %v1725_v51 = vpop.permute.xlu2 %1724 }
 0x20c   : > { %v1732_v58 = vmul.f32 %v4613_v54, %v1725_v51 }
 0x213   : > { %v1612_v0 = vpop.permute.xlu2 %1611 }
 0x214   : > { %v1618_v16 = vmul.f32 %v4040_v3, %v1612_v0 }
 0x21a   : > { %v1425_v44 = vpop.permute.xlu1 %1424 }
 0x21b   : > { %v1427_v47 = vmul.f32 %v4469_v21, %v1425_v44  ;;  %v1423_v50 = vpop.permute.xlu0 %1422  ;;  %v1812_v12 = vpop.permute.xlu2 %1811 }
 0x21c   : > { %v1426_v53 = vmul.f32 %v4469_v21, %v1423_v50  ;;  %v1368_v21 = vmul.f32 %v4466_v20, %v1365_v32  ;;  %v4044_v32 = vld [vmem:[%s1147_s15] ss:$0 sm:$0xff]  ;;  %s5099_s15 = smov 2  }
 0x21e   : > { %v1428_v55 = vpack.c.bf16 %v1427_v47, %v1426_v53 }
 0x220   : > { %1447 = vmatpush.bf16.msrb.mxu1 %v1428_v55 }
 0x222   : > { %v1723_v59 = vpop.permute.xlu1 %1722 }
 0x223   : > { %v1731_v60 = vmul.f32 %v4613_v54, %v1723_v59  ;;  %3648 = vmatmul.msk.bf16.vlgmr.msrb.gmra.mxu1 %vm1199_vm0, %v3914_v57  ;;  %v1367_v61 = vpop.permute.xlu0 %1366 }
 0x224   : > { %v1369_v62 = vmul.f32 %v4466_v20, %v1367_v61 }
 0x225   : > { %v1733_v63 = vpack.c.bf16 %v1732_v58, %v1731_v60 }
 0x226   : > { %v1370_v1 = vpack.c.bf16 %v1369_v62, %v1368_v21 }
 0x227   : > { %1752 = vmatpush.bf16.msra.mxu1 %v1733_v63 }
 0x228   : > { %1415 = vmatpush.bf16.msrb.mxu0 %v1370_v1 }
 0x22a   : > { %v1624_v4 = vpop.permute.xlu1 %1623 }
 0x22b   : > { %3641 = vmatmul.msk.bf16.vlgmr.msrb.gmra.mxu0 %vm1199_vm0, %v3912_v2  ;;  %v1607_v6 = vpop.permute.xlu0 %1606 }
 0x22c   : > { %1683 = vmatpush.msra.mxu0 %v4480_v30  ;;  %v1617_v8 = vmul.f32 %v4040_v3, %v1607_v6  ;;  %v1819_v30 = vmul.f32 %v4631_v9, %v1812_v12 }
 0x22e   : > { %1684 = vmatpush.msra.mxu0 %v4486_v33  ;;  %v1631_v20 = vadd.f32 %v1624_v4, %v1617_v8 }
 0x230   : > { %1685 = vmatpush.msra.mxu0 %v4491_v34  ;;  %1672 = vmatmul.f32.vlgmr.msrb.gmra.mxu3 %v1631_v20  ;;  %v1395_v24 = vpop.f32.mrf.mxu3 }
 0x232   : > { %1686 = vmatpush.msra.mxu0 %v4495_v35  ;;  %v1810_v14 = vpop.permute.xlu1 %1809  ;;  %v4643_v35 = vld [vmem:[%s5094_s22] ss:$0 sm:$0xff] }
 0x233   : > { %v1818_v15 = vmul.f32 %v4631_v9, %v1810_v14  ;;  %3662 = vmatmul.msk.bf16.vlgmr.msra.gmra.mxu1 %vm1199_vm0, %v3916_v10  ;;  %v1629_v33 = vpop.permute.xlu0 %1628 }
 0x234   : > { %1687 = vmatpush.msra.mxu0 %v4499_v36  ;;  %v1632_v17 = vadd.f32 %v1629_v33, %v1618_v16 }
 0x235   : > { %v1820_v34 = vpack.c.bf16 %v1819_v30, %v1818_v15 }
 0x236   : > { %1688 = vmatpush.msra.mxu0 %v4503_v37 }
 0x237   : > { %1839 = vmatpush.bf16.msra.mxu3 %v1820_v34 }
 0x238   : > { %1689 = vmatpush.msra.mxu0 %v4507_v38  ;;  %1675 = vmatmul.f32.gmra.mxu3 %v1632_v17  ;;  %v1397_v28 = vpop.f32.mrf.mxu3 }
 0x23a   : > { %1690 = vmatpush.msra.mxu0 %v4511_v39  ;;  %v1712_v36 = vpop.permute.xlu1 %1711  ;;  %v1849_v39 = vpop.permute.xlu2 %1848 }
 0x23b   : > { %v1718_v18 = vmul.f32 %v4643_v35, %v1712_v36  ;;  %v1710_v13 = vpop.permute.xlu0 %1709 }
 0x23c   : > { %1691 = vmatpush.msra.mxu0 %v4515_v40  ;;  %v1717_v37 = vmul.f32 %v4643_v35, %v1710_v13 }
 0x23e   : > { %1692 = vmatpush.msra.mxu0 %v4519_v41  ;;  %v1719_v38 = vpack.c.bf16 %v1718_v18, %v1717_v37  ;;  %v1857_v41 = vmul.f32 %v4654_v22, %v1849_v39 }
 0x240   : > { %1693 = vmatpush.msra.mxu0 %v4523_v43  ;;  %1774 = vmatpush.bf16.msrb.mxu1 %v1719_v38 }
 0x241   : > { %3682 = vmatmul.msk.bf16.vlgmr.msra.gmra.mxu3 %vm1199_vm0, %v3918_v11 }
 0x242   : > { %1694 = vmatpush.msra.mxu0 %v4530_v45  ;;  %v3919_v45 = vld [vmem:[%s5095_s3 + $0x20] sm:$0xff]  ;;  %v1892_v3 = vpop.permute.xlu1 %1891  ;;  %v1897_v10 = vpop.permute.xlu2 %1896 }
 0x243   : > { %3667 = vmatmul.msk.bf16.vlgmr.msrb.gmra.mxu1 %vm1199_vm0, %v3915_v19  ;;  %v1851_v40 = vpop.permute.xlu0 %1850 }
 0x244   : > { %1695 = vmatpush.msra.mxu0 %v4534_v46  ;;  %v1858_v43 = vmul.f32 %v4654_v22, %v1851_v40 }
 0x246   : > { %1696 = vmatpush.msra.mxu0 %v4538_v48  ;;  %v1859_v23 = vpack.c.bf16 %v1858_v43, %v1857_v41 }
 0x248   : > { %1697 = vmatpush.msra.mxu0 %v4542_v49 }
 0x24a   : > { %1698 = vmatpush.msra.mxu0 %v4546_v52 }
 0x24b   : > { %1699 = vmatmul.f32.vlgmr.msra.gmra.mxu0 %v4438_v5 }
 0x24c   : > { %1878 = vmatpush.bf16.msrb.mxu0 %v1859_v23 }
 0x24d   : > { %v1802_v53 = vpop.f32.mrf.mxu2 }
 0x253   : > { %1702 = vmatmul.f32.gmra.mxu0 %v4445_v7 }
 0x255   : > { %v1804_v21 = vpop.f32.mrf.mxu2 }
 0x25b   : > { %3690 = vmatmul.msk.bf16.vlgmr.msrb.gmra.mxu0 %vm1199_vm0, %v3919_v45 }
 0x2a0   : > { %v1449_v46 = vpop.f32.mrf.mxu1 }
 0x2a8   : > { %v1417_v48 = vpop.f32.mrf.mxu0  ;;  %v1451_v26 = vpop.f32.mrf.mxu1 }
 0x2a9   : > { %v1418_v25 = vadd.f32 %v1417_v48, %v1395_v24 }
 0x2ab   : > { %v4671_v27 = vadd.f32 %v1449_v46, %v1418_v25 }
 0x2b0   : > { %v1419_v49 = vpop.f32.mrf.mxu0  ;;  %v1754_v5 = vpop.f32.mrf.mxu1 }
 0x2b1   : > { %v1420_v29 = vadd.f32 %v1419_v49, %v1397_v28  ;;  %v1943_v49 = vpop.permute.xlu0 %1942 }
 0x2b3   : > { %v4673_v52 = vadd.f32 %v1451_v26, %v1420_v29  ;;  %v4675_v31 = vpop.f32.mrf.mxu3 }
 0x2b8   : > { %v1756_v7 = vpop.f32.mrf.mxu1 }
 0x2bb   : > { %v4681_v44 = vpop.f32.mrf.mxu3 }
 0x2c0   : > { %v1776_v51 = vpop.f32.mrf.mxu1 }
 0x2c1   : > { %v1777_v56 = vadd.f32 %v1776_v51, %v1754_v5 }
 0x2c3   : > { %v1807_v60 = vadd.f32 %v1802_v53, %v1777_v56 }
 0x2c4   : > { %v1841_v58 = vpop.f32.mrf.mxu3 }
 0x2c5   : > { %v1846_v63 = vadd.f32 %v1841_v58, %v1807_v60  ;;  %v1957_v58 = vpop.permute.xlu2 %1956 }
 0x2c8   : > { %v1700_v47 = vpop.f32.mrf.mxu0  ;;  %v1778_v59 = vpop.f32.mrf.mxu1 }
 0x2c9   : > { %v1701_v50 = vadd.f32 %v4044_v32, %v1700_v47  ;;  %v1779_v61 = vadd.f32 %v1778_v59, %v1756_v7  ;;  %v1962_v59 = vpop.permute.xlu0 %1961 }
 0x2cb   : > { %1706 = vst [vmem:[%s4683_s6] sm:$0xff] %v1701_v50  ;;  %v1808_v0 = vadd.f32 %v1804_v21, %v1779_v61 }
 0x2cc   : > { %v1843_v2 = vpop.f32.mrf.mxu3 }
 0x2cd   : > { %v1847_v4 = vadd.f32 %v1843_v2, %v1808_v0  ;;  %v3729_v0 = vld [vmem:[%s5079_s13 + $0x18] sm:$0xff] }
 0x2ce   : > { %v3731_v2 = vld [vmem:[%s5093_s11 + $0x18] sm:$0xff] }
 0x2d0   : > { %v1703_v55 = vpop.f32.mrf.mxu0 }
 0x2d1   : > { %v1704_v57 = vadd.f32 %v4044_v32, %v1703_v55  ;;  %v1948_v55 = vpop.permute.xlu1 %1947 }
 0x2d3   : > { %1707 = vst [vmem:[%s4683_s6 + $0x8] sm:$0xff] %v1704_v57 }
 0x2d8   : > { %v1880_v62 = vpop.f32.mrf.mxu0 }
 0x2d9   : > { %v1885_v1 = vadd.f32 %v1880_v62, %v1846_v63  ;;  %v3726_v62 = vld [vmem:[%s5092_s10 + $0x10] sm:$0xff] }
 0x2da   : > { %v3728_v63 = vld [vmem:[%s5079_s13 + $0x10] sm:$0xff] }
 0x2db   : > { %v1899_v6 = vadd.f32 %v1892_v3, %v1885_v1  ;;  %v3727_v1 = vld [vmem:[%s5092_s10 + $0x18] sm:$0xff]  ;;  %v3730_v3 = vld [vmem:[%s5093_s11 + $0x10] sm:$0xff] }
 0x2dd   : > { %v1901_v12 = vmax.f32 %v1899_v6, 0.0 }
 0x2df   : > { %v1911_v15 = vmul.f32 %v1901_v12, %v1901_v12 }
 0x2e0   : > { %v1882_v8 = vpop.f32.mrf.mxu0 }
 0x2e1   : > { %v1886_v20 = vadd.f32 %v1882_v8, %v1847_v4  ;;  %v3922_v4 = vld [vmem:[%s5095_s3 + $0x38] sm:$0xff] }
 0x2e3   : > { %v1900_v30 = vadd.f32 %v1897_v10, %v1886_v20 }
 0x2e5   : > { %v1902_v14 = vmax.f32 %v1900_v30, 0.0 }
 0x2e7   : > { %v1903_v33 = vadd.f32 %v1902_v14, %v1901_v12  ;;  %v1912_v16 = vmul.f32 %v1902_v14, %v1902_v14 }
 0x2e9   : > { %v1904_v34 = vrot.slane %v1903_v33, 4  ;;  %v1913_v17 = vadd.f32 %v1912_v16, %v1911_v15  ;;  %v3921_v15 = vld [vmem:[%s5095_s3 + $0x30] sm:$0xff] }
 0x2eb   : > { %v1905_v36 = vadd.f32 %v1904_v34, %v1903_v33  ;;  %v1914_v18 = vrot.slane %v1913_v17, 4 }
 0x2ed   : > { %v1906_v13 = vrot.slane %v1905_v36, 2  ;;  %v1915_v37 = vadd.f32 %v1914_v18, %v1913_v17 }
 0x2ef   : > { %v1907_v11 = vadd.f32 %v1906_v13, %v1905_v36  ;;  %v1916_v38 = vrot.slane %v1915_v37, 2 }
 0x2f1   : > { %v1908_v19 = vrot.slane %v1907_v11, 1  ;;  %v1917_v39 = vadd.f32 %v1916_v38, %v1915_v37  ;;  %v3920_v38 = vld [vmem:[%s5095_s3 + $0x28] sm:$0xff] }
 0x2f3   : > { %v1909_v40 = vadd.f32 %v1908_v19, %v1907_v11  ;;  %v1918_v41 = vrot.slane %v1917_v39, 1  ;;  %v3923_v11 = vld [vmem:[%s5095_s3 + $0x40] sm:$0xff] }
 0x2f5   : > { %v1910_v43 = vmul.f32 %v1909_v40, %v4550_v42  ;;  %v1919_v23 = vadd.f32 %v1918_v41, %v1917_v39 }
 0x2f7   : > { %v1920_v45 = vmul.f32 %v1919_v23, %v4550_v42  ;;  %v1921_v46 = vmul.f32 %v1910_v43, %v1910_v43  ;;  %v1925_v32 = vsub.f32 %v1901_v12, %v1910_v43  ;;  %v1926_v47 = vsub.f32 %v1902_v14, %v1910_v43  ;;  %v3924_v23 = vld [vmem:[%s5095_s3 + $0x48] sm:$0xff] }
 0x2f9   : > { %v1922_v24 = vsub.f32 %v1920_v45, %v1921_v46 }
 0x2fb   : > { %v1927_v48 = vadd.f32 1e-05, %v1922_v24 }
 0x2fd   : > { %4051 = vrsqrt.f32 %v1927_v48  ;;  %vm1934_vm6 = vweird.f32 %v1927_v48 }
 0x303   : > { %v4052_v25 = vpop.eup %4051 }
 0x304   : > { %v1929_v26 = vmul.f32 %v4052_v25, %v1927_v48  ;;  %vm1935_vm5 = vweird.f32 %v4052_v25 }
 0x305   : > { %vm1936_vm7 = vmor %vm1934_vm6, %vm1935_vm5 }
 0x306   : > { %v1930_v28 = vmul.f32 %v4052_v25, %v1929_v26 }
 0x308   : > { %v1931_v29 = vmul.f32 0.5, %v1930_v28 }
 0x30a   : > { %v1932_v5 = vsub.f32 1.5, %v1931_v29 }
 0x30c   : > { %v1933_v7 = vmul.f32 %v4052_v25, %v1932_v5 }
 0x30e   : > { %v1937_v50 = vsel %vm1936_vm7, %v4052_v25, %v1933_v7 }
 0x30f   : > { %v1938_v51 = vmul.f32 %v1937_v50, %v1925_v32  ;;  %v1939_v53 = vmul.f32 %v1937_v50, %v1926_v47 }
 0x311   : > { %v1950_v56 = vmul.f32 %v1943_v49, %v1938_v51  ;;  %v1951_v57 = vmul.f32 %v1948_v55, %v1939_v53 }
 0x313   : > { %v1965_v60 = vadd.f32 %v1962_v59, %v1951_v57  ;;  %v1964_v61 = vadd.f32 %v1957_v58, %v1950_v56 }
 0x315   : > { %1978 = vrot.lane.b32.xlu2 %v1965_v60, %s5098_s5  ;;  %1966 = vrot.lane.b32.xlu0 %v1964_v61, %s5099_s15  ;;  %v2030_v21 = vpack.c.bf16 %v1965_v60, %v1964_v61 }
 0x316   : > { %1976 = vrot.lane.b32.xlu1 %v1964_v61, %s5098_s5 }
 0x317   : > { %2049 = vmatpush.bf16.msrb.mxu3 %v2030_v21 }
 0x31a   : > { %3711 = vmatmul.msk.bf16.vlgmr.msrb.gmra.mxu3 %vm1199_vm0, %v3922_v4 }
 0x31d   : > { %2058 = vrot.lane.b32.xlu2 %v1964_v61, %s5100_s12  ;;  %2060 = vrot.lane.b32.xlu0 %v1965_v60, %s5100_s12 }
 0x31e   : > { %1968 = vrot.lane.b32.xlu1 %v1965_v60, %s5099_s15 }
 0x325   : > { %2094 = vrot.lane.b32.xlu2 %v1965_v60, %s5101_s17  ;;  %2131 = vperm.xlu0 %4034, %v3726_v62  }
 0x326   : > { %2092 = vrot.lane.b32.xlu1 %v1964_v61, %s5101_s17 }
 0x32d   : > { %2183 = vperm.xlu2 %4033, %v3728_v63   ;;  %2188 = vperm.xlu0 %4034, %v3729_v0  }
 0x32e   : > { %2136 = vperm.xlu1 %4035, %v3727_v1  }
 0x335   : > { %2203 = vperm.xlu2 %4033, %v3731_v2  }
 0x336   : > { %2198 = vperm.xlu1 %4035, %v3730_v3  }
 0x36f   : > { %v1979_v6 = vpop.permute.xlu2 %1978 }
 0x370   : > { %v1981_v10 = vmul.f32 %v4613_v54, %v1979_v6 }
 0x377   : > { %v2059_v14 = vpop.permute.xlu2 %2058 }
 0x378   : > { %v2062_v16 = vmul.f32 %v4631_v9, %v2059_v14 }
 0x37f   : > { %v2095_v19 = vpop.permute.xlu2 %2094 }
 0x380   : > { %v2097_v40 = vmul.f32 %v4654_v22, %v2095_v19 }
 0x387   : > { %v1967_v8 = vpop.permute.xlu0 %1966 }
 0x388   : > { %v1977_v20 = vpop.permute.xlu1 %1976  ;;  %v1970_v36 = vmul.f32 %v4643_v35, %v1967_v8 }
 0x389   : > { %v1980_v12 = vmul.f32 %v4613_v54, %v1977_v20 }
 0x38b   : > { %v1982_v30 = vpack.c.bf16 %v1981_v10, %v1980_v12 }
 0x38d   : > { %2001 = vmatpush.bf16.msra.mxu1 %v1982_v30 }
 0x38f   : > { %v2061_v33 = vpop.permute.xlu0 %2060 }
 0x390   : > { %v2063_v34 = vmul.f32 %v4631_v9, %v2061_v33  ;;  %3699 = vmatmul.msk.bf16.vlgmr.msra.gmra.mxu1 %vm1199_vm0, %v3921_v15  ;;  %v1969_v17 = vpop.permute.xlu1 %1968 }
 0x391   : > { %v1971_v18 = vmul.f32 %v4643_v35, %v1969_v17 }
 0x392   : > { %v2064_v13 = vpack.c.bf16 %v2063_v34, %v2062_v16 }
 0x393   : > { %v1972_v37 = vpack.c.bf16 %v1971_v18, %v1970_v36 }
 0x394   : > { %2083 = vmatpush.bf16.msra.mxu0 %v2064_v13 }
 0x395   : > { %2023 = vmatpush.bf16.msrb.mxu2 %v1972_v37 }
 0x397   : > { %3718 = vmatmul.msk.bf16.vlgmr.msra.gmra.mxu0 %vm1199_vm0, %v3923_v11  ;;  %v2132_v51 = vpop.permute.xlu0 %2131 }
 0x398   : > { %3704 = vmatmul.msk.bf16.vlgmr.msrb.gmra.mxu2 %vm1199_vm0, %v3920_v38  ;;  %v2093_v39 = vpop.permute.xlu1 %2092  ;;  %v2184_v38 = vpop.permute.xlu2 %2183 }
 0x399   : > { %v2096_v41 = vmul.f32 %v4654_v22, %v2093_v39 }
 0x39b   : > { %v2098_v43 = vpack.c.bf16 %v2097_v40, %v2096_v41 }
 0x39d   : > { %2117 = vmatpush.bf16.msrb.mxu1 %v2098_v43  ;;  %v2051_v24 = vpop.f32.mrf.mxu3 }
 0x3a0   : > { %3725 = vmatmul.msk.bf16.vlgmr.msrb.gmra.mxu1 %vm1199_vm0, %v3924_v23  ;;  %v2137_v59 = vpop.permute.xlu1 %2136 }
 0x3a5   : > { %v2053_v47 = vpop.f32.mrf.mxu3 }
 0x40d   : > { %v2003_v45 = vpop.f32.mrf.mxu1 }
 0x414   : > { %v2085_v26 = vpop.f32.mrf.mxu0 }
 0x415   : > { %v2005_v46 = vpop.f32.mrf.mxu1 }
 0x41b   : > { %v2025_v48 = vpop.f32.mrf.mxu2 }
 0x41c   : > { %v2026_v25 = vadd.f32 %v2025_v48, %v2003_v45  ;;  %v2087_v53 = vpop.f32.mrf.mxu0 }
 0x41d   : > { %v2119_v49 = vpop.f32.mrf.mxu1 }
 0x41e   : > { %v2056_v28 = vadd.f32 %v2051_v24, %v2026_v25  ;;  %v2189_v24 = vpop.permute.xlu0 %2188 }
 0x420   : > { %v2090_v29 = vadd.f32 %v2085_v26, %v2056_v28  ;;  %v2204_v26 = vpop.permute.xlu2 %2203  ;;  %v2199_v28 = vpop.permute.xlu1 %2198 }
 0x422   : > { %v2124_v7 = vadd.f32 %v2119_v49, %v2090_v29 }
 0x423   : > { %v2027_v5 = vpop.f32.mrf.mxu2 }
 0x424   : > { %v2028_v32 = vadd.f32 %v2027_v5, %v2005_v46  ;;  %v2139_v55 = vadd.f32 %v2132_v51, %v2124_v7  ;;  %v3767_v7 = vld [vmem:[%s5092_s10 + $0x20] sm:$0xff]  ;;  %v3772_v51 = vld [vmem:[%s5093_s11 + $0x28] sm:$0xff] }
 0x425   : > { %v2121_v57 = vpop.f32.mrf.mxu1 }
 0x426   : > { %v2057_v50 = vadd.f32 %v2053_v47, %v2028_v32  ;;  %v2141_v60 = vmax.f32 %v2139_v55, 0.0  ;;  %v3769_v32 = vld [vmem:[%s5079_s13 + $0x20] sm:$0xff]  ;;  %v3770_v47 = vld [vmem:[%s5079_s13 + $0x28] sm:$0xff] }
 0x427   : > { %v3927_v55 = vld [vmem:[%s5095_s3 + $0x60] sm:$0xff] }
 0x428   : > { %v2091_v56 = vadd.f32 %v2087_v53, %v2057_v50  ;;  %v2151_v62 = vmul.f32 %v2141_v60, %v2141_v60  ;;  %v3768_v50 = vld [vmem:[%s5092_s10 + $0x28] sm:$0xff]  ;;  %v3771_v53 = vld [vmem:[%s5093_s11 + $0x20] sm:$0xff] }
 0x42a   : > { %v2125_v58 = vadd.f32 %v2121_v57, %v2091_v56 }
 0x42c   : > { %v2140_v61 = vadd.f32 %v2137_v59, %v2125_v58 }
 0x42e   : > { %v2142_v21 = vmax.f32 %v2140_v61, 0.0 }
 0x430   : > { %v2143_v63 = vadd.f32 %v2142_v21, %v2141_v60  ;;  %v2152_v0 = vmul.f32 %v2142_v21, %v2142_v21 }
 0x432   : > { %v2144_v1 = vrot.slane %v2143_v63, 4  ;;  %v2153_v2 = vadd.f32 %v2152_v0, %v2151_v62 }
 0x434   : > { %v2145_v3 = vadd.f32 %v2144_v1, %v2143_v63  ;;  %v2154_v4 = vrot.slane %v2153_v2, 4 }
 0x436   : > { %v2146_v6 = vrot.slane %v2145_v3, 2  ;;  %v2155_v8 = vadd.f32 %v2154_v4, %v2153_v2 }
 0x438   : > { %v2147_v20 = vadd.f32 %v2146_v6, %v2145_v3  ;;  %v2156_v10 = vrot.slane %v2155_v8, 2 }
 0x43a   : > { %v2148_v12 = vrot.slane %v2147_v20, 1  ;;  %v2157_v30 = vadd.f32 %v2156_v10, %v2155_v8 }
 0x43c   : > { %v2149_v14 = vadd.f32 %v2148_v12, %v2147_v20  ;;  %v2158_v15 = vrot.slane %v2157_v30, 1  ;;  %v3925_v20 = vld [vmem:[%s5095_s3 + $0x50] sm:$0xff] }
 0x43e   : > { %v2150_v33 = vmul.f32 %v2149_v14, %v4550_v42  ;;  %v2159_v16 = vadd.f32 %v2158_v15, %v2157_v30 }
 0x440   : > { %v2160_v34 = vmul.f32 %v2159_v16, %v4550_v42  ;;  %v2161_v17 = vmul.f32 %v2150_v33, %v2150_v33  ;;  %v2166_v41 = vsub.f32 %v2141_v60, %v2150_v33  ;;  %v2167_v43 = vsub.f32 %v2142_v21, %v2150_v33  ;;  %v3926_v21 = vld [vmem:[%s5095_s3 + $0x58] sm:$0xff]  ;;  %v3928_v33 = vld [vmem:[%s5095_s3 + $0x68] sm:$0xff]  ;;  %v3929_v16 = vld [vmem:[%s5095_s3 + $0x70] sm:$0xff] }
 0x442   : > { %v2162_v36 = vsub.f32 %v2160_v34, %v2161_v17 }
 0x444   : > { %v2168_v18 = vadd.f32 1e-05, %v2162_v36 }
 0x446   : > { %4053 = vrsqrt.f32 %v2168_v18  ;;  %vm2175_vm9 = vweird.f32 %v2168_v18 }
 0x44c   : > { %v4054_v13 = vpop.eup %4053 }
 0x44d   : > { %v2170_v37 = vmul.f32 %v4054_v13, %v2168_v18  ;;  %vm2176_vm8 = vweird.f32 %v4054_v13 }
 0x44e   : > { %vm2177_vm10 = vmor %vm2175_vm9, %vm2176_vm8 }
 0x44f   : > { %v2171_v11 = vmul.f32 %v4054_v13, %v2170_v37 }
 0x451   : > { %v2172_v19 = vmul.f32 0.5, %v2171_v11 }
 0x453   : > { %v2173_v39 = vsub.f32 1.5, %v2172_v19 }
 0x455   : > { %v2174_v40 = vmul.f32 %v4054_v13, %v2173_v39 }
 0x457   : > { %v2178_v23 = vsel %vm2177_vm10, %v4054_v13, %v2174_v40 }
 0x458   : > { %v2179_v45 = vmul.f32 %v2178_v23, %v2166_v41  ;;  %v2180_v46 = vmul.f32 %v2178_v23, %v2167_v43 }
 0x45a   : > { %v2191_v48 = vmul.f32 %v2184_v38, %v2179_v45  ;;  %v2192_v25 = vmul.f32 %v2189_v24, %v2180_v46 }
 0x45c   : > { %v2207_v49 = vadd.f32 %v2204_v26, %v2192_v25  ;;  %v2206_v29 = vadd.f32 %v2199_v28, %v2191_v48 }
 0x45e   : > { %2220 = vrot.lane.b32.xlu1 %v2207_v49, %s5098_s5  ;;  %2208 = vrot.lane.b32.xlu2 %v2206_v29, %s5099_s15  ;;  %v2272_v5 = vpack.c.bf16 %v2207_v49, %v2206_v29 }
 0x45f   : > { %2218 = vrot.lane.b32.xlu0 %v2206_v29, %s5098_s5 }
 0x460   : > { %2291 = vmatpush.bf16.msrb.mxu0 %v2272_v5 }
 0x463   : > { %3752 = vmatmul.msk.bf16.vlgmr.msrb.gmra.mxu0 %vm1199_vm0, %v3927_v55 }
 0x466   : > { %2334 = vrot.lane.b32.xlu1 %v2206_v29, %s5101_s17  ;;  %2336 = vrot.lane.b32.xlu2 %v2207_v49, %s5101_s17 }
 0x467   : > { %2210 = vrot.lane.b32.xlu0 %v2207_v49, %s5099_s15 }
 0x46e   : > { %2302 = vrot.lane.b32.xlu1 %v2207_v49, %s5100_s12  ;;  %2373 = vperm.xlu2 %4033, %v3767_v7  }
 0x46f   : > { %2300 = vrot.lane.b32.xlu0 %v2206_v29, %s5100_s12 }
 0x476   : > { %2425 = vperm.xlu1 %4035, %v3769_v32   ;;  %2430 = vperm.xlu2 %4033, %v3770_v47  }
 0x477   : > { %2378 = vperm.xlu0 %4034, %v3768_v50  }
 0x47e   : > { %2445 = vperm.xlu1 %4035, %v3772_v51  }
 0x47f   : > { %2440 = vperm.xlu0 %4034, %v3771_v53  }
 0x4b8   : > { %v2209_v56 = vpop.permute.xlu2 %2208 }
 0x4b9   : > { %v2212_v3 = vmul.f32 %v4643_v35, %v2209_v56 }
 0x4c0   : > { %v2337_v62 = vpop.permute.xlu2 %2336 }
 0x4c1   : > { %v2339_v0 = vmul.f32 %v4654_v22, %v2337_v62 }
 0x4c8   : > { %v2374_v45 = vpop.permute.xlu2 %2373 }
 0x4d0   : > { %v2221_v57 = vpop.permute.xlu1 %2220 }
 0x4d1   : > { %v2223_v58 = vmul.f32 %v4613_v54, %v2221_v57  ;;  %v2219_v59 = vpop.permute.xlu0 %2218 }
 0x4d2   : > { %v2222_v60 = vmul.f32 %v4613_v54, %v2219_v59 }
 0x4d4   : > { %v2224_v61 = vpack.c.bf16 %v2223_v58, %v2222_v60 }
 0x4d6   : > { %2243 = vmatpush.bf16.msra.mxu2 %v2224_v61 }
 0x4d8   : > { %v2335_v63 = vpop.permute.xlu1 %2334 }
 0x4d9   : > { %v2338_v1 = vmul.f32 %v4654_v22, %v2335_v63  ;;  %3740 = vmatmul.msk.bf16.vlgmr.msra.gmra.mxu2 %vm1199_vm0, %v3926_v21  ;;  %v2211_v2 = vpop.permute.xlu0 %2210 }
 0x4da   : > { %v2213_v4 = vmul.f32 %v4643_v35, %v2211_v2 }
 0x4db   : > { %v2340_v6 = vpack.c.bf16 %v2339_v0, %v2338_v1 }
 0x4dc   : > { %v2214_v8 = vpack.c.bf16 %v2213_v4, %v2212_v3 }
 0x4dd   : > { %2359 = vmatpush.bf16.msrb.mxu2 %v2340_v6 }
 0x4de   : > { %2265 = vmatpush.bf16.msra.mxu3 %v2214_v8 }
 0x4e0   : > { %v2303_v10 = vpop.permute.xlu1 %2302  ;;  %v2293_v17 = vpop.f32.mrf.mxu0 }
 0x4e1   : > { %v2305_v12 = vmul.f32 %v4631_v9, %v2303_v10  ;;  %3745 = vmatmul.msk.bf16.vlgmr.msra.gmra.mxu3 %vm1199_vm0, %v3925_v20  ;;  %v2301_v30 = vpop.permute.xlu0 %2300 }
 0x4e2   : > { %v2304_v14 = vmul.f32 %v4631_v9, %v2301_v30 }
 0x4e4   : > { %v2306_v15 = vpack.c.bf16 %v2305_v12, %v2304_v14 }
 0x4e6   : > { %2325 = vmatpush.bf16.msra.mxu1 %v2306_v15 }
 0x4e8   : > { %v2295_v41 = vpop.f32.mrf.mxu0  ;;  %v2426_v10 = vpop.permute.xlu1 %2425 }
 0x4e9   : > { %3759 = vmatmul.msk.bf16.vlgmr.msra.gmra.mxu1 %vm1199_vm0, %v3928_v33  ;;  %3766 = vmatmul.msk.bf16.vlgmr.msrb.gmra.mxu2 %vm1199_vm0, %v3929_v16  ;;  %v2379_v28 = vpop.permute.xlu0 %2378 }
 0x55c   : > { %v2245_v34 = vpop.f32.mrf.mxu2 }
 0x564   : > { %v2247_v36 = vpop.f32.mrf.mxu2  ;;  %v2267_v18 = vpop.f32.mrf.mxu3 }
 0x565   : > { %v2268_v13 = vadd.f32 %v2267_v18, %v2245_v34 }
 0x566   : > { %v2327_v37 = vpop.f32.mrf.mxu1 }
 0x567   : > { %v2298_v11 = vadd.f32 %v2293_v17, %v2268_v13 }
 0x569   : > { %v2332_v39 = vadd.f32 %v2327_v37, %v2298_v11  ;;  %v2446_v37 = vpop.permute.xlu1 %2445  ;;  %v2441_v11 = vpop.permute.xlu0 %2440 }
 0x56c   : > { %v2269_v38 = vpop.f32.mrf.mxu3  ;;  %v2361_v19 = vpop.f32.mrf.mxu2 }
 0x56d   : > { %v2270_v40 = vadd.f32 %v2269_v38, %v2247_v36  ;;  %v2366_v43 = vadd.f32 %v2361_v19, %v2332_v39  ;;  %v2431_v36 = vpop.permute.xlu2 %2430 }
 0x56e   : > { %v2329_v46 = vpop.f32.mrf.mxu1 }
 0x56f   : > { %v2299_v23 = vadd.f32 %v2295_v41, %v2270_v40  ;;  %v2381_v24 = vadd.f32 %v2374_v45, %v2366_v43  ;;  %v3808_v40 = vld [vmem:[%s5092_s10 + $0x30] sm:$0xff]  ;;  %v3811_v43 = vld [vmem:[%s5079_s13 + $0x38] sm:$0xff] }
 0x570   : > { %v3810_v41 = vld [vmem:[%s5079_s13 + $0x30] sm:$0xff]  ;;  %v3813_v45 = vld [vmem:[%s5093_s11 + $0x38] sm:$0xff] }
 0x571   : > { %v2333_v48 = vadd.f32 %v2329_v46, %v2299_v23  ;;  %v2383_v49 = vmax.f32 %v2381_v24, 0.0  ;;  %v3809_v23 = vld [vmem:[%s5092_s10 + $0x38] sm:$0xff]  ;;  %v3812_v46 = vld [vmem:[%s5093_s11 + $0x30] sm:$0xff]  ;;  %v3932_v24 = vld [vmem:[%s5095_s3 + $0x88] sm:$0xff] }
 0x573   : > { %v2393_v7 = vmul.f32 %v2383_v49, %v2383_v49 }
 0x574   : > { %v2363_v25 = vpop.f32.mrf.mxu2 }
 0x575   : > { %v2367_v26 = vadd.f32 %v2363_v25, %v2333_v48 }
 0x577   : > { %v2382_v29 = vadd.f32 %v2379_v28, %v2367_v26 }
 0x579   : > { %v2384_v5 = vmax.f32 %v2382_v29, 0.0 }
 0x57b   : > { %v2385_v32 = vadd.f32 %v2384_v5, %v2383_v49  ;;  %v2394_v47 = vmul.f32 %v2384_v5, %v2384_v5 }
 0x57d   : > { %v2386_v50 = vrot.slane %v2385_v32, 4  ;;  %v2395_v51 = vadd.f32 %v2394_v47, %v2393_v7 }
 0x57f   : > { %v2387_v53 = vadd.f32 %v2386_v50, %v2385_v32  ;;  %v2396_v55 = vrot.slane %v2395_v51, 4  ;;  %v3931_v50 = vld [vmem:[%s5095_s3 + $0x80] sm:$0xff] }
 0x581   : > { %v2388_v56 = vrot.slane %v2387_v53, 2  ;;  %v2397_v57 = vadd.f32 %v2396_v55, %v2395_v51  ;;  %v3933_v51 = vld [vmem:[%s5095_s3 + $0x90] sm:$0xff] }
 0x583   : > { %v2389_v58 = vadd.f32 %v2388_v56, %v2387_v53  ;;  %v2398_v59 = vrot.slane %v2397_v57, 2 }
 0x585   : > { %v2390_v60 = vrot.slane %v2389_v58, 1  ;;  %v2399_v61 = vadd.f32 %v2398_v59, %v2397_v57 }
 0x587   : > { %v2391_v21 = vadd.f32 %v2390_v60, %v2389_v58  ;;  %v2400_v62 = vrot.slane %v2399_v61, 1  ;;  %v3930_v58 = vld [vmem:[%s5095_s3 + $0x78] sm:$0xff] }
 0x589   : > { %v2392_v63 = vmul.f32 %v2391_v21, %v4550_v42  ;;  %v2401_v0 = vadd.f32 %v2400_v62, %v2399_v61  ;;  %v3934_v62 = vld [vmem:[%s5095_s3 + $0x98] sm:$0xff] }
 0x58b   : > { %v2402_v1 = vmul.f32 %v2401_v0, %v4550_v42  ;;  %v2403_v2 = vmul.f32 %v2392_v63, %v2392_v63  ;;  %v2408_v15 = vsub.f32 %v2383_v49, %v2392_v63  ;;  %v2409_v33 = vsub.f32 %v2384_v5, %v2392_v63 }
 0x58d   : > { %v2404_v3 = vsub.f32 %v2402_v1, %v2403_v2 }
 0x58f   : > { %v2410_v4 = vadd.f32 1e-05, %v2404_v3 }
 0x591   : > { %4055 = vrsqrt.f32 %v2410_v4  ;;  %vm2417_vm12 = vweird.f32 %v2410_v4 }
 0x597   : > { %v4056_v6 = vpop.eup %4055 }
 0x598   : > { %v2412_v8 = vmul.f32 %v4056_v6, %v2410_v4  ;;  %vm2418_vm11 = vweird.f32 %v4056_v6 }
 0x599   : > { %vm2419_vm13 = vmor %vm2417_vm12, %vm2418_vm11 }
 0x59a   : > { %v2413_v20 = vmul.f32 %v4056_v6, %v2412_v8 }
 0x59c   : > { %v2414_v12 = vmul.f32 0.5, %v2413_v20 }
 0x59e   : > { %v2415_v30 = vsub.f32 1.5, %v2414_v12 }
 0x5a0   : > { %v2416_v14 = vmul.f32 %v4056_v6, %v2415_v30 }
 0x5a2   : > { %v2420_v16 = vsel %vm2419_vm13, %v4056_v6, %v2416_v14 }
 0x5a3   : > { %v2421_v34 = vmul.f32 %v2420_v16, %v2408_v15  ;;  %v2422_v17 = vmul.f32 %v2420_v16, %v2409_v33 }
 0x5a5   : > { %v2433_v18 = vmul.f32 %v2426_v10, %v2421_v34  ;;  %v2434_v13 = vmul.f32 %v2431_v36, %v2422_v17 }
 0x5a7   : > { %v2449_v38 = vadd.f32 %v2446_v37, %v2434_v13  ;;  %v2448_v19 = vadd.f32 %v2441_v11, %v2433_v18 }
 0x5a9   : > { %2462 = vrot.lane.b32.xlu0 %v2449_v38, %s5098_s5  ;;  %2542 = vrot.lane.b32.xlu1 %v2448_v19, %s5100_s12  ;;  %v2514_v39 = vpack.c.bf16 %v2449_v38, %v2448_v19 }
 0x5aa   : > { %2460 = vrot.lane.b32.xlu2 %v2448_v19, %s5098_s5 }
 0x5ab   : > { %2533 = vmatpush.bf16.msrb.mxu1 %v2514_v39 }
 0x5ae   : > { %3793 = vmatmul.msk.bf16.vlgmr.msrb.gmra.mxu1 %vm1199_vm0, %v3932_v24 }
 0x5b1   : > { %2450 = vrot.lane.b32.xlu0 %v2448_v19, %s5099_s15  ;;  %2452 = vrot.lane.b32.xlu1 %v2449_v38, %s5099_s15 }
 0x5b2   : > { %2544 = vrot.lane.b32.xlu2 %v2449_v38, %s5100_s12 }
 0x5b9   : > { %2578 = vrot.lane.b32.xlu0 %v2449_v38, %s5101_s17  ;;  %2615 = vperm.xlu1 %4035, %v3808_v40  }
 0x5ba   : > { %2576 = vrot.lane.b32.xlu2 %v2448_v19, %s5101_s17 }
 0x5c1   : > { %2667 = vperm.xlu0 %4034, %v3810_v41   ;;  %2672 = vperm.xlu1 %4035, %v3811_v43  }
 0x5c2   : > { %2620 = vperm.xlu2 %4033, %v3809_v23  }
 0x5c9   : > { %2687 = vperm.xlu0 %4034, %v3813_v45  }
 0x5ca   : > { %2682 = vperm.xlu2 %4033, %v3812_v46  }
 0x604   : > { %v2461_v48 = vpop.permute.xlu2 %2460 }
 0x605   : > { %v2464_v49 = vmul.f32 %v4613_v54, %v2461_v48 }
 0x60c   : > { %v2545_v25 = vpop.permute.xlu2 %2544 }
 0x60d   : > { %v2547_v29 = vmul.f32 %v4631_v9, %v2545_v25 }
 0x61b   : > { %v2463_v26 = vpop.permute.xlu0 %2462  ;;  %v2543_v28 = vpop.permute.xlu1 %2542 }
 0x61c   : > { %v2465_v5 = vmul.f32 %v4613_v54, %v2463_v26  ;;  %v2546_v7 = vmul.f32 %v4631_v9, %v2543_v28  ;;  %v2577_v9 = vpop.permute.xlu2 %2576 }
 0x61d   : > { %v2580_v60 = vmul.f32 %v4654_v22, %v2577_v9 }
 0x61e   : > { %v2466_v32 = vpack.c.bf16 %v2465_v5, %v2464_v49  ;;  %v2548_v47 = vpack.c.bf16 %v2547_v29, %v2546_v7 }
 0x620   : > { %2485 = vmatpush.bf16.msrb.mxu3 %v2466_v32  ;;  %2567 = vmatpush.bf16.msra.mxu2 %v2548_v47 }
 0x623   : > { %v2451_v53 = vpop.permute.xlu0 %2450  ;;  %v2453_v55 = vpop.permute.xlu1 %2452  ;;  %3781 = vmatmul.msk.bf16.vlgmr.msrb.gmra.mxu3 %vm1199_vm0, %v3931_v50  ;;  %3800 = vmatmul.msk.bf16.vlgmr.msra.gmra.mxu2 %vm1199_vm0, %v3933_v51 }
 0x624   : > { %v2454_v56 = vmul.f32 %v4643_v35, %v2451_v53  ;;  %v2455_v57 = vmul.f32 %v4643_v35, %v2453_v55  ;;  %v2621_v36 = vpop.permute.xlu2 %2620 }
 0x626   : > { %v2456_v54 = vpack.c.bf16 %v2455_v57, %v2454_v56 }
 0x628   : > { %2507 = vmatpush.bf16.msra.mxu0 %v2456_v54 }
 0x62b   : > { %v2579_v59 = vpop.permute.xlu0 %2578  ;;  %3786 = vmatmul.msk.bf16.vlgmr.msra.gmra.mxu0 %vm1199_vm0, %v3930_v58  ;;  %v2535_v1 = vpop.f32.mrf.mxu1 }
 0x62c   : > { %v2581_v61 = vmul.f32 %v4654_v22, %v2579_v59  ;;  %v2616_v15 = vpop.permute.xlu1 %2615 }
 0x62e   : > { %v2582_v21 = vpack.c.bf16 %v2581_v61, %v2580_v60 }
 0x630   : > { %2601 = vmatpush.bf16.msra.mxu3 %v2582_v21 }
 0x633   : > { %3807 = vmatmul.msk.bf16.vlgmr.msra.gmra.mxu3 %vm1199_vm0, %v3934_v62  ;;  %v2537_v20 = vpop.f32.mrf.mxu1  ;;  %v2668_v55 = vpop.permute.xlu0 %2667 }
 0x634   : > { %v2673_v21 = vpop.permute.xlu1 %2672 }
 0x6a6   : > { %v2487_v63 = vpop.f32.mrf.mxu3  ;;  %v2569_v3 = vpop.f32.mrf.mxu2 }
 0x6a8   : > { %v2509_v0 = vpop.f32.mrf.mxu0 }
 0x6a9   : > { %v2510_v2 = vadd.f32 %v2509_v0, %v2487_v63  ;;  %v2683_v0 = vpop.permute.xlu2 %2682 }
 0x6ab   : > { %v2540_v6 = vadd.f32 %v2535_v1, %v2510_v2  ;;  %v2688_v1 = vpop.permute.xlu0 %2687 }
 0x6ad   : > { %v2574_v12 = vadd.f32 %v2569_v3, %v2540_v6  ;;  %v3100_v6 = vld [vmem:[%s5103_s21] sm:$0xff] }
 0x6ae   : > { %v2489_v35 = vpop.f32.mrf.mxu3  ;;  %v2571_v22 = vpop.f32.mrf.mxu2 }
 0x6b0   : > { %v2511_v4 = vpop.f32.mrf.mxu0 }
 0x6b1   : > { %v2512_v8 = vadd.f32 %v2511_v4, %v2489_v35  ;;  %v3064_v4 = vld [vmem:[%s5102_s19] sm:$0xff] }
 0x6b3   : > { %v2541_v30 = vadd.f32 %v2537_v20, %v2512_v8  ;;  %v3101_v8 = vld [vmem:[%s5103_s21 + $0x8] sm:$0xff] }
 0x6b4   : > { %v3065_v20 = vld [vmem:[%s5102_s19 + $0x8] sm:$0xff] }
 0x6b5   : > { %v2575_v33 = vadd.f32 %v2571_v22, %v2541_v30  ;;  %v3937_v30 = vld [vmem:[%s5095_s3 + $0xb0] sm:$0xff] }
 0x6b6   : > { %v2603_v10 = vpop.f32.mrf.mxu3 }
 0x6b7   : > { %v2608_v14 = vadd.f32 %v2603_v10, %v2574_v12  ;;  %v3130_v10 = vld [vmem:[%s5104_s24 + $0x8] sm:$0xff]  ;;  %v3129_v12 = vld [vmem:[%s5104_s24] sm:$0xff] }
 0x6b9   : > { %v2623_v16 = vadd.f32 %v2616_v15, %v2608_v14 }
 0x6bb   : > { %v2625_v18 = vmax.f32 %v2623_v16, 0.0  ;;  %v4067_v16 = vld [vmem:[%s5094_s22 + $0x3] ss:$0 sm:$0xff] }
 0x6bd   : > { %v2635_v11 = vmul.f32 %v2625_v18, %v2625_v18 }
 0x6be   : > { %v2605_v34 = vpop.f32.mrf.mxu3 }
 0x6bf   : > { %v2609_v17 = vadd.f32 %v2605_v34, %v2575_v33 }
 0x6c1   : > { %v2624_v13 = vadd.f32 %v2621_v36, %v2609_v17 }
 0x6c3   : > { %v2626_v37 = vmax.f32 %v2624_v13, 0.0  ;;  %v3938_v13 = vld [vmem:[%s5095_s3 + $0xb8] sm:$0xff] }
 0x6c5   : > { %v2627_v38 = vadd.f32 %v2626_v37, %v2625_v18  ;;  %v2636_v19 = vmul.f32 %v2626_v37, %v2626_v37 }
 0x6c7   : > { %v2628_v39 = vrot.slane %v2627_v38, 4  ;;  %v2637_v40 = vadd.f32 %v2636_v19, %v2635_v11 }
 0x6c9   : > { %v2629_v41 = vadd.f32 %v2628_v39, %v2627_v38  ;;  %v2638_v43 = vrot.slane %v2637_v40, 4 }
 0x6cb   : > { %v2630_v23 = vrot.slane %v2629_v41, 2  ;;  %v2639_v45 = vadd.f32 %v2638_v43, %v2637_v40  ;;  %v4068_v40 = vld [vmem:[%s5094_s22] ss:$0 sm:$0xff] }
 0x6cd   : > { %v2631_v46 = vadd.f32 %v2630_v23, %v2629_v41  ;;  %v2640_v24 = vrot.slane %v2639_v45, 2 }
 0x6cf   : > { %v2632_v48 = vrot.slane %v2631_v46, 1  ;;  %v2641_v25 = vadd.f32 %v2640_v24, %v2639_v45  ;;  %v2977_v24 = vpack.c.bf16 %v4681_v44, %v4675_v31 }
 0x6d1   : > { %v2633_v26 = vadd.f32 %v2632_v48, %v2631_v46  ;;  %v2642_v28 = vrot.slane %v2641_v25, 1  ;;  %v3940_v46 = vld [vmem:[%s5106_s29] sm:$0xff] }
 0x6d2   : > { %v3935_v48 = vld [vmem:[%s5095_s3 + $0xa0] sm:$0xff] }
 0x6d3   : > { %v2634_v49 = vmul.f32 %v2633_v26, %v4550_v42  ;;  %v2643_v29 = vadd.f32 %v2642_v28, %v2641_v25 }
 0x6d5   : > { %v2644_v5 = vmul.f32 %v2643_v29, %v4550_v42  ;;  %v2645_v7 = vmul.f32 %v2634_v49, %v2634_v49  ;;  %v2650_v58 = vsub.f32 %v2625_v18, %v2634_v49  ;;  %v2651_v9 = vsub.f32 %v2626_v37, %v2634_v49 }
 0x6d7   : > { %v2646_v32 = vsub.f32 %v2644_v5, %v2645_v7  ;;  %v3942_v5 = vld [vmem:[%s5106_s29 + $0x10] sm:$0xff] }
 0x6d9   : > { %v2652_v47 = vadd.f32 1e-05, %v2646_v32 }
 0x6db   : > { %4057 = vrsqrt.f32 %v2652_v47  ;;  %vm2659_vm15 = vweird.f32 %v2652_v47 }
 0x6e1   : > { %v4058_v50 = vpop.eup %4057 }
 0x6e2   : > { %v2654_v51 = vmul.f32 %v4058_v50, %v2652_v47  ;;  %vm2660_vm14 = vweird.f32 %v4058_v50 }
 0x6e3   : > { %vm2661_vm1 = vmor %vm2659_vm15, %vm2660_vm14 }
 0x6e4   : > { %v2655_v53 = vmul.f32 %v4058_v50, %v2654_v51 }
 0x6e6   : > { %v2656_v56 = vmul.f32 0.5, %v2655_v53 }
 0x6e8   : > { %v2657_v57 = vsub.f32 1.5, %v2656_v56 }
 0x6ea   : > { %v2658_v54 = vmul.f32 %v4058_v50, %v2657_v57  ;;  %v4069_v57 = vld [vmem:[%s5094_s22 + $0x4] ss:$0 sm:$0xff] }
 0x6ec   : > { %v2662_v59 = vsel %vm2661_vm1, %v4058_v50, %v2658_v54  ;;  %v3941_v50 = vld [vmem:[%s5106_s29 + $0x8] sm:$0xff] }
 0x6ed   : > { %v2663_v60 = vmul.f32 %v2662_v59, %v2650_v58  ;;  %v2664_v61 = vmul.f32 %v2662_v59, %v2651_v9  ;;  %v4070_v59 = vld [vmem:[%s5094_s22 + $0x1] ss:$0 sm:$0xff] }
 0x6ef   : > { %v2675_v62 = vmul.f32 %v2668_v55, %v2663_v60  ;;  %v2676_v63 = vmul.f32 %v2673_v21, %v2664_v61 }
 0x6f1   : > { %v2691_v35 = vadd.f32 %v2688_v1, %v2676_v63  ;;  %v2690_v2 = vadd.f32 %v2683_v0, %v2675_v62  ;;  %v3936_v63 = vld [vmem:[%s5095_s3 + $0xa8] sm:$0xff]  ;;  %v3939_v0 = vld [vmem:[%s5095_s3 + $0xc0] sm:$0xff]  ;;  %s5110_s3 = sld [smem:[#allocation12_spill]] }
 0x6f3   : > { %2786 = vrot.lane.b32.xlu2 %v2691_v35, %s5100_s12  ;;  %2692 = vrot.lane.b32.xlu0 %v2690_v2, %s5099_s15  ;;  %v2756_v3 = vpack.c.bf16 %v2691_v35, %v2690_v2 }
 0x6f4   : > { %2784 = vrot.lane.b32.xlu1 %v2690_v2, %s5100_s12 }
 0x6f5   : > { %2775 = vmatpush.bf16.msrb.mxu2 %v2756_v3 }
 0x6f8   : > { %3834 = vmatmul.msk.bf16.vlgmr.msrb.gmra.mxu2 %vm1199_vm0, %v3937_v30 }
 0x6fb   : > { %2964 = vrot.lane.b32.xlu2 %v4675_v31, %s5098_s5  ;;  %2966 = vrot.lane.b32.xlu0 %v4681_v44, %s5098_s5 }
 0x6fc   : > { %2694 = vrot.lane.b32.xlu1 %v2691_v35, %s5099_s15  ;;  %s5105_s15 = sld [smem:[#allocation20_spill]] }
 0x702   : > { %v4817_v18 = vld [vmem:[%s5105_s15] ss:$0 sm:$0xff]  ;;  %v4829_v25 = vld [vmem:[%s5105_s15 + $0x2] ss:$0 sm:$0xff] }
 0x703   : > { %3027 = vrot.lane.b32.xlu2 %v4681_v44, %s5100_s12  ;;  %3068 = vperm.xlu0 %4034, %v3064_v4  }
 0x704   : > { %3025 = vrot.lane.b32.xlu1 %v4675_v31, %s5100_s12 }
 0x70b   : > { %3119 = vperm.xlu2 %4033, %v3100_v6   ;;  %3124 = vperm.xlu0 %4034, %v3101_v8  }
 0x70c   : > { %3073 = vperm.xlu1 %4035, %v3065_v20  }
 0x713   : > { %3138 = vperm.xlu2 %4033, %v3130_v10   ;;  %2702 = vrot.lane.b32.xlu0 %v2690_v2, %s5098_s5 }
 0x714   : > { %3133 = vperm.xlu1 %4035, %v3129_v12  }
 0x71b   : > { %2818 = vrot.lane.b32.xlu2 %v2690_v2, %s5101_s17  ;;  %2820 = vrot.lane.b32.xlu0 %v2691_v35, %s5101_s17  ;;  %s5107_s17 = sld [smem:[#allocation27_spill]] }
 0x71c   : > { %2704 = vrot.lane.b32.xlu1 %v2691_v35, %s5098_s5 }
 0x74d   : > { %v2787_v14 = vpop.permute.xlu2 %2786 }
 0x74e   : > { %v2789_v34 = vmul.f32 %v4067_v16, %v2787_v14 }
 0x755   : > { %v2965_v22 = vpop.permute.xlu2 %2964 }
 0x756   : > { %v2972_v38 = vmul.f32 %v4817_v18, %v2965_v22 }
 0x75d   : > { %v3028_v37 = vpop.permute.xlu2 %3027 }
 0x75e   : > { %v3035_v49 = vmul.f32 %v4829_v25, %v3028_v37 }
 0x765   : > { %v2693_v15 = vpop.permute.xlu0 %2692  ;;  %v4834_v29 = vpop.permute.xlu2 %3119 }
 0x766   : > { %v2785_v33 = vpop.permute.xlu1 %2784  ;;  %v2696_v41 = vmul.f32 %v4068_v40, %v2693_v15 }
 0x767   : > { %v2788_v17 = vmul.f32 %v4067_v16, %v2785_v33 }
 0x769   : > { %v2790_v36 = vpack.c.bf16 %v2789_v34, %v2788_v17 }
 0x76b   : > { %2809 = vmatpush.bf16.msrb.mxu3 %v2790_v36 }
 0x76d   : > { %v2967_v11 = vpop.permute.xlu0 %2966  ;;  %v4841_v47 = vpop.permute.xlu2 %3138 }
 0x76e   : > { %v2973_v19 = vmul.f32 %v4817_v18, %v2967_v11  ;;  %3841 = vmatmul.msk.bf16.vlgmr.msrb.gmra.mxu3 %vm1199_vm0, %v3938_v13  ;;  %v2695_v39 = vpop.permute.xlu1 %2694 }
 0x76f   : > { %v2697_v43 = vmul.f32 %v4068_v40, %v2695_v39 }
 0x770   : > { %v2974_v23 = vpack.c.bf16 %v2973_v19, %v2972_v38 }
 0x771   : > { %v2698_v45 = vpack.c.bf16 %v2697_v43, %v2696_v41 }
 0x772   : > { %3018 = vmatpush.bf16.msra.mxu2 %v2974_v23 }
 0x773   : > { %2749 = vmatpush.bf16.msra.mxu1 %v2698_v45 }
 0x775   : > { %v3069_v26 = vpop.permute.xlu0 %3068  ;;  %3866 = vmatmul.msk.bf16.vlgmr.msra.gmra.mxu2 %vm1199_vm0, %v3940_v46  ;;  %v2819_v55 = vpop.permute.xlu2 %2818 }
 0x776   : > { %3827 = vmatmul.msk.bf16.vlgmr.msra.gmra.mxu1 %vm1199_vm0, %v3935_v48  ;;  %v3026_v28 = vpop.permute.xlu1 %3025  ;;  %v2822_v54 = vmul.f32 %v4069_v57, %v2819_v55 }
 0x777   : > { %2996 = vmatpush.bf16.msrb.mxu1 %v2977_v24  ;;  %v3034_v31 = vmul.f32 %v4829_v25, %v3026_v28 }
 0x779   : > { %v3036_v44 = vpack.c.bf16 %v3035_v49, %v3034_v31 }
 0x77b   : > { %3055 = vmatpush.bf16.msra.mxu3 %v3036_v44  ;;  %v2777_v1 = vpop.f32.mrf.mxu2 }
 0x77d   : > { %v4838_v7 = vpop.permute.xlu0 %3124 }
 0x77e   : > { %3874 = vmatmul.msk.bf16.vlgmr.msra.gmra.mxu3 %vm1199_vm0, %v3942_v5  ;;  %v3074_v32 = vpop.permute.xlu1 %3073 }
 0x783   : > { %v2779_v3 = vpop.f32.mrf.mxu2 }
 0x785   : > { %v2703_v51 = vpop.permute.xlu0 %2702 }
 0x786   : > { %3861 = vmatmul.msk.bf16.vlgmr.msrb.gmra.mxu1 %vm1199_vm0, %v3941_v50  ;;  %v4845_v53 = vpop.permute.xlu1 %3133  ;;  %v2706_v60 = vmul.f32 %v4070_v59, %v2703_v51 }
 0x78d   : > { %v2821_v56 = vpop.permute.xlu0 %2820 }
 0x78e   : > { %v2823_v58 = vmul.f32 %v4069_v57, %v2821_v56  ;;  %v2705_v9 = vpop.permute.xlu1 %2704 }
 0x78f   : > { %v2707_v61 = vmul.f32 %v4070_v59, %v2705_v9 }
 0x790   : > { %v2824_v21 = vpack.c.bf16 %v2823_v58, %v2822_v54 }
 0x791   : > { %v2708_v62 = vpack.c.bf16 %v2707_v61, %v2706_v60 }
 0x793   : > { %2727 = vmatpush.bf16.msrb.mxu0 %v2708_v62 }
 0x796   : > { %3822 = vmatmul.msk.bf16.vlgmr.msrb.gmra.mxu0 %vm1199_vm0, %v3936_v63 }
 0x797   : > { %2843 = vmatpush.bf16.msra.mxu0 %v2824_v21 }
 0x7a6   : > { %3848 = vmatmul.msk.bf16.vlgmr.msra.gmra.mxu0 %vm1199_vm0, %v3939_v0 }
 0x7f1   : > { %v2811_v35 = vpop.f32.mrf.mxu3 }
 0x7f3   : > { %v2751_v2 = vpop.f32.mrf.mxu1 }
 0x7f8   : > { %v3020_v8 = vpop.f32.mrf.mxu2 }
 0x7f9   : > { %v2813_v4 = vpop.f32.mrf.mxu3 }
 0x7fb   : > { %v2753_v6 = vpop.f32.mrf.mxu1 }
 0x800   : > { %v3022_v14 = vpop.f32.mrf.mxu2 }
 0x801   : > { %v3057_v20 = vpop.f32.mrf.mxu3 }
 0x803   : > { %v2998_v10 = vpop.f32.mrf.mxu1 }
 0x804   : > { %v3021_v12 = vadd.f32 %v3020_v8, %v2998_v10 }
 0x806   : > { %v3062_v30 = vadd.f32 %v3057_v20, %v3021_v12 }
 0x808   : > { %v3076_v15 = vadd.f32 %v3069_v26, %v3062_v30  ;;  %v3649_v30 = vld [vmem:[%s5078_s20 + $0x10] sm:$0xff] }
 0x809   : > { %v3059_v16 = vpop.f32.mrf.mxu3 }
 0x80a   : > { %v3078_v17 = vmax.f32 %v3076_v15, 0.0  ;;  %v3654_v15 = vld [vmem:[%s5080_s4 + $0x18] sm:$0xff] }
 0x80b   : > { %v3000_v22 = vpop.f32.mrf.mxu1 }
 0x80c   : > { %v3023_v33 = vadd.f32 %v3022_v14, %v3000_v22  ;;  %v3088_v11 = vmul.f32 %v3078_v17, %v3078_v17  ;;  %v1538_v14 = vld [vmem:[%s5107_s17] sm:$0xff]  ;;  %v1539_v22 = vld [vmem:[%s5107_s17 + $0x8] sm:$0xff]  ;;  %s3354_s17 = scalar_lea.sflag [#allocation6], %s4678_s26 }
 0x80e   : > { %v3063_v34 = vadd.f32 %v3059_v16, %v3023_v33  ;;  %v3896_v33 = vld [vmem:[%s5102_s19 + $0x10] sm:$0xff]  ;;  %v3897_v16 = vld [vmem:[%s5102_s19 + $0x18] sm:$0xff] }
 0x810   : > { %v3077_v36 = vadd.f32 %v3074_v32, %v3063_v34  ;;  %v1559_v34 = vld [vmem:[#allocation2] sm:$0x1] }
 0x812   : > { %v3079_v13 = vmax.f32 %v3077_v36, 0.0  ;;  %v3851_v36 = vld [vmem:[%s5079_s13 + $0x40] sm:$0xff] }
 0x813   : > { %v2729_v37 = vpop.f32.mrf.mxu0 }
 0x814   : > { %v3080_v38 = vadd.f32 %v3079_v13, %v3078_v17  ;;  %v3089_v19 = vmul.f32 %v3079_v13, %v3079_v13  ;;  %v2752_v39 = vadd.f32 %v2751_v2, %v2729_v37  ;;  %v3853_v37 = vld [vmem:[%s5093_s11 + $0x40] sm:$0xff] }
 0x816   : > { %v3081_v40 = vrot.slane %v3080_v38, 4  ;;  %v3090_v41 = vadd.f32 %v3089_v19, %v3088_v11  ;;  %v2782_v43 = vadd.f32 %v2777_v1, %v2752_v39  ;;  %v3898_v11 = vld [vmem:[%s5103_s21 + $0x10] sm:$0xff]  ;;  %v3901_v39 = vld [vmem:[%s5104_s24 + $0x18] sm:$0xff] }
 0x817   : > { %v3900_v19 = vld [vmem:[%s5104_s24 + $0x10] sm:$0xff] }
 0x818   : > { %v3082_v23 = vadd.f32 %v3081_v40, %v3080_v38  ;;  %v3091_v45 = vrot.slane %v3090_v41, 4  ;;  %v4853_v46 = vadd.f32 %v2811_v35, %v2782_v43  ;;  %v3852_v38 = vld [vmem:[%s5079_s13 + $0x48] sm:$0xff]  ;;  %v3899_v40 = vld [vmem:[%s5103_s21 + $0x18] sm:$0xff] }
 0x81a   : > { %v3083_v24 = vrot.slane %v3082_v23, 2  ;;  %v3092_v48 = vadd.f32 %v3091_v45, %v3090_v41 }
 0x81b   : > { %v2731_v26 = vpop.f32.mrf.mxu0 }
 0x81c   : > { %v3084_v28 = vadd.f32 %v3083_v24, %v3082_v23  ;;  %v3093_v49 = vrot.slane %v3092_v48, 2  ;;  %v2754_v31 = vadd.f32 %v2753_v6, %v2731_v26  ;;  %v3854_v23 = vld [vmem:[%s5093_s11 + $0x48] sm:$0xff]  ;;  %v3338_v24 = vld [vmem:[#allocation4] sm:$0x1]  ;;  %v2955_v26 = vld [vmem:[#allocation3] sm:$0x1] }
 0x81e   : > { %v3085_v44 = vrot.slane %v3084_v28, 1  ;;  %v3094_v5 = vadd.f32 %v3093_v49, %v3092_v48  ;;  %v2783_v32 = vadd.f32 %v2779_v3, %v2754_v31 }
 0x820   : > { %v3086_v50 = vadd.f32 %v3085_v44, %v3084_v28  ;;  %v3095_v51 = vrot.slane %v3094_v5, 1  ;;  %v4855_v55 = vadd.f32 %v2813_v4, %v2783_v32  ;;  %v3944_v28 = vld [vmem:[%s5106_s29 + $0x20] sm:$0xff] }
 0x822   : > { %v3087_v56 = vmul.f32 %v3086_v50, %v4550_v42  ;;  %v3096_v57 = vadd.f32 %v3095_v51, %v3094_v5 }
 0x824   : > { %v3098_v54 = vmul.f32 %v3087_v56, %v3087_v56  ;;  %v3097_v58 = vmul.f32 %v3096_v57, %v4550_v42  ;;  %v3103_v1 = vsub.f32 %v3079_v13, %v3087_v56  ;;  %v3102_v35 = vsub.f32 %v3078_v17, %v3087_v56  ;;  %v3850_v17 = vld [vmem:[%s5092_s10 + $0x48] sm:$0xff]  ;;  %v3849_v13 = vld [vmem:[%s5092_s10 + $0x40] sm:$0xff]  ;;  %s3946_s10 = sshll.u32 %s4404_s0, 4 }
 0x826   : > { %v3099_v9 = vsub.f32 %v3097_v58, %v3098_v54  ;;  %v3945_v54 = vld [vmem:[%s5106_s29 + $0x28] sm:$0xff] }
 0x828   : > { %v3104_v59 = vadd.f32 1e-05, %v3099_v9 }
 0x82a   : > { %4059 = vrsqrt.f32 %v3104_v59  ;;  %vm3111_vm3 = vweird.f32 %v3104_v59 }
 0x830   : > { %v4060_v60 = vpop.eup %4059 }
 0x831   : > { %v3106_v61 = vmul.f32 %v4060_v60, %v3104_v59  ;;  %vm3112_vm2 = vweird.f32 %v4060_v60 }
 0x832   : > { %vm3113_vm4 = vmor %vm3111_vm3, %vm3112_vm2 }
 0x833   : > { %v3107_v21 = vmul.f32 %v4060_v60, %v3106_v61 }
 0x835   : > { %v3108_v62 = vmul.f32 0.5, %v3107_v21 }
 0x837   : > { %v3109_v63 = vsub.f32 1.5, %v3108_v62 }
 0x839   : > { %v3110_v0 = vmul.f32 %v4060_v60, %v3109_v63 }
 0x83b   : > { %v3114_v2 = vsel %vm3113_vm4, %v4060_v60, %v3110_v0 }
 0x83c   : > { %v3116_v3 = vmul.f32 %v3114_v2, %v3103_v1  ;;  %v3115_v4 = vmul.f32 %v3114_v2, %v3102_v35 }
 0x83e   : > { %v3128_v6 = vmul.f32 %v4838_v7, %v3116_v3  ;;  %v3127_v8 = vmul.f32 %v4834_v29, %v3115_v4  ;;  %v3650_v7 = vld [vmem:[%s5078_s20 + $0x18] sm:$0xff] }
 0x83f   : > { %v3652_v29 = vld [vmem:[%s4297_s27 + $0x18] sm:$0xff] }
 0x840   : > { %v3142_v20 = vadd.f32 %v4841_v47, %v3128_v6  ;;  %v3141_v10 = vadd.f32 %v4845_v53, %v3127_v8  ;;  %v3653_v47 = vld [vmem:[%s5080_s4 + $0x10] sm:$0xff]  ;;  %s1135_s4 = scalar_lea.vmem %s5110_s3, %s4434_s25  ;;  %s5111_s3 = sld [smem:[#allocation38_spill]] }
 0x841   : > { %v3651_v53 = vld [vmem:[%s4297_s27 + $0x10] sm:$0xff] }
 0x842   : > { %3203 = vrot.lane.b32.xlu2 %v3142_v20, %s5100_s12  ;;  %3143 = vrot.lane.b32.xlu0 %v3141_v10, %s5098_s5  ;;  %v3153_v12 = vpack.c.bf16 %v3142_v20, %v3141_v10 }
 0x843   : > { %3201 = vrot.lane.b32.xlu1 %v3141_v10, %s5100_s12  ;;  %s5108_s12 = sld [smem:[#allocation37_spill]] }
 0x844   : > { %3172 = vmatpush.bf16.msrb.mxu0 %v3153_v12  ;;  %v2845_v12 = vpop.f32.mrf.mxu0 }
 0x846   : > { %s3373_s11 = scalar_lea.hbm %s5111_s3, %s3946_s10 }
 0x847   : > { %3883 = vmatmul.msk.bf16.vlgmr.msrb.gmra.mxu0 %vm1199_vm0, %v3944_v28  ;;  %s3376_s13 = sshll.u32 %s3373_s11, 4  ;;  %s3377_s13 = int_to_ptr.hbm [resolvable:$true] %s3376_s13 }
 0x848   : > { %s4085_s19 = sshra.s32 %s3377_s13, 4  ;;  %s4086_s19 = int_to_ptr.hbm [resolvable:$true] %s4085_s19 }
 0x849   : > { %v3317_v41 = vld [vmem:[%s5108_s12] sm:$0xff]  ;;  %v3318_v43 = vld [vmem:[%s5108_s12 + $0x8] sm:$0xff]  ;;  %s3388_s12 = scalar_lea.hbm %s4370_s23, %s4404_s0  ;;  %s4087_s20 = scalar_lea.hbm %s4086_s19, 16 }
 0x84a   : > { %1461 = vperm.xlu2 %4033, %v3649_v30   ;;  %1466 = vperm.xlu0 %4034, %v3650_v7   ;;  %p4088_p11 = scmp.ne.s32.totalorder %s4086_s19, %s4087_s20  ;;  %p4092_p0 = scmp.lt.s32.totalorder %s4086_s19, %s5111_s3 }
 0x84b   : > { %3145 = vrot.lane.b32.xlu1 %v3142_v20, %s5098_s5  ;;  %s5109_s5 = sld [smem:[#allocation32_spill]] }
 0x84c   : > { %p4089_p12 = pnand %p4088_p11, %p4421_p5 }
 0x84e   : > { %p4090_p13 = pneg %p4089_p12 }
 0x851   : > { %v2935_v45 = vld [vmem:[%s5109_s5 + $0x8] sm:$0xff]  ;;  %v2934_v48 = vld [vmem:[%s5109_s5] sm:$0xff]  ;;  %s1121_s5 = scalar_lea.vmem [#allocation7], %s4678_s26 }
 0x852   : > { %1518 = vperm.xlu2 %4033, %v3652_v29   ;;  %1528 = vperm.xlu0 %4034, %v3653_v47   ;;  %s4962_s15 = sshll.u32 %s1121_s5, 4  ;;  %s3391_s15 = int_to_ptr.vmem [resolvable:$true] %s4962_s15 }
 0x853   : > { %1513 = vperm.xlu1 %4035, %v3651_v53  }
 0x85a   : > { %1542 = vperm.xlu2 %4033, %v1538_v14   ;;  %1547 = vperm.xlu0 %4034, %v1539_v22  }
 0x85b   : > { %1533 = vperm.xlu1 %4035, %v3654_v15  }
 0x862   : > { %3240 = vperm.xlu2 %4033, %v3896_v33   ;;  %3245 = vperm.xlu0 %4034, %v3897_v16  }
 0x863   : > { %1562 = vperm.xlu1 %4035, %v1559_v34  }
 0x86a   : > { %2862 = vperm.xlu2 %4033, %v3850_v17   ;;  %2909 = vperm.xlu0 %4034, %v3851_v36  }
 0x86b   : > { %2857 = vperm.xlu1 %4035, %v3849_v13   ;;  %v2847_v13 = vpop.f32.mrf.mxu0 }
 0x872   : > { %2924 = vperm.xlu2 %4033, %v3853_v37   ;;  %3292 = vperm.xlu0 %4034, %v3898_v11  }
 0x873   : > { %2914 = vperm.xlu1 %4035, %v3852_v38  }
 0x87a   : > { %3307 = vperm.xlu2 %4033, %v3900_v19   ;;  %3312 = vperm.xlu0 %4034, %v3901_v39   ;;  %v2851_v19 = vadd.f32 %v2847_v13, %v4855_v55 }
 0x87b   : > { %3297 = vperm.xlu1 %4035, %v3899_v40   ;;  %v2850_v40 = vadd.f32 %v2845_v12, %v4853_v46 }
 0x882   : > { %3321 = vperm.xlu2 %4033, %v3317_v41   ;;  %3326 = vperm.xlu0 %4034, %v3318_v43  }
 0x883   : > { %2929 = vperm.xlu1 %4035, %v3854_v23  }
 0x88a   : > { %2943 = vperm.xlu2 %4033, %v2935_v45   ;;  %3341 = vperm.xlu0 %4034, %v3338_v24  }
 0x88b   : > { %2938 = vperm.xlu1 %4035, %v2934_v48  }
 0x893   : > { %2958 = vperm.xlu1 %4035, %v2955_v26  }
 0x89c   : > { %v3204_v49 = vpop.permute.xlu2 %3203 }
 0x89d   : > { %v3206_v32 = vmul.f32 %v4829_v25, %v3204_v49 }
 0x8a4   : > { %v1462_v31 = vpop.permute.xlu2 %1461 }
 0x8a5   : > { %v1469_v56 = vadd.f32 %v1462_v31, %v4671_v27 }
 0x8a7   : > { %v4899_v9 = vmax.f32 %v1469_v56, 0.0 }
 0x8a9   : > { %v1481_v62 = vmul.f32 %v4899_v9, %v4899_v9 }
 0x8ac   : > { %v4896_v57 = vpop.permute.xlu2 %1518 }
 0x8b4   : > { %v3144_v44 = vpop.permute.xlu0 %3143  ;;  %v4914_v1 = vpop.permute.xlu2 %1542 }
 0x8b5   : > { %v3202_v5 = vpop.permute.xlu1 %3201  ;;  %v3147_v61 = vmul.f32 %v4817_v18, %v3144_v44 }
 0x8b6   : > { %v3205_v50 = vmul.f32 %v4829_v25, %v3202_v5 }
 0x8b8   : > { %v3207_v51 = vpack.c.bf16 %v3206_v32, %v3205_v50 }
 0x8ba   : > { %3226 = vmatpush.bf16.msrb.mxu2 %v3207_v51 }
 0x8bc   : > { %v1467_v58 = vpop.permute.xlu0 %1466  ;;  %v4917_v29 = vpop.permute.xlu2 %3240 }
 0x8bd   : > { %v1470_v59 = vadd.f32 %v1467_v58, %v4673_v52  ;;  %v3146_v60 = vpop.permute.xlu1 %3145  ;;  %3895 = vmatmul.msk.bf16.vlgmr.msrb.gmra.mxu2 %vm1199_vm0, %v3945_v54  ;;  %v3943_v52 = vld [vmem:[%s5106_s29 + $0x18] sm:$0xff] }
 0x8be   : > { %v3148_v25 = vmul.f32 %v4817_v18, %v3146_v60 }
 0x8bf   : > { %v4905_v21 = vmax.f32 %v1470_v59, 0.0 }
 0x8c0   : > { %v3149_v27 = vpack.c.bf16 %v3148_v25, %v3147_v61 }
 0x8c1   : > { %v1473_v63 = vadd.f32 %v4905_v21, %v4899_v9  ;;  %v1482_v0 = vmul.f32 %v4905_v21, %v4905_v21 }
 0x8c2   : > { %3194 = vmatpush.bf16.msra.mxu1 %v3149_v27 }
 0x8c3   : > { %v1474_v35 = vrot.slane %v1473_v63, 4  ;;  %v1483_v2 = vadd.f32 %v1482_v0, %v1481_v62 }
 0x8c4   : > { %v2863_v38 = vpop.permute.xlu2 %2862  ;;  %v1529_v46 = vpop.permute.xlu0 %1528 }
 0x8c5   : > { %v1475_v3 = vadd.f32 %v1474_v35, %v1473_v63  ;;  %v1484_v18 = vrot.slane %v1483_v2, 4  ;;  %3888 = vmatmul.msk.bf16.vlgmr.msra.gmra.mxu1 %vm1199_vm0, %v3943_v52  ;;  %v1514_v4 = vpop.permute.xlu1 %1513  ;;  %v2866_v39 = vadd.f32 %v2863_v38, %v2851_v19  ;;  %v1176_v38 = vld [vmem:[%s1135_s4] sm:$0x1]  ;;  %s3374_s4 = sshll.u32 %s4683_s6, 4  ;;  %s4091_s6 = scalar_lea.hbm %s5111_s3, 32  ;;  %s3375_s4 = int_to_ptr.vmem [resolvable:$true] %s3374_s4 }
 0x8c6   : > { %p4093_p1 = scmp.lt.s32.totalorder %s4091_s6, %s4087_s20 }
 0x8c7   : > { %v1476_v6 = vrot.slane %v1475_v3, 2  ;;  %v1485_v8 = vadd.f32 %v1484_v18, %v1483_v2  ;;  %v4927_v23 = vmax.f32 %v2866_v39, 0.0 }
 0x8c8   : > { %p4094_p2 = por %p4093_p1, %p4092_p0 }
 0x8c9   : > { %v1477_v20 = vadd.f32 %v1476_v6, %v1475_v3  ;;  %v1486_v10 = vrot.slane %v1485_v8, 2  ;;  %v2878_v28 = vmul.f32 %v4927_v23, %v4927_v23 }
 0x8ca   : > { %p4095_p3 = pnand %p4094_p2, %p4090_p13 }
 0x8cb   : > { %v1478_v30 = vrot.slane %v1477_v20, 1  ;;  %v1487_v7 = vadd.f32 %v1486_v10, %v1485_v8 }
 0x8cc   : > { %v1548_v35 = vpop.permute.xlu0 %1547  ;;  %v2925_v10 = vpop.permute.xlu2 %2924 }
 0x8cd   : > { %v1479_v47 = vadd.f32 %v1478_v30, %v1477_v20  ;;  %v1488_v53 = vrot.slane %v1487_v7, 1  ;;  %v1534_v14 = vpop.permute.xlu1 %1533 }
 0x8cf   : > { %v1480_v22 = vmul.f32 %v1479_v47, %v4550_v42  ;;  %v1489_v15 = vadd.f32 %v1488_v53, %v1487_v7 }
 0x8d1   : > { %v1497_v33 = vsub.f32 %v4905_v21, %v1480_v22  ;;  %v1490_v16 = vmul.f32 %v1489_v15, %v4550_v42  ;;  %v1491_v34 = vmul.f32 %v1480_v22, %v1480_v22  ;;  %v1496_v17 = vsub.f32 %v4899_v9, %v1480_v22 }
 0x8d3   : > { %v1492_v36 = vsub.f32 %v1490_v16, %v1491_v34 }
 0x8d4   : > { %v4943_v16 = vpop.permute.xlu2 %3307 }
 0x8d5   : > { %v1498_v37 = vadd.f32 1e-05, %v1492_v36  ;;  %v4923_v11 = vpop.permute.xlu1 %1562 }
 0x8d6   : > { %v1565_v13 = vperm.slane %v4923_v11, 0 }
 0x8d7   : > { %4061 = vrsqrt.f32 %v1498_v37  ;;  %vm1505_vm5 = vweird.f32 %v1498_v37 }
 0x8dd   : > { %v4062_v41 = vpop.eup %4061  ;;  %v2858_v43 = vpop.permute.xlu1 %2857 }
 0x8de   : > { %v1500_v45 = vmul.f32 %v4062_v41, %v1498_v37  ;;  %v2865_v24 = vadd.f32 %v2858_v43, %v2850_v40  ;;  %vm1506_vm0 = vweird.f32 %v4062_v41  ;;  %v4950_v40 = vpop.permute.xlu0 %3245 }
 0x8df   : > { %vm1507_vm6 = vmor %vm1505_vm5, %vm1506_vm0 }
 0x8e0   : > { %v1501_v48 = vmul.f32 %v4062_v41, %v1500_v45  ;;  %v4929_v26 = vmax.f32 %v2865_v24, 0.0  ;;  %v4953_v45 = vpop.permute.xlu2 %3321 }
 0x8e2   : > { %v1502_v49 = vmul.f32 0.5, %v1501_v48  ;;  %v2869_v31 = vadd.f32 %v4927_v23, %v4929_v26  ;;  %v2877_v55 = vmul.f32 %v4929_v26, %v4929_v26 }
 0x8e4   : > { %v1503_v44 = vsub.f32 1.5, %v1502_v49  ;;  %v2870_v5 = vrot.slane %v2869_v31, 4  ;;  %v2879_v32 = vadd.f32 %v2878_v28, %v2877_v55 }
 0x8e6   : > { %v1504_v50 = vmul.f32 %v4062_v41, %v1503_v44  ;;  %v2871_v51 = vadd.f32 %v2870_v5, %v2869_v31  ;;  %v2880_v56 = vrot.slane %v2879_v32, 4  ;;  %v2910_v31 = vpop.permute.xlu0 %2909 }
 0x8e8   : > { %v1508_v54 = vsel %vm1507_vm6, %v4062_v41, %v1504_v50  ;;  %v2872_v58 = vrot.slane %v2871_v51, 2  ;;  %v2881_v9 = vadd.f32 %v2880_v56, %v2879_v32  ;;  %v2944_v32 = vpop.permute.xlu2 %2943 }
 0x8e9   : > { %v1509_v59 = vmul.f32 %v1508_v54, %v1496_v17  ;;  %v1510_v60 = vmul.f32 %v1508_v54, %v1497_v33 }
 0x8ea   : > { %v2873_v61 = vadd.f32 %v2872_v58, %v2871_v51  ;;  %v2882_v25 = vrot.slane %v2881_v9, 2 }
 0x8eb   : > { %v1521_v21 = vmul.f32 %v1514_v4, %v1509_v59  ;;  %v1522_v27 = vmul.f32 %v4896_v57, %v1510_v60  ;;  %v2915_v4 = vpop.permute.xlu1 %2914 }
 0x8ec   : > { %v2874_v62 = vrot.slane %v2873_v61, 1  ;;  %v2883_v63 = vadd.f32 %v2882_v25, %v2881_v9 }
 0x8ed   : > { %v1536_v0 = vadd.f32 %v1529_v46, %v1521_v21  ;;  %v1537_v52 = vadd.f32 %v1534_v14, %v1522_v27 }
 0x8ee   : > { %v2875_v2 = vadd.f32 %v2874_v62, %v2873_v61  ;;  %v2884_v3 = vrot.slane %v2883_v63, 1 }
 0x8ef   : > { %v1550_v18 = vmul.f32 %v4914_v1, %v1536_v0  ;;  %v1551_v6 = vmul.f32 %v1548_v35, %v1537_v52 }
 0x8f0   : > { %v2876_v8 = vmul.f32 %v2875_v2, %v4550_v42  ;;  %v2885_v20 = vadd.f32 %v2884_v3, %v2883_v63 }
 0x8f1   : > { %v1552_v12 = vadd.f32 %v1551_v6, %v1550_v18 }
 0x8f2   : > { %v2892_v57 = vsub.f32 %v4929_v26, %v2876_v8  ;;  %v2886_v30 = vmul.f32 %v2885_v20, %v4550_v42  ;;  %v2887_v7 = vmul.f32 %v2876_v8, %v2876_v8  ;;  %v2893_v47 = vsub.f32 %v4927_v23, %v2876_v8 }
 0x8f3   : > { %v1553_v53 = vrot.slane %v1552_v12, 4  ;;  %v4947_v17 = vpop.permute.xlu1 %3297 }
 0x8f4   : > { %v2888_v14 = vsub.f32 %v2886_v30, %v2887_v7 }
 0x8f5   : > { %v1554_v22 = vadd.f32 %v1553_v53, %v1552_v12 }
 0x8f6   : > { %v2894_v1 = vadd.f32 1e-05, %v2888_v14 }
 0x8f7   : > { %v1555_v15 = vrot.slane %v1554_v22, 2 }
 0x8f8   : > { %4063 = vrsqrt.f32 %v2894_v1  ;;  %vm2901_vm8 = vweird.f32 %v2894_v1 }
 0x8f9   : > { %v1556_v33 = vadd.f32 %v1555_v15, %v1554_v22 }
 0x8fb   : > { %v1557_v34 = vrot.slane %v1556_v33, 1  ;;  %v2930_v48 = vpop.permute.xlu1 %2929 }
 0x8fd   : > { %v1558_v36 = vadd.f32 %v1557_v34, %v1556_v33 }
 0x8fe   : > { %v4064_v37 = vpop.eup %4063 }
 0x8ff   : > { %v1566_v19 = vadd.f32 %v1565_v13, %v1558_v36  ;;  %v2896_v39 = vmul.f32 %v4064_v37, %v2894_v1  ;;  %vm2902_vm7 = vweird.f32 %v4064_v37 }
 0x900   : > { %vm2903_vm9 = vmor %vm2901_vm8, %vm2902_vm7 }
 0x901   : > { %v1567_v41 = vmul.f32 %v1566_v19, %v1176_v38  ;;  %v2897_v43 = vmul.f32 %v4064_v37, %v2896_v39 }
 0x903   : > { %v2898_v23 = vmul.f32 0.5, %v2897_v43  ;;  %1568 = vst [vmem:[%s1121_s5] sm:$0x1] %v1567_v41  ;;  %v2939_v50 = vpop.permute.xlu1 %2938 }
 0x905   : > { %v2899_v24 = vsub.f32 1.5, %v2898_v23 }
 0x907   : > { %v2900_v26 = vmul.f32 %v4064_v37, %v2899_v24 }
 0x909   : > { %v2904_v11 = vsel %vm2903_vm9, %v4064_v37, %v2900_v26 }
 0x90a   : > { %v2905_v28 = vmul.f32 %v2904_v11, %v2892_v57  ;;  %v2906_v49 = vmul.f32 %v2904_v11, %v2893_v47 }
 0x90c   : > { %v2918_v55 = vmul.f32 %v2915_v4, %v2906_v49  ;;  %v2917_v46 = vmul.f32 %v2910_v31, %v2905_v28 }
 0x90e   : > { %v2933_v44 = vadd.f32 %v2930_v48, %v2918_v55  ;;  %v2932_v5 = vadd.f32 %v2925_v10, %v2917_v46 }
 0x910   : > { %v2947_v51 = vmul.f32 %v2944_v32, %v2933_v44  ;;  %v2946_v56 = vmul.f32 %v2939_v50, %v2932_v5 }
 0x912   : > { %v4956_v54 = vadd.f32 %v2947_v51, %v2946_v56 }
 0x913   : > { %4098 = shalt.err (!%p4095_p3)
}
 0x914   : > { %s4207_s10 = smov 128   ;;  %s4208_s0 = smov 8  }
 0x915   : > { %3947 = dma.vmem_to_hbm [thread:$0]  (%p4421_p5), %s3375_s4, 256, %s3377_s13, %s3354_s17, %s4207_s10, %s4207_s10, %s4208_s0  }
 0x916   : > { %s3392_s11 = sshll.u32 %s3388_s12, 4  ;;  %s3359_s5 = scalar_lea.sflag [#allocation8], %s4678_s26  ;;  %s3393_s11 = int_to_ptr.hbm [resolvable:$true] %s3392_s11 }
 0x917   : > { %s4113_s21 = sshra.s32 %s3393_s11, 4  ;;  %s4119_s20 = scalar_lea.hbm %s4370_s23, 2  ;;  %s4114_s21 = int_to_ptr.hbm [resolvable:$true] %s4113_s21 }
 0x918   : > { %s4115_s19 = scalar_lea.hbm %s4114_s21, 1  ;;  %p4120_p9 = scmp.lt.s32.totalorder %s4114_s21, %s4370_s23 }
 0x919   : > { %p4116_p4 = scmp.ne.s32.totalorder %s4114_s21, %s4115_s19  ;;  %p4121_p10 = scmp.lt.s32.totalorder %s4119_s20, %s4115_s19 }
 0x91b   : > { %p4117_p7 = pnand %p4116_p4, %p4421_p5  ;;  %p4122_p11 = por %p4121_p10, %p4120_p9 }
 0x91d   : > { %p4118_p8 = pneg %p4117_p7 }
 0x91f   : > { %p4123_p12 = pnand %p4122_p11, %p4118_p8 }
 0x921   : > { %4126 = shalt.err (!%p4123_p12)
}
 0x922   : > { %3948 = dma.vmem_to_hbm [thread:$0]  (%p4421_p5), %s3391_s15, 16, %s3393_s11, %s3359_s5   ;;  %v3174_v58 = vpop.f32.mrf.mxu0  ;;  %v3293_v13 = vpop.permute.xlu0 %3292  ;;  %v2949_v23 = vrot.slane %v4956_v54, 4  ;;  %vm3350_vm13 = vcmask 1040384  }
 0x923   : > { %s5112_s13 = sld [smem:[#allocation13_spill]]  ;;  %s3607_s28 = sshll.u32 %s4434_s25, 1 }
 0x924   : > { %v2950_v28 = vadd.f32 %v2949_v23, %v4956_v54  ;;  %s1156_s26 = scalar_lea.vmem %s4375_s1, %s3607_s28 }
 0x926   : > { %v2951_v5 = vrot.slane %v2950_v28, 2 }
 0x928   : > { %v2952_v56 = vadd.f32 %v2951_v5, %v2950_v28 }
 0x929   : > { %s1138_s21 = scalar_lea.vmem %s5112_s13, %s4434_s25 }
 0x92a   : > { %v3176_v25 = vpop.f32.mrf.mxu0 }
 0x940   : > { %v3228_v59 = vpop.f32.mrf.mxu2 }
 0x942   : > { %v3196_v9 = vpop.f32.mrf.mxu1 }
 0x943   : > { %v3197_v60 = vadd.f32 %v3196_v9, %v3174_v58 }
 0x945   : > { %v3233_v61 = vadd.f32 %v3228_v59, %v3197_v60  ;;  %v2953_v59 = vrot.slane %v2952_v56, 1 }
 0x947   : > { %v3248_v27 = vadd.f32 %v4917_v29, %v3233_v61  ;;  %v2959_v61 = vpop.permute.xlu1 %2958 }
 0x948   : > { %v3230_v63 = vpop.f32.mrf.mxu2 }
 0x949   : > { %v3250_v52 = vmax.f32 %v3248_v27, 0.0  ;;  %v2961_v27 = vperm.slane %v2959_v61, 0 }
 0x94a   : > { %v3198_v21 = vpop.f32.mrf.mxu1 }
 0x94b   : > { %v3199_v62 = vadd.f32 %v3198_v21, %v3176_v25  ;;  %v3260_v3 = vmul.f32 %v3250_v52, %v3250_v52 }
 0x94d   : > { %v3234_v0 = vadd.f32 %v3230_v63, %v3199_v62 }
 0x94f   : > { %v3249_v35 = vadd.f32 %v4950_v40, %v3234_v0  ;;  %v3313_v40 = vpop.permute.xlu0 %3312  ;;  %v1708_v0 = vld [vmem:[%s1138_s21] sm:$0x1] }
 0x951   : > { %v3251_v2 = vmax.f32 %v3249_v35, 0.0 }
 0x953   : > { %v3252_v18 = vadd.f32 %v3251_v2, %v3250_v52  ;;  %v3261_v6 = vmul.f32 %v3251_v2, %v3251_v2 }
 0x955   : > { %v3253_v8 = vrot.slane %v3252_v18, 4  ;;  %v3262_v20 = vadd.f32 %v3261_v6, %v3260_v3 }
 0x957   : > { %v3254_v10 = vadd.f32 %v3253_v8, %v3252_v18  ;;  %v3263_v12 = vrot.slane %v3262_v20, 4  ;;  %v3327_v44 = vpop.permute.xlu0 %3326 }
 0x959   : > { %v3255_v4 = vrot.slane %v3254_v10, 2  ;;  %v3264_v57 = vadd.f32 %v3263_v12, %v3262_v20 }
 0x95b   : > { %v3256_v30 = vadd.f32 %v3255_v4, %v3254_v10  ;;  %v3265_v7 = vrot.slane %v3264_v57, 2 }
 0x95d   : > { %v3257_v47 = vrot.slane %v3256_v30, 1  ;;  %v3266_v29 = vadd.f32 %v3265_v7, %v3264_v57 }
 0x95f   : > { %v3258_v53 = vadd.f32 %v3257_v47, %v3256_v30  ;;  %v3267_v14 = vrot.slane %v3266_v29, 1 }
 0x961   : > { %v3259_v22 = vmul.f32 %v3258_v53, %v4550_v42  ;;  %v3268_v1 = vadd.f32 %v3267_v14, %v3266_v29 }
 0x963   : > { %v3269_v15 = vmul.f32 %v3268_v1, %v4550_v42  ;;  %v3270_v33 = vmul.f32 %v3259_v22, %v3259_v22  ;;  %v3275_v24 = vsub.f32 %v3250_v52, %v3259_v22  ;;  %v3276_v48 = vsub.f32 %v3251_v2, %v3259_v22 }
 0x965   : > { %v3271_v34 = vsub.f32 %v3269_v15, %v3270_v33 }
 0x967   : > { %v3277_v36 = vadd.f32 1e-05, %v3271_v34 }
 0x969   : > { %4065 = vrsqrt.f32 %v3277_v36  ;;  %vm3284_vm11 = vweird.f32 %v3277_v36 }
 0x96f   : > { %v4066_v37 = vpop.eup %4065 }
 0x970   : > { %v3279_v38 = vmul.f32 %v4066_v37, %v3277_v36  ;;  %vm3285_vm10 = vweird.f32 %v4066_v37 }
 0x971   : > { %vm3286_vm12 = vmor %vm3284_vm11, %vm3285_vm10 }
 0x972   : > { %v3280_v19 = vmul.f32 %v4066_v37, %v3279_v38 }
 0x974   : > { %v3281_v39 = vmul.f32 0.5, %v3280_v19 }
 0x976   : > { %v3282_v41 = vsub.f32 1.5, %v3281_v39 }
 0x978   : > { %v3283_v43 = vmul.f32 %v4066_v37, %v3282_v41 }
 0x97a   : > { %v3287_v42 = vsel %vm3286_vm12, %v4066_v37, %v3283_v43 }
 0x97b   : > { %v3288_v26 = vmul.f32 %v3287_v42, %v3275_v24  ;;  %v3289_v11 = vmul.f32 %v3287_v42, %v3276_v48 }
 0x97d   : > { %v3300_v49 = vmul.f32 %v3293_v13, %v3288_v26  ;;  %v3301_v31 = vmul.f32 %v4947_v17, %v3289_v11  ;;  %v3342_v17 = vpop.permute.xlu0 %3341 }
 0x97e   : > { %v3344_v21 = vperm.slane %v3342_v17, 0 }
 0x97f   : > { %v3315_v55 = vadd.f32 %v4943_v16, %v3300_v49  ;;  %v3316_v46 = vadd.f32 %v3313_v40, %v3301_v31  ;;  %v2954_v16 = vadd.f32 %v2953_v59, %v2952_v56 }
 0x981   : > { %v3329_v32 = vmul.f32 %v4953_v45, %v3315_v55  ;;  %v3330_v50 = vmul.f32 %v3327_v44, %v3316_v46  ;;  %v2962_v63 = vadd.f32 %v2961_v27, %v2954_v16 }
 0x983   : > { %v3331_v51 = vadd.f32 %v3330_v50, %v3329_v32  ;;  %v2963_v35 = vmul.f32 %v2962_v63, %v1708_v0 }
 0x985   : > { %v3332_v58 = vrot.slane %v3331_v51, 4 }
 0x987   : > { %v3333_v9 = vadd.f32 %v3332_v58, %v3331_v51 }
 0x989   : > { %v3334_v54 = vrot.slane %v3333_v9, 2 }
 0x98b   : > { %v3335_v60 = vadd.f32 %v3334_v54, %v3333_v9 }
 0x98d   : > { %v3336_v25 = vrot.slane %v3335_v60, 1 }
 0x98f   : > { %v3337_v62 = vadd.f32 %v3336_v25, %v3335_v60 }
 0x991   : > { %v3345_v45 = vadd.f32 %v3344_v21, %v3337_v62 }
 0x993   : > { %v3346_v52 = vmul.f32 %v3345_v45, %v1708_v0 }
 0x995   : > { %v3348_v2 = vrot.slane %v3346_v52, 7 }
 0x997   : > { %v3351_v3 = vsel %vm3350_vm13, %v2963_v35, %v3348_v2 }
 0x998   : > { %3352 = vst [vmem:[%s1156_s26] sm:$0x3] %v3351_v3 }
 0x999 PF: > { %p3958_p5 = scmp.ge.s32.totalorder %s4165_s14, 2  ;;  %s3407_s15 = sand.u32 1, %s4153_s8  }
 0x99a   : > { %s3408_s17 = scalar_lea.sflag [#allocation6], %s3407_s15 }
 0x99b   : > { %p3952_p13 = pnand %p3958_p5, %p4425_p6 }
 0x99d   : > { %p3953_p0 = pneg %p3952_p13 }
 0x99f   : > { %4144 = dma.done.wait (%p3953_p0), %s3408_s17, 256  }
 0x9a0   : > { %4146 = vsyncadd (%p3953_p0), %s3408_s17, 4294967040  ;;  %s3418_s25 = scalar_lea.sflag [#allocation8], %s3407_s15 }
 0x9a1   : > { %4148 = dma.done.wait (%p3953_p0), %s3418_s25, 16  }
 0x9a2   : > { %4150 = vsyncadd (%p3953_p0), %s3418_s25, 4294967280  ;;  %p89_p1 = scmp.ge.s32.totalorder %s4408_s7, 4   ;;  %s5113_s8 = smov %s4157_s16 }
 0x9a3   : > { %s5114_s16 = smov %s4161_s18  ;;  %s5115_s18 = smov %s4419_s9 }
 0x9a4   : > { %s5116_s14 = smov %s4408_s7  ;;  %91 = sbr.rel (!%p89_p1) target bundleno = 76 (0x4c), region = 321 }
 0x9a9   :  { %3430 = vsyncpa [#allocation6], 1 }
 0x9aa   :  { %3432 = vsyncpa [#allocation6 + $0x1], 1 }
 0x9ab   :  { %3433 = vsyncpa [#allocation8], 1 }
 0x9ac   :  { %3435 = vsyncpa [#allocation8 + $0x1], 1 }

</bundles_post_ra>
